<compile_context>
chip_gen: v5e
topology: v5e:2x2
jax: 0.10.0
libtpu: 0.0.40
codegen_flags: <defaults>
</compile_context>

<pallas_src>
import math

import jax
import jax.numpy as jnp
from jax import lax
from jax.experimental import pallas as pl
from jax.experimental.pallas import tpu as pltpu

# ---- tiny synthetic BERT config (stands in for bert-base-chinese) ----
VOCAB = 100
TYPE_VOCAB = 2
MAX_POS = 16
HIDDEN = 128                 # lane-dense (multiple of 128)
NUM_HEADS = 4
HEAD_DIM = HIDDEN // NUM_HEADS
INTER = 256
NUM_LAYERS = 2
NUM_CLASSES = 2
PAD_CLASSES = 128            # classifier padded to a full 128-lane store
BATCH = 2
SEQ = 8
BS = BATCH * SEQ
LN_EPS = 1e-12


def _layernorm(x, g, b, eps=LN_EPS):
    mu = jnp.mean(x, axis=-1, keepdims=True)
    var = jnp.mean((x - mu) ** 2, axis=-1, keepdims=True)
    return (x - mu) * lax.rsqrt(var + eps) * g + b


def _gelu(x):
    # TODO(synk): HF BERT uses exact erf-GELU; tanh approximation used here
    # (keeps the op on EUP / guaranteed Mosaic lowering, tiny numerical drift).
    return 0.5 * x * (1.0 + jnp.tanh(0.7978845608028654 * (x + 0.044715 * x * x * x)))


def bert_kernel(x_ref, mask_ref, emb_g_ref, emb_b_ref,
                wqkv_ref, bqkv_ref, wo_ref, bo_ref,
                ln1_g_ref, ln1_b_ref, w1_ref, b1_ref, w2_ref, b2_ref,
                ln2_g_ref, ln2_b_ref, wp_ref, bp_ref, wc_ref, bc_ref,
                hid_ref, pooled_ref, logits_ref):
    # Embedding LayerNorm straight into the register-resident hidden slab.
    h = _layernorm(x_ref[...], emb_g_ref[...], emb_b_ref[...])       # (BS, H) f32
    mask = mask_ref[...]                                              # (BS, BS) f32

    for l in range(NUM_LAYERS):          # static unroll: LLO sees across layers
        # ---- fused QKV projection (softmax scale pre-folded into Wq) ----
        qkv = jnp.dot(h.astype(jnp.bfloat16), wqkv_ref[l],
                      preferred_element_type=jnp.float32) + bqkv_ref[l]
        qkv16 = qkv.astype(jnp.bfloat16)                              # (BS, 3H)

        # Head split: one lane slice per (tensor, head), stacked on a leading
        # group axis.  Batches stay interleaved on the sublane axis; the
        # block-diagonal mask removes cross-sequence attention exactly.
        def heads(base):
            return jnp.concatenate(
                [qkv16[:, base + hh * HEAD_DIM: base + (hh + 1) * HEAD_DIM][None]
                 for hh in range(NUM_HEADS)], axis=0)                 # (NH, BS, HD)

        qg = heads(0)
        kg = heads(HIDDEN)
        vg = heads(2 * HIDDEN)

        # ---- all heads at once (flash-style batched einsums) ----
        s = jnp.einsum('gqd,gkd->gqk', qg, kg,
                       preferred_element_type=jnp.float32)            # (NH, BS, BS)
        s = s + mask                                                  # added once
        s_max = jnp.max(s, axis=-1, keepdims=True)
        e = jnp.exp(s - s_max)
        inv = pl.reciprocal(jnp.sum(e, axis=-1, keepdims=True), approx=True)
        p_attn = (e * inv).astype(jnp.bfloat16)                       # f32 softmax math
        ctx = jnp.einsum('gqk,gkd->gqd', p_attn, vg,
                         preferred_element_type=jnp.float32)          # (NH, BS, HD)
        ctx16 = ctx.astype(jnp.bfloat16)

        # ---- output projection: heads back onto lanes, ONE K=128 dot ----
        ctx2d = jnp.concatenate([ctx16[hh] for hh in range(NUM_HEADS)],
                                axis=1)                               # (BS, H)
        attn = jnp.dot(ctx2d, wo_ref[l],
                       preferred_element_type=jnp.float32) + bo_ref[l]
        h1 = _layernorm(h + attn, ln1_g_ref[l], ln1_b_ref[l])

        # ---- FFN on the flattened slab ----
        ff = jnp.dot(h1.astype(jnp.bfloat16), w1_ref[l],
                     preferred_element_type=jnp.float32) + b1_ref[l]
        ff = _gelu(ff)
        ff = jnp.dot(ff.astype(jnp.bfloat16), w2_ref[l],
                     preferred_element_type=jnp.float32) + b2_ref[l]
        h = _layernorm(h1 + ff, ln2_g_ref[l], ln2_b_ref[l])

    # ---- epilogue: hidden state + fused pooler / classifier ----
    hid_ref[...] = h
    # CLS rows (token 0 of each sequence) via one strided sublane load.
    cls = hid_ref[pl.ds(0, BATCH, stride=SEQ), :]                     # (B, H)
    pooled = jnp.tanh(
        jnp.dot(cls.astype(jnp.bfloat16), wp_ref[...],
                preferred_element_type=jnp.float32) + bp_ref[...])
    pooled_ref[...] = pooled
    # TODO(synk): nn.Dropout(0.1) on pooled_output applied as identity (inference).
    logits_ref[...] = (
        jnp.dot(pooled.astype(jnp.bfloat16), wc_ref[...],
                preferred_element_type=jnp.float32) + bc_ref[...])


def bert_forward_call(x_flat, mask2d, p):
    def full(shape):
        nd = len(shape)
        return pl.BlockSpec(shape, lambda i, _nd=nd: (0,) * _nd)

    operands = (x_flat, mask2d, p["emb_ln_g"], p["emb_ln_b"],
                p["w_qkv"], p["b_qkv"], p["wo"], p["bo"],
                p["ln1_g"], p["ln1_b"], p["w1"], p["b1"], p["w2"], p["b2"],
                p["ln2_g"], p["ln2_b"], p["wp"], p["bp"], p["wc_pad"], p["bc_pad"])

    out_shapes = (jax.ShapeDtypeStruct((BS, HIDDEN), jnp.float32),
                  jax.ShapeDtypeStruct((BATCH, HIDDEN), jnp.float32),
                  jax.ShapeDtypeStruct((BATCH, PAD_CLASSES), jnp.float32))

    # Advisory cost hint so XLA schedules surrounding ops around this tiny call.
    flops = NUM_LAYERS * (2 * BS * HIDDEN * 3 * HIDDEN            # QKV
                          + 2 * 2 * NUM_HEADS * BS * BS * HEAD_DIM  # scores+ctx
                          + 2 * BS * HIDDEN * HIDDEN              # Wo
                          + 2 * 2 * BS * HIDDEN * INTER)          # FFN
    flops += 2 * 2 * BATCH * HIDDEN * HIDDEN                      # pooler+classifier
    transcendentals = NUM_LAYERS * (NUM_HEADS * BS * BS + NUM_HEADS * BS
                                    + BS * INTER) + BATCH * HIDDEN
    bytes_accessed = (sum(int(a.size) * a.dtype.itemsize for a in operands)
                      + sum(int(math.prod(s.shape)) * 4 for s in out_shapes))

    grid_spec = pltpu.PrefetchScalarGridSpec(
        num_scalar_prefetch=0,
        grid=(1,),
        in_specs=[full(a.shape) for a in operands],
        out_specs=[full(s.shape) for s in out_shapes],
    )
    return pl.pallas_call(
        bert_kernel,
        out_shape=out_shapes,
        grid_spec=grid_spec,
        compiler_params=pltpu.CompilerParams(dimension_semantics=("arbitrary",)),
        cost_estimate=pl.CostEstimate(flops=int(flops),
                                      transcendentals=int(transcendentals),
                                      bytes_accessed=int(bytes_accessed)),
    )(*operands)


def init_params(key):
    ks = jax.random.split(key, 12)

    def nrm(k, shape, std=0.02):
        return jax.random.normal(k, shape, jnp.float32) * std

    bf16 = jnp.bfloat16

    # fused QKV; 1/sqrt(HEAD_DIM) folded into the Q block (one-time transform)
    w_qkv = nrm(ks[3], (NUM_LAYERS, HIDDEN, 3 * HIDDEN))
    scale = 1.0 / math.sqrt(HEAD_DIM)
    w_qkv = w_qkv.at[:, :, :HIDDEN].multiply(scale)
    b_qkv = jnp.zeros((NUM_LAYERS, 1, 3 * HIDDEN), jnp.float32)
    b_qkv = b_qkv.at[:, :, :HIDDEN].multiply(scale)   # zeros; kept for clarity

    p = {
        "word_emb": nrm(ks[0], (VOCAB, HIDDEN)),
        "pos_emb": nrm(ks[1], (MAX_POS, HIDDEN)),
        "type_emb": nrm(ks[2], (TYPE_VOCAB, HIDDEN)),
        "emb_ln_g": jnp.ones((1, HIDDEN), jnp.float32),
        "emb_ln_b": jnp.zeros((1, HIDDEN), jnp.float32),
        "w_qkv": w_qkv.astype(bf16),
        "b_qkv": b_qkv,
        "wo": nrm(ks[4], (NUM_LAYERS, HIDDEN, HIDDEN)).astype(bf16),
        "bo": jnp.zeros((NUM_LAYERS, 1, HIDDEN), jnp.float32),
        "ln1_g": jnp.ones((NUM_LAYERS, 1, HIDDEN), jnp.float32),
        "ln1_b": jnp.zeros((NUM_LAYERS, 1, HIDDEN), jnp.float32),
        "w1": nrm(ks[5], (NUM_LAYERS, HIDDEN, INTER)).astype(bf16),
        "b1": jnp.zeros((NUM_LAYERS, 1, INTER), jnp.float32),
        "w2": nrm(ks[6], (NUM_LAYERS, INTER, HIDDEN)).astype(bf16),
        "b2": jnp.zeros((NUM_LAYERS, 1, HIDDEN), jnp.float32),
        "ln2_g": jnp.ones((NUM_LAYERS, 1, HIDDEN), jnp.float32),
        "ln2_b": jnp.zeros((NUM_LAYERS, 1, HIDDEN), jnp.float32),
        "wp": nrm(ks[7], (HIDDEN, HIDDEN)).astype(bf16),
        "bp": jnp.zeros((1, HIDDEN), jnp.float32),
    }
    # classifier: xavier_normal_ weight, zero bias (as in _init_weights),
    # padded to 128 output lanes (real logits are the first NUM_CLASSES cols).
    xavier_std = math.sqrt(2.0 / (HIDDEN + NUM_CLASSES))
    wc = jax.random.normal(ks[8], (HIDDEN, NUM_CLASSES), jnp.float32) * xavier_std
    p["wc_pad"] = (jnp.zeros((HIDDEN, PAD_CLASSES), jnp.float32)
                   .at[:, :NUM_CLASSES].set(wc).astype(bf16))
    p["bc_pad"] = jnp.zeros((1, PAD_CLASSES), jnp.float32)
    return p


def base_bert_forward(params, input_ids, attention_mask=None, token_type_ids=None):
    if attention_mask is None:
        attention_mask = jnp.ones_like(input_ids)
    if token_type_ids is None:
        token_type_ids = jnp.zeros_like(input_ids)
    pos_ids = jnp.arange(SEQ, dtype=jnp.int32)
    x = (jnp.take(params["word_emb"], input_ids, axis=0)
         + jnp.take(params["pos_emb"], pos_ids, axis=0)[None, :, :]
         + jnp.take(params["type_emb"], token_type_ids, axis=0))        # (B,S,H)
    x_flat = x.reshape(BS, HIDDEN)

    # Combined (B*S, B*S) additive mask: HF-style -10000 on padded keys within
    # a sequence and -1e9 on cross-sequence pairs.  This makes a single
    # block-diagonal attention over the flattened token slab exactly equal to
    # per-sequence attention (exp of the cross terms underflows to 0.0 in f32).
    key_pad = (1.0 - attention_mask.astype(jnp.float32)) * -10000.0     # (B,S)
    key_pad_flat = key_pad.reshape(BS)
    batch_of = jnp.repeat(jnp.arange(BATCH), SEQ)                        # (B*S,)
    same_batch = (batch_of[:, None] == batch_of[None, :]).astype(jnp.float32)
    mask2d = same_batch * key_pad_flat[None, :] + (1.0 - same_batch) * (-1e9)

    hidden_flat, pooled, logits_pad = bert_forward_call(x_flat, mask2d, params)
    hidden = hidden_flat.reshape(BATCH, SEQ, HIDDEN)
    logits = logits_pad[:, :NUM_CLASSES]
    return {"logits": logits, "hidden_states": hidden, "pooled_output": pooled}


if __name__ == "__main__":
    key = jax.random.PRNGKey(0)
    pkey, ikey = jax.random.split(key)
    params = init_params(pkey)

    input_ids = jax.random.randint(ikey, (BATCH, SEQ), 0, VOCAB, dtype=jnp.int32)
    attention_mask = jnp.ones((BATCH, SEQ), jnp.int32)
    token_type_ids = jnp.zeros((BATCH, SEQ), jnp.int32)

    out = base_bert_forward(params, input_ids, attention_mask, token_type_ids)
    jax.block_until_ready(out)

    assert out["logits"].shape == (BATCH, NUM_CLASSES)
    assert out["hidden_states"].shape == (BATCH, SEQ, HIDDEN)
    assert out["pooled_output"].shape == (BATCH, HIDDEN)
    assert bool(jnp.all(jnp.isfinite(out["logits"])))
    assert bool(jnp.all(jnp.isfinite(out["hidden_states"])))
    assert bool(jnp.all(jnp.isfinite(out["pooled_output"])))
    print("KERNEL_OK")
</pallas_src>

<mosaic_0001>
module attributes {stable_mosaic.version = 11 : i64} {
  func.func @bert_kernel(%arg0: i32, %arg1: memref<16x128xf32, #tpu.memory_space<vmem>>, %arg2: memref<16x16xf32, #tpu.memory_space<vmem>>, %arg3: memref<1x128xf32, #tpu.memory_space<vmem>>, %arg4: memref<1x128xf32, #tpu.memory_space<vmem>>, %arg5: memref<2x128x384xbf16, #tpu.memory_space<vmem>>, %arg6: memref<2x1x384xf32, #tpu.memory_space<vmem>>, %arg7: memref<2x128x128xbf16, #tpu.memory_space<vmem>>, %arg8: memref<2x1x128xf32, #tpu.memory_space<vmem>>, %arg9: memref<2x1x128xf32, #tpu.memory_space<vmem>>, %arg10: memref<2x1x128xf32, #tpu.memory_space<vmem>>, %arg11: memref<2x128x256xbf16, #tpu.memory_space<vmem>>, %arg12: memref<2x1x256xf32, #tpu.memory_space<vmem>>, %arg13: memref<2x256x128xbf16, #tpu.memory_space<vmem>>, %arg14: memref<2x1x128xf32, #tpu.memory_space<vmem>>, %arg15: memref<2x1x128xf32, #tpu.memory_space<vmem>>, %arg16: memref<2x1x128xf32, #tpu.memory_space<vmem>>, %arg17: memref<128x128xbf16, #tpu.memory_space<vmem>>, %arg18: memref<1x128xf32, #tpu.memory_space<vmem>>, %arg19: memref<128x128xbf16, #tpu.memory_space<vmem>>, %arg20: memref<1x128xf32, #tpu.memory_space<vmem>>, %arg21: memref<16x128xf32, #tpu.memory_space<vmem>>, %arg22: memref<2x128xf32, #tpu.memory_space<vmem>>, %arg23: memref<2x128xf32, #tpu.memory_space<vmem>>) attributes {dimension_semantics = [#tpu.dimension_semantics<arbitrary>], iteration_bounds = array<i64: 1>, scalar_prefetch = 0 : i64, scratch_operands = 0 : i64, tpu.core_type = #tpu.core_type<tc>, window_params = [{pipeline_mode = #tpu.pipeline_mode<synchronous>, transform_indices = @transform_0, window_bounds = array<i64: 16, 128>}, {pipeline_mode = #tpu.pipeline_mode<synchronous>, transform_indices = @transform_1, window_bounds = array<i64: 16, 16>}, {pipeline_mode = #tpu.pipeline_mode<synchronous>, transform_indices = @transform_2, window_bounds = array<i64: 1, 128>}, {pipeline_mode = #tpu.pipeline_mode<synchronous>, transform_indices = @transform_3, window_bounds = array<i64: 1, 128>}, {pipeline_mode = #tpu.pipeline_mode<synchronous>, transform_indices = @transform_4, window_bounds = array<i64: 2, 128, 384>}, {pipeline_mode = #tpu.pipeline_mode<synchronous>, transform_indices = @transform_5, window_bounds = array<i64: 2, 1, 384>}, {pipeline_mode = #tpu.pipeline_mode<synchronous>, transform_indices = @transform_6, window_bounds = array<i64: 2, 128, 128>}, {pipeline_mode = #tpu.pipeline_mode<synchronous>, transform_indices = @transform_7, window_bounds = array<i64: 2, 1, 128>}, {pipeline_mode = #tpu.pipeline_mode<synchronous>, transform_indices = @transform_8, window_bounds = array<i64: 2, 1, 128>}, {pipeline_mode = #tpu.pipeline_mode<synchronous>, transform_indices = @transform_9, window_bounds = array<i64: 2, 1, 128>}, {pipeline_mode = #tpu.pipeline_mode<synchronous>, transform_indices = @transform_10, window_bounds = array<i64: 2, 128, 256>}, {pipeline_mode = #tpu.pipeline_mode<synchronous>, transform_indices = @transform_11, window_bounds = array<i64: 2, 1, 256>}, {pipeline_mode = #tpu.pipeline_mode<synchronous>, transform_indices = @transform_12, window_bounds = array<i64: 2, 256, 128>}, {pipeline_mode = #tpu.pipeline_mode<synchronous>, transform_indices = @transform_13, window_bounds = array<i64: 2, 1, 128>}, {pipeline_mode = #tpu.pipeline_mode<synchronous>, transform_indices = @transform_14, window_bounds = array<i64: 2, 1, 128>}, {pipeline_mode = #tpu.pipeline_mode<synchronous>, transform_indices = @transform_15, window_bounds = array<i64: 2, 1, 128>}, {pipeline_mode = #tpu.pipeline_mode<synchronous>, transform_indices = @transform_16, window_bounds = array<i64: 128, 128>}, {pipeline_mode = #tpu.pipeline_mode<synchronous>, transform_indices = @transform_17, window_bounds = array<i64: 1, 128>}, {pipeline_mode = #tpu.pipeline_mode<synchronous>, transform_indices = @transform_18, window_bounds = array<i64: 128, 128>}, {pipeline_mode = #tpu.pipeline_mode<synchronous>, transform_indices = @transform_19, window_bounds = array<i64: 1, 128>}, {pipeline_mode = #tpu.pipeline_mode<synchronous>, transform_indices = @transform_20, window_bounds = array<i64: 16, 128>}, {pipeline_mode = #tpu.pipeline_mode<synchronous>, transform_indices = @transform_21, window_bounds = array<i64: 2, 128>}, {pipeline_mode = #tpu.pipeline_mode<synchronous>, transform_indices = @transform_22, window_bounds = array<i64: 2, 128>}]} {
    %c0 = arith.constant 0 : index
    %c0_0 = arith.constant 0 : index
    %0 = vector.load %arg1[%c0, %c0_0] : memref<16x128xf32, #tpu.memory_space<vmem>>, vector<16x128xf32>
    %c0_1 = arith.constant 0 : index
    %c0_2 = arith.constant 0 : index
    %1 = vector.load %arg3[%c0_1, %c0_2] : memref<1x128xf32, #tpu.memory_space<vmem>>, vector<1x128xf32>
    %c0_3 = arith.constant 0 : index
    %c0_4 = arith.constant 0 : index
    %2 = vector.load %arg4[%c0_3, %c0_4] : memref<1x128xf32, #tpu.memory_space<vmem>>, vector<1x128xf32>
    %cst = arith.constant dense<0.000000e+00> : vector<16xf32>
    %3 = vector.multi_reduction <add>, %0, %cst [1] : vector<16x128xf32> to vector<16xf32>
    %4 = vector.shape_cast %3 : vector<16xf32> to vector<16x1xf32>
    %cst_5 = arith.constant 1.280000e+02 : f32
    %5 = vector.broadcast %cst_5 : f32 to vector<16x1xf32>
    %6 = arith.divf %4, %5 : vector<16x1xf32>
    %7 = vector.broadcast %6 : vector<16x1xf32> to vector<16x128xf32>
    %8 = arith.subf %0, %7 : vector<16x128xf32>
    %9 = arith.mulf %8, %8 : vector<16x128xf32>
    %cst_6 = arith.constant dense<0.000000e+00> : vector<16xf32>
    %10 = vector.multi_reduction <add>, %9, %cst_6 [1] : vector<16x128xf32> to vector<16xf32>
    %11 = vector.shape_cast %10 : vector<16xf32> to vector<16x1xf32>
    %cst_7 = arith.constant 1.280000e+02 : f32
    %12 = vector.broadcast %cst_7 : f32 to vector<16x1xf32>
    %13 = arith.divf %11, %12 : vector<16x1xf32>
    %14 = vector.broadcast %6 : vector<16x1xf32> to vector<16x128xf32>
    %15 = arith.subf %0, %14 : vector<16x128xf32>
    %cst_8 = arith.constant 9.99999996E-13 : f32
    %16 = vector.broadcast %cst_8 : f32 to vector<16x1xf32>
    %17 = arith.addf %13, %16 : vector<16x1xf32>
    %18 = math.rsqrt %17 : vector<16x1xf32>
    %19 = vector.broadcast %18 : vector<16x1xf32> to vector<16x128xf32>
    %20 = arith.mulf %15, %19 : vector<16x128xf32>
    %21 = vector.broadcast %1 : vector<1x128xf32> to vector<16x128xf32>
    %22 = arith.mulf %20, %21 : vector<16x128xf32>
    %23 = vector.broadcast %2 : vector<1x128xf32> to vector<16x128xf32>
    %24 = arith.addf %22, %23 : vector<16x128xf32>
    %c0_9 = arith.constant 0 : index
    %c0_10 = arith.constant 0 : index
    %25 = vector.load %arg2[%c0_9, %c0_10] : memref<16x16xf32, #tpu.memory_space<vmem>>, vector<16x16xf32>
    %26 = arith.truncf %24 : vector<16x128xf32> to vector<16x128xbf16>
    %c0_11 = arith.constant 0 : index
    %c0_12 = arith.constant 0 : index
    %c0_13 = arith.constant 0 : index
    %27 = vector.load %arg5[%c0_11, %c0_12, %c0_13] : memref<2x128x384xbf16, #tpu.memory_space<vmem>>, vector<1x128x384xbf16>
    %28 = vector.shape_cast %27 : vector<1x128x384xbf16> to vector<128x384xbf16>
    %cst_14 = arith.constant dense<0.000000e+00> : vector<16x384xf32>
    %29 = tpu.matmul %26, %28, %cst_14 {dimension_numbers = #tpu.dot_dimension_numbers<[1], [0], [0], [1], [0, 0, 1, 1], [], []>} : vector<16x128xbf16>, vector<128x384xbf16>, vector<16x384xf32> -> vector<16x384xf32>
    %c0_15 = arith.constant 0 : index
    %c0_16 = arith.constant 0 : index
    %c0_17 = arith.constant 0 : index
    %30 = vector.load %arg6[%c0_15, %c0_16, %c0_17] : memref<2x1x384xf32, #tpu.memory_space<vmem>>, vector<1x1x384xf32>
    %31 = vector.shape_cast %30 : vector<1x1x384xf32> to vector<1x384xf32>
    %32 = vector.broadcast %31 : vector<1x384xf32> to vector<16x384xf32>
    %33 = arith.addf %29, %32 : vector<16x384xf32>
    %34 = arith.truncf %33 : vector<16x384xf32> to vector<16x384xbf16>
    %35 = vector.extract_strided_slice %34 {offsets = [0, 0], sizes = [16, 32], strides = [1, 1]} : vector<16x384xbf16> to vector<16x32xbf16>
    %36 = vector.shape_cast %35 : vector<16x32xbf16> to vector<1x16x32xbf16>
    %37 = vector.extract_strided_slice %34 {offsets = [0, 32], sizes = [16, 32], strides = [1, 1]} : vector<16x384xbf16> to vector<16x32xbf16>
    %38 = vector.shape_cast %37 : vector<16x32xbf16> to vector<1x16x32xbf16>
    %39 = vector.extract_strided_slice %34 {offsets = [0, 64], sizes = [16, 32], strides = [1, 1]} : vector<16x384xbf16> to vector<16x32xbf16>
    %40 = vector.shape_cast %39 : vector<16x32xbf16> to vector<1x16x32xbf16>
    %41 = vector.extract_strided_slice %34 {offsets = [0, 96], sizes = [16, 32], strides = [1, 1]} : vector<16x384xbf16> to vector<16x32xbf16>
    %42 = vector.shape_cast %41 : vector<16x32xbf16> to vector<1x16x32xbf16>
    %43 = tpu.concatenate %36, %38, %40, %42 in 0 : vector<1x16x32xbf16>, vector<1x16x32xbf16>, vector<1x16x32xbf16>, vector<1x16x32xbf16> -> vector<4x16x32xbf16>
    %44 = vector.extract_strided_slice %34 {offsets = [0, 128], sizes = [16, 32], strides = [1, 1]} : vector<16x384xbf16> to vector<16x32xbf16>
    %45 = vector.shape_cast %44 : vector<16x32xbf16> to vector<1x16x32xbf16>
    %46 = vector.extract_strided_slice %34 {offsets = [0, 160], sizes = [16, 32], strides = [1, 1]} : vector<16x384xbf16> to vector<16x32xbf16>
    %47 = vector.shape_cast %46 : vector<16x32xbf16> to vector<1x16x32xbf16>
    %48 = vector.extract_strided_slice %34 {offsets = [0, 192], sizes = [16, 32], strides = [1, 1]} : vector<16x384xbf16> to vector<16x32xbf16>
    %49 = vector.shape_cast %48 : vector<16x32xbf16> to vector<1x16x32xbf16>
    %50 = vector.extract_strided_slice %34 {offsets = [0, 224], sizes = [16, 32], strides = [1, 1]} : vector<16x384xbf16> to vector<16x32xbf16>
    %51 = vector.shape_cast %50 : vector<16x32xbf16> to vector<1x16x32xbf16>
    %52 = tpu.concatenate %45, %47, %49, %51 in 0 : vector<1x16x32xbf16>, vector<1x16x32xbf16>, vector<1x16x32xbf16>, vector<1x16x32xbf16> -> vector<4x16x32xbf16>
    %53 = vector.extract_strided_slice %34 {offsets = [0, 256], sizes = [16, 32], strides = [1, 1]} : vector<16x384xbf16> to vector<16x32xbf16>
    %54 = vector.shape_cast %53 : vector<16x32xbf16> to vector<1x16x32xbf16>
    %55 = vector.extract_strided_slice %34 {offsets = [0, 288], sizes = [16, 32], strides = [1, 1]} : vector<16x384xbf16> to vector<16x32xbf16>
    %56 = vector.shape_cast %55 : vector<16x32xbf16> to vector<1x16x32xbf16>
    %57 = vector.extract_strided_slice %34 {offsets = [0, 320], sizes = [16, 32], strides = [1, 1]} : vector<16x384xbf16> to vector<16x32xbf16>
    %58 = vector.shape_cast %57 : vector<16x32xbf16> to vector<1x16x32xbf16>
    %59 = vector.extract_strided_slice %34 {offsets = [0, 352], sizes = [16, 32], strides = [1, 1]} : vector<16x384xbf16> to vector<16x32xbf16>
    %60 = vector.shape_cast %59 : vector<16x32xbf16> to vector<1x16x32xbf16>
    %61 = tpu.concatenate %54, %56, %58, %60 in 0 : vector<1x16x32xbf16>, vector<1x16x32xbf16>, vector<1x16x32xbf16>, vector<1x16x32xbf16> -> vector<4x16x32xbf16>
    "tpu.trace_start"() <{level = 10 : i32, message = "gqd,gkd->gqk"}> : () -> ()
    %cst_18 = arith.constant dense<0.000000e+00> : vector<4x16x16xf32>
    %62 = tpu.matmul %43, %52, %cst_18 {dimension_numbers = #tpu.dot_dimension_numbers<[2], [2], [1], [1], [0, 0, 0, 1, 1, 1], [0], [0]>} : vector<4x16x32xbf16>, vector<4x16x32xbf16>, vector<4x16x16xf32> -> vector<4x16x16xf32>
    "tpu.trace_stop"() : () -> ()
    %63 = vector.shape_cast %25 : vector<16x16xf32> to vector<1x16x16xf32>
    %64 = vector.broadcast %63 : vector<1x16x16xf32> to vector<4x16x16xf32>
    %65 = arith.addf %62, %64 : vector<4x16x16xf32>
    %cst_19 = arith.constant dense<0xFF800000> : vector<4x16xf32>
    %66 = vector.multi_reduction <maximumf>, %65, %cst_19 [2] : vector<4x16x16xf32> to vector<4x16xf32>
    %67 = vector.shape_cast %66 : vector<4x16xf32> to vector<4x16x1xf32>
    %68 = vector.broadcast %67 : vector<4x16x1xf32> to vector<4x16x16xf32>
    %69 = arith.subf %65, %68 : vector<4x16x16xf32>
    %70 = math.exp %69 : vector<4x16x16xf32>
    %cst_20 = arith.constant dense<0.000000e+00> : vector<4x16xf32>
    %71 = vector.multi_reduction <add>, %70, %cst_20 [2] : vector<4x16x16xf32> to vector<4x16xf32>
    %72 = vector.shape_cast %71 : vector<4x16xf32> to vector<4x16x1xf32>
    %73 = tpu.reciprocal %72 {approx = true} : vector<4x16x1xf32> -> vector<4x16x1xf32>
    %74 = vector.broadcast %73 : vector<4x16x1xf32> to vector<4x16x16xf32>
    %75 = arith.mulf %70, %74 : vector<4x16x16xf32>
    %76 = arith.truncf %75 : vector<4x16x16xf32> to vector<4x16x16xbf16>
    "tpu.trace_start"() <{level = 10 : i32, message = "gqk,gkd->gqd"}> : () -> ()
    %cst_21 = arith.constant dense<0.000000e+00> : vector<4x16x32xf32>
    %77 = tpu.matmul %76, %61, %cst_21 {dimension_numbers = #tpu.dot_dimension_numbers<[2], [1], [1], [2], [0, 0, 0, 1, 1, 2], [0], [0]>} : vector<4x16x16xbf16>, vector<4x16x32xbf16>, vector<4x16x32xf32> -> vector<4x16x32xf32>
    "tpu.trace_stop"() : () -> ()
    %78 = arith.truncf %77 : vector<4x16x32xf32> to vector<4x16x32xbf16>
    %79 = vector.extract_strided_slice %78 {offsets = [0, 0, 0], sizes = [1, 16, 32], strides = [1, 1, 1]} : vector<4x16x32xbf16> to vector<1x16x32xbf16>
    %80 = vector.shape_cast %79 : vector<1x16x32xbf16> to vector<16x32xbf16>
    %81 = vector.extract_strided_slice %78 {offsets = [1, 0, 0], sizes = [1, 16, 32], strides = [1, 1, 1]} : vector<4x16x32xbf16> to vector<1x16x32xbf16>
    %82 = vector.shape_cast %81 : vector<1x16x32xbf16> to vector<16x32xbf16>
    %83 = vector.extract_strided_slice %78 {offsets = [2, 0, 0], sizes = [1, 16, 32], strides = [1, 1, 1]} : vector<4x16x32xbf16> to vector<1x16x32xbf16>
    %84 = vector.shape_cast %83 : vector<1x16x32xbf16> to vector<16x32xbf16>
    %85 = vector.extract_strided_slice %78 {offsets = [3, 0, 0], sizes = [1, 16, 32], strides = [1, 1, 1]} : vector<4x16x32xbf16> to vector<1x16x32xbf16>
    %86 = vector.shape_cast %85 : vector<1x16x32xbf16> to vector<16x32xbf16>
    %87 = tpu.concatenate %80, %82, %84, %86 in 1 : vector<16x32xbf16>, vector<16x32xbf16>, vector<16x32xbf16>, vector<16x32xbf16> -> vector<16x128xbf16>
    %c0_22 = arith.constant 0 : index
    %c0_23 = arith.constant 0 : index
    %c0_24 = arith.constant 0 : index
    %88 = vector.load %arg7[%c0_22, %c0_23, %c0_24] : memref<2x128x128xbf16, #tpu.memory_space<vmem>>, vector<1x128x128xbf16>
    %89 = vector.shape_cast %88 : vector<1x128x128xbf16> to vector<128x128xbf16>
    %cst_25 = arith.constant dense<0.000000e+00> : vector<16x128xf32>
    %90 = tpu.matmul %87, %89, %cst_25 {dimension_numbers = #tpu.dot_dimension_numbers<[1], [0], [0], [1], [0, 0, 1, 1], [], []>} : vector<16x128xbf16>, vector<128x128xbf16>, vector<16x128xf32> -> vector<16x128xf32>
    %c0_26 = arith.constant 0 : index
    %c0_27 = arith.constant 0 : index
    %c0_28 = arith.constant 0 : index
    %91 = vector.load %arg8[%c0_26, %c0_27, %c0_28] : memref<2x1x128xf32, #tpu.memory_space<vmem>>, vector<1x1x128xf32>
    %92 = vector.shape_cast %91 : vector<1x1x128xf32> to vector<1x128xf32>
    %93 = vector.broadcast %92 : vector<1x128xf32> to vector<16x128xf32>
    %94 = arith.addf %90, %93 : vector<16x128xf32>
    %95 = arith.addf %24, %94 : vector<16x128xf32>
    %c0_29 = arith.constant 0 : index
    %c0_30 = arith.constant 0 : index
    %c0_31 = arith.constant 0 : index
    %96 = vector.load %arg9[%c0_29, %c0_30, %c0_31] : memref<2x1x128xf32, #tpu.memory_space<vmem>>, vector<1x1x128xf32>
    %97 = vector.shape_cast %96 : vector<1x1x128xf32> to vector<1x128xf32>
    %c0_32 = arith.constant 0 : index
    %c0_33 = arith.constant 0 : index
    %c0_34 = arith.constant 0 : index
    %98 = vector.load %arg10[%c0_32, %c0_33, %c0_34] : memref<2x1x128xf32, #tpu.memory_space<vmem>>, vector<1x1x128xf32>
    %99 = vector.shape_cast %98 : vector<1x1x128xf32> to vector<1x128xf32>
    %cst_35 = arith.constant dense<0.000000e+00> : vector<16xf32>
    %100 = vector.multi_reduction <add>, %95, %cst_35 [1] : vector<16x128xf32> to vector<16xf32>
    %101 = vector.shape_cast %100 : vector<16xf32> to vector<16x1xf32>
    %cst_36 = arith.constant 1.280000e+02 : f32
    %102 = vector.broadcast %cst_36 : f32 to vector<16x1xf32>
    %103 = arith.divf %101, %102 : vector<16x1xf32>
    %104 = vector.broadcast %103 : vector<16x1xf32> to vector<16x128xf32>
    %105 = arith.subf %95, %104 : vector<16x128xf32>
    %106 = arith.mulf %105, %105 : vector<16x128xf32>
    %cst_37 = arith.constant dense<0.000000e+00> : vector<16xf32>
    %107 = vector.multi_reduction <add>, %106, %cst_37 [1] : vector<16x128xf32> to vector<16xf32>
    %108 = vector.shape_cast %107 : vector<16xf32> to vector<16x1xf32>
    %cst_38 = arith.constant 1.280000e+02 : f32
    %109 = vector.broadcast %cst_38 : f32 to vector<16x1xf32>
    %110 = arith.divf %108, %109 : vector<16x1xf32>
    %111 = vector.broadcast %103 : vector<16x1xf32> to vector<16x128xf32>
    %112 = arith.subf %95, %111 : vector<16x128xf32>
    %cst_39 = arith.constant 9.99999996E-13 : f32
    %113 = vector.broadcast %cst_39 : f32 to vector<16x1xf32>
    %114 = arith.addf %110, %113 : vector<16x1xf32>
    %115 = math.rsqrt %114 : vector<16x1xf32>
    %116 = vector.broadcast %115 : vector<16x1xf32> to vector<16x128xf32>
    %117 = arith.mulf %112, %116 : vector<16x128xf32>
    %118 = vector.broadcast %97 : vector<1x128xf32> to vector<16x128xf32>
    %119 = arith.mulf %117, %118 : vector<16x128xf32>
    %120 = vector.broadcast %99 : vector<1x128xf32> to vector<16x128xf32>
    %121 = arith.addf %119, %120 : vector<16x128xf32>
    %122 = arith.truncf %121 : vector<16x128xf32> to vector<16x128xbf16>
    %c0_40 = arith.constant 0 : index
    %c0_41 = arith.constant 0 : index
    %c0_42 = arith.constant 0 : index
    %123 = vector.load %arg11[%c0_40, %c0_41, %c0_42] : memref<2x128x256xbf16, #tpu.memory_space<vmem>>, vector<1x128x256xbf16>
    %124 = vector.shape_cast %123 : vector<1x128x256xbf16> to vector<128x256xbf16>
    %cst_43 = arith.constant dense<0.000000e+00> : vector<16x256xf32>
    %125 = tpu.matmul %122, %124, %cst_43 {dimension_numbers = #tpu.dot_dimension_numbers<[1], [0], [0], [1], [0, 0, 1, 1], [], []>} : vector<16x128xbf16>, vector<128x256xbf16>, vector<16x256xf32> -> vector<16x256xf32>
    %c0_44 = arith.constant 0 : index
    %c0_45 = arith.constant 0 : index
    %c0_46 = arith.constant 0 : index
    %126 = vector.load %arg12[%c0_44, %c0_45, %c0_46] : memref<2x1x256xf32, #tpu.memory_space<vmem>>, vector<1x1x256xf32>
    %127 = vector.shape_cast %126 : vector<1x1x256xf32> to vector<1x256xf32>
    %128 = vector.broadcast %127 : vector<1x256xf32> to vector<16x256xf32>
    %129 = arith.addf %125, %128 : vector<16x256xf32>
    %cst_47 = arith.constant 5.000000e-01 : f32
    %130 = vector.broadcast %cst_47 : f32 to vector<16x256xf32>
    %131 = arith.mulf %130, %129 : vector<16x256xf32>
    %cst_48 = arith.constant 4.471500e-02 : f32
    %132 = vector.broadcast %cst_48 : f32 to vector<16x256xf32>
    %133 = arith.mulf %132, %129 : vector<16x256xf32>
    %134 = arith.mulf %133, %129 : vector<16x256xf32>
    %135 = arith.mulf %134, %129 : vector<16x256xf32>
    %136 = arith.addf %129, %135 : vector<16x256xf32>
    %cst_49 = arith.constant 0.797884583 : f32
    %137 = vector.broadcast %cst_49 : f32 to vector<16x256xf32>
    %138 = arith.mulf %137, %136 : vector<16x256xf32>
    %139 = math.tanh %138 : vector<16x256xf32>
    %cst_50 = arith.constant 1.000000e+00 : f32
    %140 = vector.broadcast %cst_50 : f32 to vector<16x256xf32>
    %141 = arith.addf %140, %139 : vector<16x256xf32>
    %142 = arith.mulf %131, %141 : vector<16x256xf32>
    %143 = arith.truncf %142 : vector<16x256xf32> to vector<16x256xbf16>
    %c0_51 = arith.constant 0 : index
    %c0_52 = arith.constant 0 : index
    %c0_53 = arith.constant 0 : index
    %144 = vector.load %arg13[%c0_51, %c0_52, %c0_53] : memref<2x256x128xbf16, #tpu.memory_space<vmem>>, vector<1x256x128xbf16>
    %145 = vector.shape_cast %144 : vector<1x256x128xbf16> to vector<256x128xbf16>
    %cst_54 = arith.constant dense<0.000000e+00> : vector<16x128xf32>
    %146 = tpu.matmul %143, %145, %cst_54 {dimension_numbers = #tpu.dot_dimension_numbers<[1], [0], [0], [1], [0, 0, 1, 1], [], []>} : vector<16x256xbf16>, vector<256x128xbf16>, vector<16x128xf32> -> vector<16x128xf32>
    %c0_55 = arith.constant 0 : index
    %c0_56 = arith.constant 0 : index
    %c0_57 = arith.constant 0 : index
    %147 = vector.load %arg14[%c0_55, %c0_56, %c0_57] : memref<2x1x128xf32, #tpu.memory_space<vmem>>, vector<1x1x128xf32>
    %148 = vector.shape_cast %147 : vector<1x1x128xf32> to vector<1x128xf32>
    %149 = vector.broadcast %148 : vector<1x128xf32> to vector<16x128xf32>
    %150 = arith.addf %146, %149 : vector<16x128xf32>
    %151 = arith.addf %121, %150 : vector<16x128xf32>
    %c0_58 = arith.constant 0 : index
    %c0_59 = arith.constant 0 : index
    %c0_60 = arith.constant 0 : index
    %152 = vector.load %arg15[%c0_58, %c0_59, %c0_60] : memref<2x1x128xf32, #tpu.memory_space<vmem>>, vector<1x1x128xf32>
    %153 = vector.shape_cast %152 : vector<1x1x128xf32> to vector<1x128xf32>
    %c0_61 = arith.constant 0 : index
    %c0_62 = arith.constant 0 : index
    %c0_63 = arith.constant 0 : index
    %154 = vector.load %arg16[%c0_61, %c0_62, %c0_63] : memref<2x1x128xf32, #tpu.memory_space<vmem>>, vector<1x1x128xf32>
    %155 = vector.shape_cast %154 : vector<1x1x128xf32> to vector<1x128xf32>
    %cst_64 = arith.constant dense<0.000000e+00> : vector<16xf32>
    %156 = vector.multi_reduction <add>, %151, %cst_64 [1] : vector<16x128xf32> to vector<16xf32>
    %157 = vector.shape_cast %156 : vector<16xf32> to vector<16x1xf32>
    %cst_65 = arith.constant 1.280000e+02 : f32
    %158 = vector.broadcast %cst_65 : f32 to vector<16x1xf32>
    %159 = arith.divf %157, %158 : vector<16x1xf32>
    %160 = vector.broadcast %159 : vector<16x1xf32> to vector<16x128xf32>
    %161 = arith.subf %151, %160 : vector<16x128xf32>
    %162 = arith.mulf %161, %161 : vector<16x128xf32>
    %cst_66 = arith.constant dense<0.000000e+00> : vector<16xf32>
    %163 = vector.multi_reduction <add>, %162, %cst_66 [1] : vector<16x128xf32> to vector<16xf32>
    %164 = vector.shape_cast %163 : vector<16xf32> to vector<16x1xf32>
    %cst_67 = arith.constant 1.280000e+02 : f32
    %165 = vector.broadcast %cst_67 : f32 to vector<16x1xf32>
    %166 = arith.divf %164, %165 : vector<16x1xf32>
    %167 = vector.broadcast %159 : vector<16x1xf32> to vector<16x128xf32>
    %168 = arith.subf %151, %167 : vector<16x128xf32>
    %cst_68 = arith.constant 9.99999996E-13 : f32
    %169 = vector.broadcast %cst_68 : f32 to vector<16x1xf32>
    %170 = arith.addf %166, %169 : vector<16x1xf32>
    %171 = math.rsqrt %170 : vector<16x1xf32>
    %172 = vector.broadcast %171 : vector<16x1xf32> to vector<16x128xf32>
    %173 = arith.mulf %168, %172 : vector<16x128xf32>
    %174 = vector.broadcast %153 : vector<1x128xf32> to vector<16x128xf32>
    %175 = arith.mulf %173, %174 : vector<16x128xf32>
    %176 = vector.broadcast %155 : vector<1x128xf32> to vector<16x128xf32>
    %177 = arith.addf %175, %176 : vector<16x128xf32>
    %178 = arith.truncf %177 : vector<16x128xf32> to vector<16x128xbf16>
    %c1 = arith.constant 1 : index
    %c0_69 = arith.constant 0 : index
    %c0_70 = arith.constant 0 : index
    %179 = vector.load %arg5[%c1, %c0_69, %c0_70] : memref<2x128x384xbf16, #tpu.memory_space<vmem>>, vector<1x128x384xbf16>
    %180 = vector.shape_cast %179 : vector<1x128x384xbf16> to vector<128x384xbf16>
    %cst_71 = arith.constant dense<0.000000e+00> : vector<16x384xf32>
    %181 = tpu.matmul %178, %180, %cst_71 {dimension_numbers = #tpu.dot_dimension_numbers<[1], [0], [0], [1], [0, 0, 1, 1], [], []>} : vector<16x128xbf16>, vector<128x384xbf16>, vector<16x384xf32> -> vector<16x384xf32>
    %c1_72 = arith.constant 1 : index
    %c0_73 = arith.constant 0 : index
    %c0_74 = arith.constant 0 : index
    %182 = vector.load %arg6[%c1_72, %c0_73, %c0_74] : memref<2x1x384xf32, #tpu.memory_space<vmem>>, vector<1x1x384xf32>
    %183 = vector.shape_cast %182 : vector<1x1x384xf32> to vector<1x384xf32>
    %184 = vector.broadcast %183 : vector<1x384xf32> to vector<16x384xf32>
    %185 = arith.addf %181, %184 : vector<16x384xf32>
    %186 = arith.truncf %185 : vector<16x384xf32> to vector<16x384xbf16>
    %187 = vector.extract_strided_slice %186 {offsets = [0, 0], sizes = [16, 32], strides = [1, 1]} : vector<16x384xbf16> to vector<16x32xbf16>
    %188 = vector.shape_cast %187 : vector<16x32xbf16> to vector<1x16x32xbf16>
    %189 = vector.extract_strided_slice %186 {offsets = [0, 32], sizes = [16, 32], strides = [1, 1]} : vector<16x384xbf16> to vector<16x32xbf16>
    %190 = vector.shape_cast %189 : vector<16x32xbf16> to vector<1x16x32xbf16>
    %191 = vector.extract_strided_slice %186 {offsets = [0, 64], sizes = [16, 32], strides = [1, 1]} : vector<16x384xbf16> to vector<16x32xbf16>
    %192 = vector.shape_cast %191 : vector<16x32xbf16> to vector<1x16x32xbf16>
    %193 = vector.extract_strided_slice %186 {offsets = [0, 96], sizes = [16, 32], strides = [1, 1]} : vector<16x384xbf16> to vector<16x32xbf16>
    %194 = vector.shape_cast %193 : vector<16x32xbf16> to vector<1x16x32xbf16>
    %195 = tpu.concatenate %188, %190, %192, %194 in 0 : vector<1x16x32xbf16>, vector<1x16x32xbf16>, vector<1x16x32xbf16>, vector<1x16x32xbf16> -> vector<4x16x32xbf16>
    %196 = vector.extract_strided_slice %186 {offsets = [0, 128], sizes = [16, 32], strides = [1, 1]} : vector<16x384xbf16> to vector<16x32xbf16>
    %197 = vector.shape_cast %196 : vector<16x32xbf16> to vector<1x16x32xbf16>
    %198 = vector.extract_strided_slice %186 {offsets = [0, 160], sizes = [16, 32], strides = [1, 1]} : vector<16x384xbf16> to vector<16x32xbf16>
    %199 = vector.shape_cast %198 : vector<16x32xbf16> to vector<1x16x32xbf16>
    %200 = vector.extract_strided_slice %186 {offsets = [0, 192], sizes = [16, 32], strides = [1, 1]} : vector<16x384xbf16> to vector<16x32xbf16>
    %201 = vector.shape_cast %200 : vector<16x32xbf16> to vector<1x16x32xbf16>
    %202 = vector.extract_strided_slice %186 {offsets = [0, 224], sizes = [16, 32], strides = [1, 1]} : vector<16x384xbf16> to vector<16x32xbf16>
    %203 = vector.shape_cast %202 : vector<16x32xbf16> to vector<1x16x32xbf16>
    %204 = tpu.concatenate %197, %199, %201, %203 in 0 : vector<1x16x32xbf16>, vector<1x16x32xbf16>, vector<1x16x32xbf16>, vector<1x16x32xbf16> -> vector<4x16x32xbf16>
    %205 = vector.extract_strided_slice %186 {offsets = [0, 256], sizes = [16, 32], strides = [1, 1]} : vector<16x384xbf16> to vector<16x32xbf16>
    %206 = vector.shape_cast %205 : vector<16x32xbf16> to vector<1x16x32xbf16>
    %207 = vector.extract_strided_slice %186 {offsets = [0, 288], sizes = [16, 32], strides = [1, 1]} : vector<16x384xbf16> to vector<16x32xbf16>
    %208 = vector.shape_cast %207 : vector<16x32xbf16> to vector<1x16x32xbf16>
    %209 = vector.extract_strided_slice %186 {offsets = [0, 320], sizes = [16, 32], strides = [1, 1]} : vector<16x384xbf16> to vector<16x32xbf16>
    %210 = vector.shape_cast %209 : vector<16x32xbf16> to vector<1x16x32xbf16>
    %211 = vector.extract_strided_slice %186 {offsets = [0, 352], sizes = [16, 32], strides = [1, 1]} : vector<16x384xbf16> to vector<16x32xbf16>
    %212 = vector.shape_cast %211 : vector<16x32xbf16> to vector<1x16x32xbf16>
    %213 = tpu.concatenate %206, %208, %210, %212 in 0 : vector<1x16x32xbf16>, vector<1x16x32xbf16>, vector<1x16x32xbf16>, vector<1x16x32xbf16> -> vector<4x16x32xbf16>
    "tpu.trace_start"() <{level = 10 : i32, message = "gqd,gkd->gqk"}> : () -> ()
    %cst_75 = arith.constant dense<0.000000e+00> : vector<4x16x16xf32>
    %214 = tpu.matmul %195, %204, %cst_75 {dimension_numbers = #tpu.dot_dimension_numbers<[2], [2], [1], [1], [0, 0, 0, 1, 1, 1], [0], [0]>} : vector<4x16x32xbf16>, vector<4x16x32xbf16>, vector<4x16x16xf32> -> vector<4x16x16xf32>
    "tpu.trace_stop"() : () -> ()
    %215 = vector.shape_cast %25 : vector<16x16xf32> to vector<1x16x16xf32>
    %216 = vector.broadcast %215 : vector<1x16x16xf32> to vector<4x16x16xf32>
    %217 = arith.addf %214, %216 : vector<4x16x16xf32>
    %cst_76 = arith.constant dense<0xFF800000> : vector<4x16xf32>
    %218 = vector.multi_reduction <maximumf>, %217, %cst_76 [2] : vector<4x16x16xf32> to vector<4x16xf32>
    %219 = vector.shape_cast %218 : vector<4x16xf32> to vector<4x16x1xf32>
    %220 = vector.broadcast %219 : vector<4x16x1xf32> to vector<4x16x16xf32>
    %221 = arith.subf %217, %220 : vector<4x16x16xf32>
    %222 = math.exp %221 : vector<4x16x16xf32>
    %cst_77 = arith.constant dense<0.000000e+00> : vector<4x16xf32>
    %223 = vector.multi_reduction <add>, %222, %cst_77 [2] : vector<4x16x16xf32> to vector<4x16xf32>
    %224 = vector.shape_cast %223 : vector<4x16xf32> to vector<4x16x1xf32>
    %225 = tpu.reciprocal %224 {approx = true} : vector<4x16x1xf32> -> vector<4x16x1xf32>
    %226 = vector.broadcast %225 : vector<4x16x1xf32> to vector<4x16x16xf32>
    %227 = arith.mulf %222, %226 : vector<4x16x16xf32>
    %228 = arith.truncf %227 : vector<4x16x16xf32> to vector<4x16x16xbf16>
    "tpu.trace_start"() <{level = 10 : i32, message = "gqk,gkd->gqd"}> : () -> ()
    %cst_78 = arith.constant dense<0.000000e+00> : vector<4x16x32xf32>
    %229 = tpu.matmul %228, %213, %cst_78 {dimension_numbers = #tpu.dot_dimension_numbers<[2], [1], [1], [2], [0, 0, 0, 1, 1, 2], [0], [0]>} : vector<4x16x16xbf16>, vector<4x16x32xbf16>, vector<4x16x32xf32> -> vector<4x16x32xf32>
    "tpu.trace_stop"() : () -> ()
    %230 = arith.truncf %229 : vector<4x16x32xf32> to vector<4x16x32xbf16>
    %231 = vector.extract_strided_slice %230 {offsets = [0, 0, 0], sizes = [1, 16, 32], strides = [1, 1, 1]} : vector<4x16x32xbf16> to vector<1x16x32xbf16>
    %232 = vector.shape_cast %231 : vector<1x16x32xbf16> to vector<16x32xbf16>
    %233 = vector.extract_strided_slice %230 {offsets = [1, 0, 0], sizes = [1, 16, 32], strides = [1, 1, 1]} : vector<4x16x32xbf16> to vector<1x16x32xbf16>
    %234 = vector.shape_cast %233 : vector<1x16x32xbf16> to vector<16x32xbf16>
    %235 = vector.extract_strided_slice %230 {offsets = [2, 0, 0], sizes = [1, 16, 32], strides = [1, 1, 1]} : vector<4x16x32xbf16> to vector<1x16x32xbf16>
    %236 = vector.shape_cast %235 : vector<1x16x32xbf16> to vector<16x32xbf16>
    %237 = vector.extract_strided_slice %230 {offsets = [3, 0, 0], sizes = [1, 16, 32], strides = [1, 1, 1]} : vector<4x16x32xbf16> to vector<1x16x32xbf16>
    %238 = vector.shape_cast %237 : vector<1x16x32xbf16> to vector<16x32xbf16>
    %239 = tpu.concatenate %232, %234, %236, %238 in 1 : vector<16x32xbf16>, vector<16x32xbf16>, vector<16x32xbf16>, vector<16x32xbf16> -> vector<16x128xbf16>
    %c1_79 = arith.constant 1 : index
    %c0_80 = arith.constant 0 : index
    %c0_81 = arith.constant 0 : index
    %240 = vector.load %arg7[%c1_79, %c0_80, %c0_81] : memref<2x128x128xbf16, #tpu.memory_space<vmem>>, vector<1x128x128xbf16>
    %241 = vector.shape_cast %240 : vector<1x128x128xbf16> to vector<128x128xbf16>
    %cst_82 = arith.constant dense<0.000000e+00> : vector<16x128xf32>
    %242 = tpu.matmul %239, %241, %cst_82 {dimension_numbers = #tpu.dot_dimension_numbers<[1], [0], [0], [1], [0, 0, 1, 1], [], []>} : vector<16x128xbf16>, vector<128x128xbf16>, vector<16x128xf32> -> vector<16x128xf32>
    %c1_83 = arith.constant 1 : index
    %c0_84 = arith.constant 0 : index
    %c0_85 = arith.constant 0 : index
    %243 = vector.load %arg8[%c1_83, %c0_84, %c0_85] : memref<2x1x128xf32, #tpu.memory_space<vmem>>, vector<1x1x128xf32>
    %244 = vector.shape_cast %243 : vector<1x1x128xf32> to vector<1x128xf32>
    %245 = vector.broadcast %244 : vector<1x128xf32> to vector<16x128xf32>
    %246 = arith.addf %242, %245 : vector<16x128xf32>
    %247 = arith.addf %177, %246 : vector<16x128xf32>
    %c1_86 = arith.constant 1 : index
    %c0_87 = arith.constant 0 : index
    %c0_88 = arith.constant 0 : index
    %248 = vector.load %arg9[%c1_86, %c0_87, %c0_88] : memref<2x1x128xf32, #tpu.memory_space<vmem>>, vector<1x1x128xf32>
    %249 = vector.shape_cast %248 : vector<1x1x128xf32> to vector<1x128xf32>
    %c1_89 = arith.constant 1 : index
    %c0_90 = arith.constant 0 : index
    %c0_91 = arith.constant 0 : index
    %250 = vector.load %arg10[%c1_89, %c0_90, %c0_91] : memref<2x1x128xf32, #tpu.memory_space<vmem>>, vector<1x1x128xf32>
    %251 = vector.shape_cast %250 : vector<1x1x128xf32> to vector<1x128xf32>
    %cst_92 = arith.constant dense<0.000000e+00> : vector<16xf32>
    %252 = vector.multi_reduction <add>, %247, %cst_92 [1] : vector<16x128xf32> to vector<16xf32>
    %253 = vector.shape_cast %252 : vector<16xf32> to vector<16x1xf32>
    %cst_93 = arith.constant 1.280000e+02 : f32
    %254 = vector.broadcast %cst_93 : f32 to vector<16x1xf32>
    %255 = arith.divf %253, %254 : vector<16x1xf32>
    %256 = vector.broadcast %255 : vector<16x1xf32> to vector<16x128xf32>
    %257 = arith.subf %247, %256 : vector<16x128xf32>
    %258 = arith.mulf %257, %257 : vector<16x128xf32>
    %cst_94 = arith.constant dense<0.000000e+00> : vector<16xf32>
    %259 = vector.multi_reduction <add>, %258, %cst_94 [1] : vector<16x128xf32> to vector<16xf32>
    %260 = vector.shape_cast %259 : vector<16xf32> to vector<16x1xf32>
    %cst_95 = arith.constant 1.280000e+02 : f32
    %261 = vector.broadcast %cst_95 : f32 to vector<16x1xf32>
    %262 = arith.divf %260, %261 : vector<16x1xf32>
    %263 = vector.broadcast %255 : vector<16x1xf32> to vector<16x128xf32>
    %264 = arith.subf %247, %263 : vector<16x128xf32>
    %cst_96 = arith.constant 9.99999996E-13 : f32
    %265 = vector.broadcast %cst_96 : f32 to vector<16x1xf32>
    %266 = arith.addf %262, %265 : vector<16x1xf32>
    %267 = math.rsqrt %266 : vector<16x1xf32>
    %268 = vector.broadcast %267 : vector<16x1xf32> to vector<16x128xf32>
    %269 = arith.mulf %264, %268 : vector<16x128xf32>
    %270 = vector.broadcast %249 : vector<1x128xf32> to vector<16x128xf32>
    %271 = arith.mulf %269, %270 : vector<16x128xf32>
    %272 = vector.broadcast %251 : vector<1x128xf32> to vector<16x128xf32>
    %273 = arith.addf %271, %272 : vector<16x128xf32>
    %274 = arith.truncf %273 : vector<16x128xf32> to vector<16x128xbf16>
    %c1_97 = arith.constant 1 : index
    %c0_98 = arith.constant 0 : index
    %c0_99 = arith.constant 0 : index
    %275 = vector.load %arg11[%c1_97, %c0_98, %c0_99] : memref<2x128x256xbf16, #tpu.memory_space<vmem>>, vector<1x128x256xbf16>
    %276 = vector.shape_cast %275 : vector<1x128x256xbf16> to vector<128x256xbf16>
    %cst_100 = arith.constant dense<0.000000e+00> : vector<16x256xf32>
    %277 = tpu.matmul %274, %276, %cst_100 {dimension_numbers = #tpu.dot_dimension_numbers<[1], [0], [0], [1], [0, 0, 1, 1], [], []>} : vector<16x128xbf16>, vector<128x256xbf16>, vector<16x256xf32> -> vector<16x256xf32>
    %c1_101 = arith.constant 1 : index
    %c0_102 = arith.constant 0 : index
    %c0_103 = arith.constant 0 : index
    %278 = vector.load %arg12[%c1_101, %c0_102, %c0_103] : memref<2x1x256xf32, #tpu.memory_space<vmem>>, vector<1x1x256xf32>
    %279 = vector.shape_cast %278 : vector<1x1x256xf32> to vector<1x256xf32>
    %280 = vector.broadcast %279 : vector<1x256xf32> to vector<16x256xf32>
    %281 = arith.addf %277, %280 : vector<16x256xf32>
    %cst_104 = arith.constant 5.000000e-01 : f32
    %282 = vector.broadcast %cst_104 : f32 to vector<16x256xf32>
    %283 = arith.mulf %282, %281 : vector<16x256xf32>
    %cst_105 = arith.constant 4.471500e-02 : f32
    %284 = vector.broadcast %cst_105 : f32 to vector<16x256xf32>
    %285 = arith.mulf %284, %281 : vector<16x256xf32>
    %286 = arith.mulf %285, %281 : vector<16x256xf32>
    %287 = arith.mulf %286, %281 : vector<16x256xf32>
    %288 = arith.addf %281, %287 : vector<16x256xf32>
    %cst_106 = arith.constant 0.797884583 : f32
    %289 = vector.broadcast %cst_106 : f32 to vector<16x256xf32>
    %290 = arith.mulf %289, %288 : vector<16x256xf32>
    %291 = math.tanh %290 : vector<16x256xf32>
    %cst_107 = arith.constant 1.000000e+00 : f32
    %292 = vector.broadcast %cst_107 : f32 to vector<16x256xf32>
    %293 = arith.addf %292, %291 : vector<16x256xf32>
    %294 = arith.mulf %283, %293 : vector<16x256xf32>
    %295 = arith.truncf %294 : vector<16x256xf32> to vector<16x256xbf16>
    %c1_108 = arith.constant 1 : index
    %c0_109 = arith.constant 0 : index
    %c0_110 = arith.constant 0 : index
    %296 = vector.load %arg13[%c1_108, %c0_109, %c0_110] : memref<2x256x128xbf16, #tpu.memory_space<vmem>>, vector<1x256x128xbf16>
    %297 = vector.shape_cast %296 : vector<1x256x128xbf16> to vector<256x128xbf16>
    %cst_111 = arith.constant dense<0.000000e+00> : vector<16x128xf32>
    %298 = tpu.matmul %295, %297, %cst_111 {dimension_numbers = #tpu.dot_dimension_numbers<[1], [0], [0], [1], [0, 0, 1, 1], [], []>} : vector<16x256xbf16>, vector<256x128xbf16>, vector<16x128xf32> -> vector<16x128xf32>
    %c1_112 = arith.constant 1 : index
    %c0_113 = arith.constant 0 : index
    %c0_114 = arith.constant 0 : index
    %299 = vector.load %arg14[%c1_112, %c0_113, %c0_114] : memref<2x1x128xf32, #tpu.memory_space<vmem>>, vector<1x1x128xf32>
    %300 = vector.shape_cast %299 : vector<1x1x128xf32> to vector<1x128xf32>
    %301 = vector.broadcast %300 : vector<1x128xf32> to vector<16x128xf32>
    %302 = arith.addf %298, %301 : vector<16x128xf32>
    %303 = arith.addf %273, %302 : vector<16x128xf32>
    %c1_115 = arith.constant 1 : index
    %c0_116 = arith.constant 0 : index
    %c0_117 = arith.constant 0 : index
    %304 = vector.load %arg15[%c1_115, %c0_116, %c0_117] : memref<2x1x128xf32, #tpu.memory_space<vmem>>, vector<1x1x128xf32>
    %305 = vector.shape_cast %304 : vector<1x1x128xf32> to vector<1x128xf32>
    %c1_118 = arith.constant 1 : index
    %c0_119 = arith.constant 0 : index
    %c0_120 = arith.constant 0 : index
    %306 = vector.load %arg16[%c1_118, %c0_119, %c0_120] : memref<2x1x128xf32, #tpu.memory_space<vmem>>, vector<1x1x128xf32>
    %307 = vector.shape_cast %306 : vector<1x1x128xf32> to vector<1x128xf32>
    %cst_121 = arith.constant dense<0.000000e+00> : vector<16xf32>
    %308 = vector.multi_reduction <add>, %303, %cst_121 [1] : vector<16x128xf32> to vector<16xf32>
    %309 = vector.shape_cast %308 : vector<16xf32> to vector<16x1xf32>
    %cst_122 = arith.constant 1.280000e+02 : f32
    %310 = vector.broadcast %cst_122 : f32 to vector<16x1xf32>
    %311 = arith.divf %309, %310 : vector<16x1xf32>
    %312 = vector.broadcast %311 : vector<16x1xf32> to vector<16x128xf32>
    %313 = arith.subf %303, %312 : vector<16x128xf32>
    %314 = arith.mulf %313, %313 : vector<16x128xf32>
    %cst_123 = arith.constant dense<0.000000e+00> : vector<16xf32>
    %315 = vector.multi_reduction <add>, %314, %cst_123 [1] : vector<16x128xf32> to vector<16xf32>
    %316 = vector.shape_cast %315 : vector<16xf32> to vector<16x1xf32>
    %cst_124 = arith.constant 1.280000e+02 : f32
    %317 = vector.broadcast %cst_124 : f32 to vector<16x1xf32>
    %318 = arith.divf %316, %317 : vector<16x1xf32>
    %319 = vector.broadcast %311 : vector<16x1xf32> to vector<16x128xf32>
    %320 = arith.subf %303, %319 : vector<16x128xf32>
    %cst_125 = arith.constant 9.99999996E-13 : f32
    %321 = vector.broadcast %cst_125 : f32 to vector<16x1xf32>
    %322 = arith.addf %318, %321 : vector<16x1xf32>
    %323 = math.rsqrt %322 : vector<16x1xf32>
    %324 = vector.broadcast %323 : vector<16x1xf32> to vector<16x128xf32>
    %325 = arith.mulf %320, %324 : vector<16x128xf32>
    %326 = vector.broadcast %305 : vector<1x128xf32> to vector<16x128xf32>
    %327 = arith.mulf %325, %326 : vector<16x128xf32>
    %328 = vector.broadcast %307 : vector<1x128xf32> to vector<16x128xf32>
    %329 = arith.addf %327, %328 : vector<16x128xf32>
    %c0_126 = arith.constant 0 : index
    %c0_127 = arith.constant 0 : index
    %330 = vector.load %arg21[%c0_126, %c0_127] : memref<16x128xf32, #tpu.memory_space<vmem>>, vector<16x128xf32>
    tpu.vector_store %arg21[%c0_126, %c0_127], %329 {strides = array<i32>} : memref<16x128xf32, #tpu.memory_space<vmem>>, vector<16x128xf32>,
    %c0_128 = arith.constant 0 : index
    %c0_129 = arith.constant 0 : index
    %331 = tpu.strided_load %arg21[%c0_128, %c0_129] {strides = array<i32: 8, 1>} : memref<16x128xf32, #tpu.memory_space<vmem>>, vector<2x128xf32>
    %332 = arith.truncf %331 : vector<2x128xf32> to vector<2x128xbf16>
    %c0_130 = arith.constant 0 : index
    %c0_131 = arith.constant 0 : index
    %333 = vector.load %arg17[%c0_130, %c0_131] : memref<128x128xbf16, #tpu.memory_space<vmem>>, vector<128x128xbf16>
    %cst_132 = arith.constant dense<0.000000e+00> : vector<2x128xf32>
    %334 = tpu.matmul %332, %333, %cst_132 {dimension_numbers = #tpu.dot_dimension_numbers<[1], [0], [0], [1], [0, 0, 1, 1], [], []>} : vector<2x128xbf16>, vector<128x128xbf16>, vector<2x128xf32> -> vector<2x128xf32>
    %c0_133 = arith.constant 0 : index
    %c0_134 = arith.constant 0 : index
    %335 = vector.load %arg18[%c0_133, %c0_134] : memref<1x128xf32, #tpu.memory_space<vmem>>, vector<1x128xf32>
    %336 = vector.broadcast %335 : vector<1x128xf32> to vector<2x128xf32>
    %337 = arith.addf %334, %336 : vector<2x128xf32>
    %338 = math.tanh %337 : vector<2x128xf32>
    %c0_135 = arith.constant 0 : index
    %c0_136 = arith.constant 0 : index
    %339 = vector.load %arg22[%c0_135, %c0_136] : memref<2x128xf32, #tpu.memory_space<vmem>>, vector<2x128xf32>
    tpu.vector_store %arg22[%c0_135, %c0_136], %338 {strides = array<i32>} : memref<2x128xf32, #tpu.memory_space<vmem>>, vector<2x128xf32>,
    %340 = arith.truncf %338 : vector<2x128xf32> to vector<2x128xbf16>
    %c0_137 = arith.constant 0 : index
    %c0_138 = arith.constant 0 : index
    %341 = vector.load %arg19[%c0_137, %c0_138] : memref<128x128xbf16, #tpu.memory_space<vmem>>, vector<128x128xbf16>
    %cst_139 = arith.constant dense<0.000000e+00> : vector<2x128xf32>
    %342 = tpu.matmul %340, %341, %cst_139 {dimension_numbers = #tpu.dot_dimension_numbers<[1], [0], [0], [1], [0, 0, 1, 1], [], []>} : vector<2x128xbf16>, vector<128x128xbf16>, vector<2x128xf32> -> vector<2x128xf32>
    %c0_140 = arith.constant 0 : index
    %c0_141 = arith.constant 0 : index
    %343 = vector.load %arg20[%c0_140, %c0_141] : memref<1x128xf32, #tpu.memory_space<vmem>>, vector<1x128xf32>
    %344 = vector.broadcast %343 : vector<1x128xf32> to vector<2x128xf32>
    %345 = arith.addf %342, %344 : vector<2x128xf32>
    %c0_142 = arith.constant 0 : index
    %c0_143 = arith.constant 0 : index
    %346 = vector.load %arg23[%c0_142, %c0_143] : memref<2x128xf32, #tpu.memory_space<vmem>>, vector<2x128xf32>
    tpu.vector_store %arg23[%c0_142, %c0_143], %345 {strides = array<i32>} : memref<2x128xf32, #tpu.memory_space<vmem>>, vector<2x128xf32>,
    return
  }
  func.func @transform_0(%arg0: i32) -> (i32, i32) {
    %c0_i32 = arith.constant 0 : i32
    %c0_i32_0 = arith.constant 0 : i32
    %c0_i32_1 = arith.constant 0 : i32
    return %c0_i32, %c0_i32_0 : i32, i32
  }
  func.func @transform_1(%arg0: i32) -> (i32, i32) {
    %c0_i32 = arith.constant 0 : i32
    %c0_i32_0 = arith.constant 0 : i32
    %c0_i32_1 = arith.constant 0 : i32
    return %c0_i32, %c0_i32_0 : i32, i32
  }
  func.func @transform_2(%arg0: i32) -> (i32, i32) {
    %c0_i32 = arith.constant 0 : i32
    %c0_i32_0 = arith.constant 0 : i32
    %c0_i32_1 = arith.constant 0 : i32
    return %c0_i32, %c0_i32_0 : i32, i32
  }
  func.func @transform_3(%arg0: i32) -> (i32, i32) {
    %c0_i32 = arith.constant 0 : i32
    %c0_i32_0 = arith.constant 0 : i32
    %c0_i32_1 = arith.constant 0 : i32
    return %c0_i32, %c0_i32_0 : i32, i32
  }
  func.func @transform_4(%arg0: i32) -> (i32, i32, i32) {
    %c0_i32 = arith.constant 0 : i32
    %c0_i32_0 = arith.constant 0 : i32
    %c0_i32_1 = arith.constant 0 : i32
    %c0_i32_2 = arith.constant 0 : i32
    return %c0_i32, %c0_i32_0, %c0_i32_1 : i32, i32, i32
  }
  func.func @transform_5(%arg0: i32) -> (i32, i32, i32) {
    %c0_i32 = arith.constant 0 : i32
    %c0_i32_0 = arith.constant 0 : i32
    %c0_i32_1 = arith.constant 0 : i32
    %c0_i32_2 = arith.constant 0 : i32
    return %c0_i32, %c0_i32_0, %c0_i32_1 : i32, i32, i32
  }
  func.func @transform_6(%arg0: i32) -> (i32, i32, i32) {
    %c0_i32 = arith.constant 0 : i32
    %c0_i32_0 = arith.constant 0 : i32
    %c0_i32_1 = arith.constant 0 : i32
    %c0_i32_2 = arith.constant 0 : i32
    return %c0_i32, %c0_i32_0, %c0_i32_1 : i32, i32, i32
  }
  func.func @transform_7(%arg0: i32) -> (i32, i32, i32) {
    %c0_i32 = arith.constant 0 : i32
    %c0_i32_0 = arith.constant 0 : i32
    %c0_i32_1 = arith.constant 0 : i32
    %c0_i32_2 = arith.constant 0 : i32
    return %c0_i32, %c0_i32_0, %c0_i32_1 : i32, i32, i32
  }
  func.func @transform_8(%arg0: i32) -> (i32, i32, i32) {
    %c0_i32 = arith.constant 0 : i32
    %c0_i32_0 = arith.constant 0 : i32
    %c0_i32_1 = arith.constant 0 : i32
    %c0_i32_2 = arith.constant 0 : i32
    return %c0_i32, %c0_i32_0, %c0_i32_1 : i32, i32, i32
  }
  func.func @transform_9(%arg0: i32) -> (i32, i32, i32) {
    %c0_i32 = arith.constant 0 : i32
    %c0_i32_0 = arith.constant 0 : i32
    %c0_i32_1 = arith.constant 0 : i32
    %c0_i32_2 = arith.constant 0 : i32
    return %c0_i32, %c0_i32_0, %c0_i32_1 : i32, i32, i32
  }
  func.func @transform_10(%arg0: i32) -> (i32, i32, i32) {
    %c0_i32 = arith.constant 0 : i32
    %c0_i32_0 = arith.constant 0 : i32
    %c0_i32_1 = arith.constant 0 : i32
    %c0_i32_2 = arith.constant 0 : i32
    return %c0_i32, %c0_i32_0, %c0_i32_1 : i32, i32, i32
  }
  func.func @transform_11(%arg0: i32) -> (i32, i32, i32) {
    %c0_i32 = arith.constant 0 : i32
    %c0_i32_0 = arith.constant 0 : i32
    %c0_i32_1 = arith.constant 0 : i32
    %c0_i32_2 = arith.constant 0 : i32
    return %c0_i32, %c0_i32_0, %c0_i32_1 : i32, i32, i32
  }
  func.func @transform_12(%arg0: i32) -> (i32, i32, i32) {
    %c0_i32 = arith.constant 0 : i32
    %c0_i32_0 = arith.constant 0 : i32
    %c0_i32_1 = arith.constant 0 : i32
    %c0_i32_2 = arith.constant 0 : i32
    return %c0_i32, %c0_i32_0, %c0_i32_1 : i32, i32, i32
  }
  func.func @transform_13(%arg0: i32) -> (i32, i32, i32) {
    %c0_i32 = arith.constant 0 : i32
    %c0_i32_0 = arith.constant 0 : i32
    %c0_i32_1 = arith.constant 0 : i32
    %c0_i32_2 = arith.constant 0 : i32
    return %c0_i32, %c0_i32_0, %c0_i32_1 : i32, i32, i32
  }
  func.func @transform_14(%arg0: i32) -> (i32, i32, i32) {
    %c0_i32 = arith.constant 0 : i32
    %c0_i32_0 = arith.constant 0 : i32
    %c0_i32_1 = arith.constant 0 : i32
    %c0_i32_2 = arith.constant 0 : i32
    return %c0_i32, %c0_i32_0, %c0_i32_1 : i32, i32, i32
  }
  func.func @transform_15(%arg0: i32) -> (i32, i32, i32) {
    %c0_i32 = arith.constant 0 : i32
    %c0_i32_0 = arith.constant 0 : i32
    %c0_i32_1 = arith.constant 0 : i32
    %c0_i32_2 = arith.constant 0 : i32
    return %c0_i32, %c0_i32_0, %c0_i32_1 : i32, i32, i32
  }
  func.func @transform_16(%arg0: i32) -> (i32, i32) {
    %c0_i32 = arith.constant 0 : i32
    %c0_i32_0 = arith.constant 0 : i32
    %c0_i32_1 = arith.constant 0 : i32
    return %c0_i32, %c0_i32_0 : i32, i32
  }
  func.func @transform_17(%arg0: i32) -> (i32, i32) {
    %c0_i32 = arith.constant 0 : i32
    %c0_i32_0 = arith.constant 0 : i32
    %c0_i32_1 = arith.constant 0 : i32
    return %c0_i32, %c0_i32_0 : i32, i32
  }
  func.func @transform_18(%arg0: i32) -> (i32, i32) {
    %c0_i32 = arith.constant 0 : i32
    %c0_i32_0 = arith.constant 0 : i32
    %c0_i32_1 = arith.constant 0 : i32
    return %c0_i32, %c0_i32_0 : i32, i32
  }
  func.func @transform_19(%arg0: i32) -> (i32, i32) {
    %c0_i32 = arith.constant 0 : i32
    %c0_i32_0 = arith.constant 0 : i32
    %c0_i32_1 = arith.constant 0 : i32
    return %c0_i32, %c0_i32_0 : i32, i32
  }
  func.func @transform_20(%arg0: i32) -> (i32, i32) {
    %c0_i32 = arith.constant 0 : i32
    %c0_i32_0 = arith.constant 0 : i32
    %c0_i32_1 = arith.constant 0 : i32
    return %c0_i32, %c0_i32_0 : i32, i32
  }
  func.func @transform_21(%arg0: i32) -> (i32, i32) {
    %c0_i32 = arith.constant 0 : i32
    %c0_i32_0 = arith.constant 0 : i32
    %c0_i32_1 = arith.constant 0 : i32
    return %c0_i32, %c0_i32_0 : i32, i32
  }
  func.func @transform_22(%arg0: i32) -> (i32, i32) {
    %c0_i32 = arith.constant 0 : i32
    %c0_i32_0 = arith.constant 0 : i32
    %c0_i32_1 = arith.constant 0 : i32
    return %c0_i32, %c0_i32_0 : i32, i32
  }
}

</mosaic_0001>

<bundles_post_ra>
// kernel: tpu_custom_call.1
= control target key start
LH: loop header
LB: loop body
LE: loop exit
PB: predicated region body
PF: predicated region fallthrough
CT: control target
= control target key end

     0   :  { %s4578_s0 = inlined_call_operand.hbm [shape: f32[16,128], index: 0, kind: input, shape index: {}]   ;;  %s4579_s1 = inlined_call_operand.hbm [shape: f32[16,16], index: 1, kind: input, shape index: {}]   ;;  %s4580_s2 = inlined_call_operand.hbm [shape: f32[1,128], index: 2, kind: input, shape index: {}]   ;;  %s4581_s3 = inlined_call_operand.hbm [shape: f32[1,128], index: 3, kind: input, shape index: {}]   ;;  %s4582_s4 = inlined_call_operand.hbm [shape: bf16[2,128,384], index: 4, kind: input, shape index: {}]   ;;  %s4583_s5 = inlined_call_operand.hbm [shape: f32[2,1,384], index: 5, kind: input, shape index: {}]   ;;  %s4584_s6 = inlined_call_operand.hbm [shape: bf16[2,128,128], index: 6, kind: input, shape index: {}]   ;;  %s4585_s7 = inlined_call_operand.vmem [shape: f32[2,1,128], index: 7, kind: input, shape index: {}]   ;;  %s4586_s8 = inlined_call_operand.hbm [shape: f32[2,1,128], index: 8, kind: input, shape index: {}]   ;;  %s4587_s9 = inlined_call_operand.vmem [shape: f32[2,1,128], index: 9, kind: input, shape index: {}]   ;;  %s4588_s10 = inlined_call_operand.hbm [shape: bf16[2,128,256], index: 10, kind: input, shape index: {}]   ;;  %s4589_s11 = inlined_call_operand.vmem [shape: f32[2,1,256], index: 11, kind: input, shape index: {}]   ;;  %s4590_s12 = inlined_call_operand.hbm [shape: bf16[2,256,128], index: 12, kind: input, shape index: {}]   ;;  %s4591_s13 = inlined_call_operand.vmem [shape: f32[2,1,128], index: 13, kind: input, shape index: {}]   ;;  %s4592_s14 = inlined_call_operand.vmem [shape: f32[2,1,128], index: 14, kind: input, shape index: {}]   ;;  %s4593_s15 = inlined_call_operand.vmem [shape: f32[2,1,128], index: 15, kind: input, shape index: {}]   ;;  %s4594_s16 = inlined_call_operand.hbm [shape: bf16[128,128], index: 16, kind: input, shape index: {}]   ;;  %s4595_s17 = inlined_call_operand.vmem [shape: f32[1,128], index: 17, kind: input, shape index: {}]   ;;  %s4596_s18 = inlined_call_operand.hbm [shape: bf16[128,128], index: 18, kind: input, shape index: {}]   ;;  %s4597_s19 = inlined_call_operand.vmem [shape: f32[1,128], index: 19, kind: input, shape index: {}]   ;;  %s4598_s20 = inlined_call_operand.hbm [shape: f32[16,128], index: 20, kind: output, shape index: {0}]   ;;  %s4599_s21 = inlined_call_operand.hbm [shape: f32[2,128], index: 21, kind: output, shape index: {1}]   ;;  %s4600_s22 = inlined_call_operand.hbm [shape: f32[2,128], index: 22, kind: output, shape index: {2}]  }
   0x1   :  { %4605 = sst [smem:[#allocation35_spill]] %s4578_s0 }
   0x2   :  { %4606 = sst [smem:[#allocation36_spill]] %s4579_s1 }
   0x3   :  { %4607 = sst [smem:[#allocation37_spill]] %s4580_s2 }
   0x4   :  { %4608 = sst [smem:[#allocation38_spill]] %s4581_s3 }
   0x5   :  { %4609 = sst [smem:[#allocation39_spill]] %s4582_s4 }
   0x6   :  { %4610 = sst [smem:[#allocation40_spill]] %s4583_s5 }
   0x7   :  { %4611 = sst [smem:[#allocation41_spill]] %s4584_s6 }
   0x8   :  { %4612 = sst [smem:[#allocation42_spill]] %s4597_s19 }
   0x9   :  { %4613 = sst [smem:[#allocation43_spill]] %s4598_s20 }
   0xa   :  { %4614 = sst [smem:[#allocation44_spill]] %s4600_s22 }
   0xb   :  { %28 = vsyncpa [#allocation3], 0 }
   0xc   :  { %29 = vsyncpa [#allocation6], 0 }
   0xd   :  { %30 = vsyncpa [#allocation9], 0 }
   0xe   :  { %31 = vsyncpa [#allocation12], 0 }
   0xf   :  { %32 = vsyncpa [#allocation15], 0 }
  0x10   :  { %33 = vsyncpa [#allocation18], 0 }
  0x11   :  { %34 = vsyncpa [#allocation21], 0 }
  0x12   :  { %35 = vsyncpa [#allocation4], 0 }
  0x13   :  { %36 = vsyncpa [#allocation24], 0  ;;  %s4615_s29 = sld [smem:[#allocation36_spill]]  ;;  %s4061_s4 = smov [#allocation5]  }
  0x14   :  { %s56_s0 = sshll.u32 %s4061_s4, 4  ;;  %s4616_s5 = sld [smem:[#allocation38_spill]]  ;;  %s57_s0 = int_to_ptr.vmem [resolvable:$true] %s56_s0 }
  0x15   :  { %s4601_s6 = smov 128   ;;  %s4063_s25 = smov 8  }
  0x16   :  { %s4064_s26 = smov [#allocation8]   ;;  %s4617_s28 = sld [smem:[#allocation40_spill]] }
  0x17   :  { %s81_s2 = sshll.u32 %s4064_s26, 4  ;;  %s4065_s4 = smov [#allocation11]   ;;  %s82_s2 = int_to_ptr.vmem [resolvable:$true] %s81_s2 }
  0x18   :  { %s104_s22 = sshll.u32 %s4065_s4, 4  ;;  %s4066_s19 = smov 48   ;;  %s105_s22 = int_to_ptr.vmem [resolvable:$true] %s104_s22 }
  0x19   :  { %s54_s30 = sshll.u32 %s4615_s29, 4  ;;  %s4067_s20 = smov 3   ;;  %s55_s30 = int_to_ptr.hbm [resolvable:$true] %s54_s30 }
  0x1a   :  { %s79_s24 = sshll.u32 %s4616_s5, 4  ;;  %s130_s5 = sshll.u32 %s4586_s8, 4  ;;  %s80_s24 = int_to_ptr.hbm [resolvable:$true] %s79_s24  ;;  %s131_s5 = int_to_ptr.hbm [resolvable:$true] %s130_s5 }
  0x1b   :  { %62 = dma.hbm_to_vmem [thread:$0]  %s55_s30, 256, %s57_s0, [#allocation6], %s4601_s6, %s4601_s6, %s4063_s25  }
  0x1c   :  { %s102_s29 = sshll.u32 %s4617_s28, 4  ;;  %s4068_s30 = smov [#allocation14]   ;;  %s103_s29 = int_to_ptr.hbm [resolvable:$true] %s102_s29 }
  0x1d   :  { %84 = dma.hbm_to_vmem [thread:$0]  %s80_s24, 16, %s82_s2, [#allocation9]  }
  0x1e   :  { %110 = dma.hbm_to_vmem [thread:$0]  %s103_s29, 96, %s105_s22, [#allocation12], %s4066_s19, %s4066_s19, %s4067_s20  }
  0x1f   :  { %s132_s0 = sshll.u32 %s4068_s30, 4  ;;  %s4069_s26 = smov 16   ;;  %s133_s0 = int_to_ptr.vmem [resolvable:$true] %s132_s0 }
  0x20   :  { %s4070_s27 = smov 1   ;;  %s160_s24 = sshll.u32 %s4590_s12, 4  ;;  %s161_s24 = int_to_ptr.hbm [resolvable:$true] %s160_s24 }
  0x21   :  { %138 = dma.hbm_to_vmem [thread:$0]  %s131_s5, 32, %s133_s0, [#allocation15], %s4069_s26, %s4069_s26, %s4070_s27  }
  0x22   :  { %s4071_s2 = smov [#allocation17]   ;;  %s4618_s1 = sld [smem:[#allocation35_spill]] }
  0x23   :  { %s162_s4 = sshll.u32 %s4071_s2, 4  ;;  %s4603_s19 = smov 64   ;;  %s163_s4 = int_to_ptr.vmem [resolvable:$true] %s162_s4 }
  0x24   :  { %s4073_s20 = smov 4   ;;  %s4074_s22 = smov [#allocation2]  }
  0x25   :  { %168 = dma.hbm_to_vmem [thread:$0]  %s161_s24, 4096, %s163_s4, [#allocation18], %s4603_s19, %s4603_s19, %s4073_s20  }
  0x26   :  { %s43_s29 = sshll.u32 %s4074_s22, 4  ;;  %s4619_s12 = sld [smem:[#allocation37_spill]]  ;;  %s44_s29 = int_to_ptr.vmem [resolvable:$true] %s43_s29 }
  0x27   :  { %s4620_s26 = smov 128   ;;  %s4621_s28 = sld [smem:[#allocation39_spill]] }
  0x28   :  { %s41_s6 = sshll.u32 %s4618_s1, 4  ;;  %s4075_s23 = smov [#allocation7]   ;;  %s42_s6 = int_to_ptr.hbm [resolvable:$true] %s41_s6 }
  0x29   :  { %49 = dma.hbm_to_vmem [thread:$0]  %s42_s6, 256, %s44_s29, [#allocation3], %s4620_s26, %s4620_s26, %s4063_s25  }
  0x2a   :  { %s70_s8 = sshll.u32 %s4075_s23, 4  ;;  %s4076_s24 = smov [#allocation10]   ;;  %s71_s8 = int_to_ptr.vmem [resolvable:$true] %s70_s8 }
  0x2b   :  { %s91_s4 = sshll.u32 %s4076_s24, 4  ;;  %s4077_s1 = smov 192   ;;  %s92_s4 = int_to_ptr.vmem [resolvable:$true] %s91_s4 }
  0x2c   :  { %s68_s0 = sshll.u32 %s4619_s12, 4  ;;  %s4078_s22 = smov 12   ;;  %s69_s0 = int_to_ptr.hbm [resolvable:$true] %s68_s0 }
  0x2d   :  { %s89_s2 = sshll.u32 %s4621_s28, 4  ;;  %s4622_s12 = sld [smem:[#allocation41_spill]]  ;;  %s90_s2 = int_to_ptr.hbm [resolvable:$true] %s89_s2 }
  0x2e   :  { %73 = dma.hbm_to_vmem [thread:$0]  %s69_s0, 16, %s71_s8, [#allocation6]  }
  0x2f   :  { %97 = dma.hbm_to_vmem [thread:$0]  %s90_s2, 6144, %s92_s4, [#allocation9], %s4077_s1, %s4077_s1, %s4078_s22  }
  0x30   :  { %s4079_s6 = smov [#allocation13]   ;;  %s145_s28 = sshll.u32 %s4588_s10, 4  ;;  %s146_s28 = int_to_ptr.hbm [resolvable:$true] %s145_s28 }
  0x31   :  { %s117_s29 = sshll.u32 %s4079_s6, 4  ;;  %s4623_s0 = smov 64   ;;  %s118_s29 = int_to_ptr.vmem [resolvable:$true] %s117_s29 }
  0x32   :  { %s4080_s23 = smov [#allocation16]   ;;  %s179_s4 = sshll.u32 %s4594_s16, 4  ;;  %s180_s4 = int_to_ptr.hbm [resolvable:$true] %s179_s4 }
  0x33   :  { %s115_s19 = sshll.u32 %s4622_s12, 4  ;;  %s147_s8 = sshll.u32 %s4080_s23, 4  ;;  %s116_s19 = int_to_ptr.hbm [resolvable:$true] %s115_s19  ;;  %s148_s8 = int_to_ptr.vmem [resolvable:$true] %s147_s8 }
  0x34   :  { %123 = dma.hbm_to_vmem [thread:$0]  %s116_s19, 2048, %s118_s29, [#allocation12], %s4623_s0, %s4623_s0, %s4073_s20  }
  0x35   :  { %153 = dma.hbm_to_vmem [thread:$0]  %s146_s28, 4096, %s148_s8, [#allocation15], %s4620_s26, %s4620_s26, %s4063_s25  }
  0x36   :  { %s194_s10 = sshll.u32 %s4596_s18, 4  ;;  %s4081_s5 = smov [#allocation19]   ;;  %s195_s10 = int_to_ptr.hbm [resolvable:$true] %s194_s10 }
  0x37   :  { %s181_s30 = sshll.u32 %s4081_s5, 4  ;;  %s4082_s19 = smov [#allocation20]   ;;  %s182_s30 = int_to_ptr.vmem [resolvable:$true] %s181_s30 }
  0x38   :  { %187 = dma.hbm_to_vmem [thread:$0]  %s180_s4, 1024, %s182_s30, [#allocation18], %s4623_s0, %s4623_s0, %s4073_s20  }
  0x39   :  { %s196_s16 = sshll.u32 %s4082_s19, 4  ;;  %s197_s16 = int_to_ptr.vmem [resolvable:$true] %s196_s16 }
  0x3a   :  { %202 = dma.hbm_to_vmem [thread:$0]  %s195_s10, 1024, %s197_s16, [#allocation21], %s4623_s0, %s4623_s0, %s4073_s20  }
  0x3b   :  { %4043 = dma.done.wait [#allocation3], 256  }
  0x3c   :  { %4044 = vsyncadd [#allocation3], 4294967040 }
  0x3d   :  { %4045 = dma.done.wait [#allocation6], 272  }
  0x3e   :  { %4046 = vsyncadd [#allocation6], 4294967024 }
  0x3f   :  { %4047 = dma.done.wait [#allocation9], 6160  }
  0x40   :  { %4048 = vsyncadd [#allocation9], 4294961136 }
  0x41   :  { %4049 = dma.done.wait [#allocation12], 2144  }
  0x42   :  { %4050 = vsyncadd [#allocation12], 4294965152 }
  0x43   :  { %4051 = dma.done.wait [#allocation15], 4128  }
  0x44   :  { %4052 = vsyncadd [#allocation15], 4294963168 }
  0x45   :  { %4053 = dma.done.wait [#allocation18], 5120  }
  0x46   :  { %4054 = vsyncadd [#allocation18], 4294962176 }
  0x47   :  { %4055 = dma.done.wait [#allocation21], 1024  }
  0x48   :  { %4056 = vsyncadd [#allocation21], 4294966272  ;;  %v254_v0 = vld [vmem:[#allocation2] sm:$0xff]  ;;  %v255_v1 = vld [vmem:[#allocation2 + $0x8] sm:$0xff]  ;;  %v4083_v2 = vmov 128.0   ;;  %s4084_s18 = smov 96  }
  0x49   :  { %258 = vadd.xlane.f32.xlu0 %v254_v0  ;;  %3577 = vrcp.f32 %v4083_v2  ;;  %v2877_v17 = vld [vmem:[#allocation10 + $0xa8] sm:$0xf]  ;;  %v3411_v18 = vld [vmem:[#allocation10 + $0xb0] sm:$0xf0]  ;;  %v3410_v19 = vld [vmem:[#allocation10 + $0xac] sm:$0xf] }
  0x4a   :  { %v2878_v20 = vor.u32 %v3411_v18, %v2877_v17  ;;  %v2879_v21 = vld [vmem:[#allocation10 + $0xb4] sm:$0xf0]  ;;  %v2885_v22 = vld [vmem:[#allocation10 + $0xb0] sm:$0xf]  ;;  %v3412_v23 = vld [vmem:[#allocation10 + $0xb8] sm:$0xf0] }
  0x4b   :  { %v2882_v24 = vor.u32 %v3410_v19, %v2879_v21  ;;  %v2886_v25 = vor.u32 %v3412_v23, %v2885_v22  ;;  %v2865_v26 = vld [vmem:[#allocation10 + $0x90] sm:$0xf]  ;;  %v3408_v27 = vld [vmem:[#allocation10 + $0x98] sm:$0xf0]  ;;  %v3407_v28 = vld [vmem:[#allocation10 + $0x94] sm:$0xf] }
  0x4c   :  { %486 = vmatpush.bf16.msra.mxu0 %v2878_v20  ;;  %v2866_v29 = vor.u32 %v3408_v27, %v2865_v26  ;;  %v2867_v30 = vld [vmem:[#allocation10 + $0x9c] sm:$0xf0]  ;;  %v2873_v31 = vld [vmem:[#allocation10 + $0x98] sm:$0xf]  ;;  %v3409_v32 = vld [vmem:[#allocation10 + $0xa0] sm:$0xf0] }
  0x4d   :  { %500 = vmatpush.bf16.msra.mxu1 %v2882_v24  ;;  %514 = vmatpush.bf16.msra.mxu2 %v2886_v25  ;;  %v2870_v33 = vor.u32 %v3407_v28, %v2867_v30  ;;  %v2874_v34 = vor.u32 %v3409_v32, %v2873_v31  ;;  %v2853_v35 = vld [vmem:[#allocation10 + $0x78] sm:$0xf]  ;;  %v3405_v36 = vld [vmem:[#allocation10 + $0x80] sm:$0xf0]  ;;  %v3404_v37 = vld [vmem:[#allocation10 + $0x7c] sm:$0xf] }
  0x4e   :  { %v2854_v38 = vor.u32 %v3405_v36, %v2853_v35  ;;  %v2855_v39 = vld [vmem:[#allocation10 + $0x84] sm:$0xf0]  ;;  %v2861_v40 = vld [vmem:[#allocation10 + $0x80] sm:$0xf]  ;;  %v3406_v41 = vld [vmem:[#allocation10 + $0x88] sm:$0xf0] }
  0x4f   :  { %v3578_v3 = vpop.eup %3577  ;;  %v2858_v42 = vor.u32 %v3404_v37, %v2855_v39  ;;  %v2862_v43 = vor.u32 %v3406_v41, %v2861_v40  ;;  %v2841_v44 = vld [vmem:[#allocation10 + $0x60] sm:$0xf]  ;;  %v3402_v45 = vld [vmem:[#allocation10 + $0x68] sm:$0xf0]  ;;  %v3401_v46 = vld [vmem:[#allocation10 + $0x64] sm:$0xf] }
  0x50   :  { %v263_v4 = vmul.f32 128.0, %v3578_v3  ;;  %vm267_vm0 = vweird.f32 %v3578_v3  ;;  %487 = vmatpush.bf16.msra.mxu0 %v2866_v29  ;;  %v2842_v47 = vor.u32 %v3402_v45, %v2841_v44  ;;  %v2843_v48 = vld [vmem:[#allocation10 + $0x6c] sm:$0xf0]  ;;  %v2849_v49 = vld [vmem:[#allocation10 + $0x68] sm:$0xf]  ;;  %vm574_vm7 = vcmask 261120  }
  0x51   :  { %260 = vadd.xlane.f32.xlu0 %v255_v1  ;;  %501 = vmatpush.bf16.msra.mxu1 %v2870_v33  ;;  %v3403_v50 = vld [vmem:[#allocation10 + $0x70] sm:$0xf0]  ;;  %v2846_v51 = vor.u32 %v3401_v46, %v2843_v48  ;;  %v2829_v53 = vld [vmem:[#allocation10 + $0x48] sm:$0xf]  ;;  %v3398_v55 = vld [vmem:[#allocation10 + $0x4c] sm:$0xf] }
  0x52   :  { %v264_v5 = vsub.f32 1.0, %v263_v4  ;;  %515 = vmatpush.bf16.msra.mxu2 %v2874_v34  ;;  %v2850_v52 = vor.u32 %v3403_v50, %v2849_v49  ;;  %v3399_v54 = vld [vmem:[#allocation10 + $0x50] sm:$0xf0]  ;;  %v2831_v57 = vld [vmem:[#allocation10 + $0x54] sm:$0xf0]  ;;  %s4085_s20 = smov 32  }
  0x53   :  { %v2830_v56 = vor.u32 %v3399_v54, %v2829_v53  ;;  %v2837_v58 = vld [vmem:[#allocation10 + $0x50] sm:$0xf]  ;;  %v3400_v59 = vld [vmem:[#allocation10 + $0x58] sm:$0xf0]  ;;  %v2834_v60 = vor.u32 %v3398_v55, %v2831_v57  ;;  %v2819_v2 = vld [vmem:[#allocation10 + $0x3c] sm:$0xf0] }
  0x54   :  { %v265_v6 = vmul.f32 %v3578_v3, %v264_v5  ;;  %488 = vmatpush.bf16.msra.mxu0 %v2854_v38  ;;  %v2838_v61 = vor.u32 %v3400_v59, %v2837_v58  ;;  %v2817_v62 = vld [vmem:[#allocation10 + $0x30] sm:$0xf]  ;;  %v3396_v63 = vld [vmem:[#allocation10 + $0x38] sm:$0xf0]  ;;  %v3397_v4 = vld [vmem:[#allocation10 + $0x40] sm:$0xf0] }
  0x55   :  { %502 = vmatpush.bf16.msra.mxu1 %v2858_v42  ;;  %v2793_v19 = vld [vmem:[#allocation10] sm:$0xf]  ;;  %v3390_v20 = vld [vmem:[#allocation10 + $0x8] sm:$0xf0]  ;;  %v3389_v21 = vld [vmem:[#allocation10 + $0x4] sm:$0xf] }
  0x56   :  { %v266_v7 = vadd.f32 %v3578_v3, %v265_v6  ;;  %516 = vmatpush.bf16.msra.mxu2 %v2862_v43  ;;  %v2794_v23 = vor.u32 %v3390_v20, %v2793_v19  ;;  %v2795_v24 = vld [vmem:[#allocation10 + $0xc] sm:$0xf0]  ;;  %v2801_v25 = vld [vmem:[#allocation10 + $0x8] sm:$0xf]  ;;  %v3391_v26 = vld [vmem:[#allocation10 + $0x10] sm:$0xf0] }
  0x57   :  { %v2798_v28 = vor.u32 %v3389_v21, %v2795_v24  ;;  %v2802_v29 = vor.u32 %v3391_v26, %v2801_v25  ;;  %vm673_vm8 = vcmask 130048   ;;  %vm911_vm9 = vcmask 523264   ;;  %s2755_s27 = sshll.u32 %s4599_s21, 4  ;;  %s4087_s8 = smov [#allocation22]   ;;  %s2756_s27 = int_to_ptr.hbm [resolvable:$true] %s2755_s27 }
  0x58   :  { %v4261_v8 = vsel %vm267_vm0, %v3578_v3, %v266_v7  ;;  %489 = vmatpush.bf16.msra.mxu0 %v2842_v47  ;;  %v2825_v3 = vld [vmem:[#allocation10 + $0x38] sm:$0xf]  ;;  %v3561_v47 = vld [vmem:[#allocation7] ss:$0 sm:$0xff]  ;;  %vm914_vm10 = vcmask 785408   ;;  %s2739_s2 = sshll.u32 %s4087_s8, 4  ;;  %s2740_s2 = int_to_ptr.vmem [resolvable:$true] %s2739_s2 }
  0x59   :  { %503 = vmatpush.bf16.msra.mxu1 %v2846_v51  ;;  %v2826_v6 = vor.u32 %v3397_v4, %v2825_v3  ;;  %v2805_v7 = vld [vmem:[#allocation10 + $0x18] sm:$0xf]  ;;  %s4625_s1 = sld [smem:[#allocation42_spill]]  ;;  %s4088_s21 = smov [#allocation25]  }
  0x5a   :  { %517 = vmatpush.bf16.msra.mxu2 %v2850_v52  ;;  %v3562_v52 = vld [vmem:[#allocation8] ss:$0 sm:$0xff]  ;;  %s4626_s10 = sld [smem:[#allocation44_spill]] }
  0x5c   :  { %490 = vmatpush.bf16.msra.mxu0 %v2830_v56 }
  0x5d   :  { %504 = vmatpush.bf16.msra.mxu1 %v2834_v60 }
  0x5e   :  { %518 = vmatpush.bf16.msra.mxu2 %v2838_v61 }
  0x62   :  { %519 = vmatpush.bf16.msra.mxu2 %v2826_v6 }
  0xbc   :  { %v259_v9 = vpop.xlane.xlu0 %258 }
  0xbd   :  { %v269_v10 = vmul.f32 %v4261_v8, %v259_v9  ;;  %v3393_v9 = vld [vmem:[#allocation10 + $0x20] sm:$0xf0] }
  0xbf   :  { %v4264_v11 = vsub.f32 %v254_v0, %v269_v10  ;;  %v3395_v0 = vld [vmem:[#allocation10 + $0x34] sm:$0xf]  ;;  %v3392_v10 = vld [vmem:[#allocation10 + $0x1c] sm:$0xf] }
  0xc0   :  { %v2822_v5 = vor.u32 %v3395_v0, %v2819_v2 }
  0xc1   :  { %v273_v12 = vmul.f32 %v4264_v11, %v4264_v11 }
  0xc2   :  { %505 = vmatpush.bf16.msra.mxu1 %v2822_v5 }
  0xc3   :  { %275 = vadd.xlane.f32.xlu1 %v273_v12  ;;  %v2806_v12 = vor.u32 %v3393_v9, %v2805_v7 }
  0xc4   :  { %v261_v13 = vpop.xlane.xlu0 %260 }
  0xc5   :  { %v270_v14 = vmul.f32 %v4261_v8, %v261_v13  ;;  %v2807_v13 = vld [vmem:[#allocation10 + $0x24] sm:$0xf0] }
  0xc6   :  { %v2810_v17 = vor.u32 %v3392_v10, %v2807_v13 }
  0xc7   :  { %v4269_v15 = vsub.f32 %v255_v1, %v270_v14  ;;  %v2818_v1 = vor.u32 %v3396_v63, %v2817_v62  ;;  %v2813_v14 = vld [vmem:[#allocation10 + $0x20] sm:$0xf] }
  0xc8   :  { %506 = vmatpush.bf16.msra.mxu1 %v2810_v17 }
  0xc9   :  { %v274_v16 = vmul.f32 %v4269_v15, %v4269_v15  ;;  %491 = vmatpush.bf16.msra.mxu0 %v2818_v1 }
  0xcb   :  { %277 = vadd.xlane.f32.xlu1 %v274_v16  ;;  %v3394_v16 = vld [vmem:[#allocation10 + $0x28] sm:$0xf0] }
  0xcc   :  { %v2814_v18 = vor.u32 %v3394_v16, %v2813_v14  ;;  %507 = vmatpush.bf16.msra.mxu1 %v2798_v28 }
  0xcd   :  { %492 = vmatpush.bf16.msra.mxu0 %v2806_v12 }
  0xce   :  { %520 = vmatpush.bf16.msra.mxu2 %v2814_v18 }
  0xd1   :  { %493 = vmatpush.bf16.msra.mxu0 %v2794_v23 }
  0xd2   :  { %521 = vmatpush.bf16.msra.mxu2 %v2802_v29 }
 0x136   :  { %v276_v22 = vpop.xlane.xlu1 %275 }
 0x137   :  { %v279_v27 = vmul.f32 %v276_v22, %v4261_v8 }
 0x139   :  { %v281_v30 = vadd.f32 1e-12, %v279_v27 }
 0x13b   :  { %3579 = vrsqrt.f32 %v281_v30  ;;  %vm289_vm2 = vweird.f32 %v281_v30 }
 0x13e   :  { %v278_v31 = vpop.xlane.xlu1 %277 }
 0x13f   :  { %v280_v32 = vmul.f32 %v278_v31, %v4261_v8 }
 0x141   :  { %v3580_v33 = vpop.eup %3579  ;;  %v282_v34 = vadd.f32 1e-12, %v280_v32 }
 0x142   :  { %v284_v35 = vmul.f32 %v3580_v33, %v281_v30  ;;  %vm290_vm1 = vweird.f32 %v3580_v33 }
 0x143   :  { %3581 = vrsqrt.f32 %v282_v34  ;;  %vm291_vm3 = vmor %vm289_vm2, %vm290_vm1  ;;  %vm299_vm5 = vweird.f32 %v282_v34 }
 0x144   :  { %v285_v36 = vmul.f32 %v3580_v33, %v284_v35 }
 0x146   :  { %v286_v37 = vmul.f32 0.5, %v285_v36 }
 0x148   :  { %v287_v38 = vsub.f32 1.5, %v286_v37 }
 0x149   :  { %v3582_v39 = vpop.eup %3581 }
 0x14a   :  { %v288_v40 = vmul.f32 %v3580_v33, %v287_v38  ;;  %v294_v41 = vmul.f32 %v3582_v39, %v282_v34  ;;  %vm300_vm4 = vweird.f32 %v3582_v39 }
 0x14b   :  { %vm301_vm6 = vmor %vm299_vm5, %vm300_vm4 }
 0x14c   :  { %v295_v42 = vmul.f32 %v3582_v39, %v294_v41  ;;  %v292_v43 = vsel %vm291_vm3, %v3580_v33, %v288_v40 }
 0x14d   :  { %v303_v46 = vmul.f32 %v292_v43, %v4264_v11  ;;  %v350_v11 = vld [vmem:[#allocation11] sm:$0x7] }
 0x14e   :  { %v296_v44 = vmul.f32 0.5, %v295_v42  ;;  %v352_v57 = vperm.slane %v350_v11, 0  ;;  %v353_v58 = vperm.slane %v350_v11, 1  ;;  %v354_v0 = vperm.slane %v350_v11, 2 }
 0x14f   :  { %v308_v51 = vmul.f32 %v3561_v47, %v303_v46 }
 0x150   :  { %v297_v45 = vsub.f32 1.5, %v296_v44 }
 0x151   :  { %v4277_v54 = vadd.f32 %v3562_v52, %v308_v51 }
 0x152   :  { %v298_v48 = vmul.f32 %v3582_v39, %v297_v45 }
 0x154   :  { %v302_v49 = vsel %vm301_vm6, %v3582_v39, %v298_v48 }
 0x155   :  { %v304_v50 = vmul.f32 %v302_v49, %v4269_v15 }
 0x157   :  { %v309_v53 = vmul.f32 %v3561_v47, %v304_v50 }
 0x159   :  { %v4279_v55 = vadd.f32 %v3562_v52, %v309_v53 }
 0x15b   :  { %v317_v56 = vpack.c.bf16 %v4279_v55, %v4277_v54 }
 0x15d   :  { %494 = vmatmul.bf16.vlgmr.msra.gmra.mxu0 %v317_v56  ;;  %508 = vmatmul.bf16.vlgmr.msra.gmra.mxu1 %v317_v56 }
 0x15e   :  { %522 = vmatmul.bf16.vlgmr.msra.gmra.mxu2 %v317_v56 }
 0x1da   :  { %v495_v59 = vpop.f32.mrf.mxu0  ;;  %v509_v60 = vpop.f32.mrf.mxu1 }
 0x1db   :  { %v496_v61 = vadd.f32 %v495_v59, %v352_v57  ;;  %v510_v15 = vadd.f32 %v509_v60, %v353_v58  ;;  %v315_v60 = vld [vmem:[#allocation5] sm:$0xff] }
 0x1dd   :  { %v528_v62 = vpack.c.bf16 %v510_v15, %v496_v61 }
 0x1df   :  { %538 = vrot.lane.b32.xlu0 %v528_v62, %s4623_s0  ;;  %534 = vrot.lane.b32.xlu2 %v528_v62, %s4084_s18  ;;  %v546_v6 = vrot.slane %v528_v62, 4  ;;  %v568_v24 = vunpack.c.l.b16 %v528_v62 }
 0x1e1   :  { %v523_v63 = vpop.f32.mrf.mxu2  ;;  %v571_v12 = vunpack.c.l.b16 %v546_v6 }
 0x1e2   :  { %v497_v1 = vpop.f32.mrf.mxu0  ;;  %v511_v2 = vpop.f32.mrf.mxu1  ;;  %v524_v7 = vadd.f32 %v523_v63, %v354_v0  ;;  %v316_v63 = vld [vmem:[#allocation5 + $0x8] sm:$0xff] }
 0x1e3   :  { %v498_v3 = vadd.f32 %v497_v1, %v352_v57  ;;  %v512_v4 = vadd.f32 %v511_v2, %v353_v58 }
 0x1e4   :  { %v4287_v14 = vpack.c.bf16 %v524_v7, %v524_v7 }
 0x1e5   :  { %v530_v5 = vpack.c.bf16 %v512_v4, %v498_v3 }
 0x1e6   :  { %v775_v20 = vunpack.c.l.b16 %v4287_v14 }
 0x1e7   :  { %540 = vrot.lane.b32.xlu1 %v530_v5, %s4623_s0  ;;  %536 = vrot.lane.b32.xlu2 %v530_v5, %s4084_s18  ;;  %v547_v9 = vrot.slane %v530_v5, 4  ;;  %v569_v22 = vunpack.c.l.b16 %v530_v5 }
 0x1e9   :  { %v525_v10 = vpop.f32.mrf.mxu2  ;;  %v572_v13 = vunpack.c.l.b16 %v547_v9  ;;  %v570_v25 = vpack.c.b16 %v569_v22, %v568_v24 }
 0x1ea   :  { %v526_v16 = vadd.f32 %v525_v10, %v354_v0 }
 0x1eb   :  { %v573_v17 = vpack.c.b16 %v572_v13, %v571_v12 }
 0x1ec   :  { %v4289_v18 = vpack.c.bf16 %v526_v16, %v526_v16 }
 0x1ed   :  { %v579_v19 = vsel %vm574_vm7, %v573_v17, 0 }
 0x1ee   :  { %588 = vmatpush.bf16.xpose.msrb.mxu0 %v579_v19  ;;  %v776_v21 = vunpack.c.l.b16 %v4289_v18 }
 0x1ef   :  { %542 = vrot.lane.b32.xlu2 %v528_v62, %s4085_s20 }
 0x1f0   :  { %v777_v23 = vpack.c.b16 %v776_v21, %v775_v20 }
 0x1f2   :  { %789 = vmatpush.bf16.msrb.mxu1 %v777_v23 }
 0x1f5   :  { %2887 = vmatmul.msk.bf16.vlgmr.msrb.gmra.mxu0 %vm574_vm7, %v570_v25 }
 0x1f7   :  { %544 = vrot.lane.b32.xlu2 %v530_v5, %s4085_s20 }
 0x239   :  { %v535_v26 = vpop.permute.xlu2 %534 }
 0x23a   :  { %v548_v27 = vrot.slane %v535_v26, 4  ;;  %v595_v36 = vunpack.c.l.b16 %v535_v26 }
 0x23c   :  { %v598_v30 = vunpack.c.l.b16 %v548_v27 }
 0x241   :  { %v537_v28 = vpop.permute.xlu2 %536 }
 0x242   :  { %v549_v29 = vrot.slane %v537_v28, 4  ;;  %v596_v35 = vunpack.c.l.b16 %v537_v28 }
 0x244   :  { %v599_v31 = vunpack.c.l.b16 %v549_v29  ;;  %v597_v37 = vpack.c.b16 %v596_v35, %v595_v36 }
 0x246   :  { %v600_v32 = vpack.c.b16 %v599_v31, %v598_v30 }
 0x248   :  { %v605_v33 = vsel %vm574_vm7, %v600_v32, 0 }
 0x249   :  { %614 = vmatpush.bf16.xpose.msra.mxu3 %v605_v33  ;;  %v543_v34 = vpop.permute.xlu2 %542 }
 0x24a   :  { %v552_v38 = vrot.slane %v543_v34, 4  ;;  %v647_v50 = vunpack.c.l.b16 %v543_v34 }
 0x24c   :  { %v650_v41 = vunpack.c.l.b16 %v552_v38 }
 0x250   :  { %2888 = vmatmul.msk.bf16.vlgmr.msra.gmra.mxu3 %vm574_vm7, %v597_v37 }
 0x251   :  { %v545_v39 = vpop.permute.xlu2 %544  ;;  %v539_v43 = vpop.permute.xlu0 %538 }
 0x252   :  { %v553_v40 = vrot.slane %v545_v39, 4  ;;  %v550_v45 = vrot.slane %v539_v43, 4  ;;  %v648_v48 = vunpack.c.l.b16 %v545_v39  ;;  %v621_v58 = vunpack.c.l.b16 %v539_v43 }
 0x254   :  { %v651_v42 = vunpack.c.l.b16 %v553_v40  ;;  %v624_v51 = vunpack.c.l.b16 %v550_v45  ;;  %v649_v53 = vpack.c.b16 %v648_v48, %v647_v50 }
 0x256   :  { %v652_v44 = vpack.c.b16 %v651_v42, %v650_v41 }
 0x258   :  { %v657_v46 = vsel %vm574_vm7, %v652_v44, 0 }
 0x259   :  { %v541_v47 = vpop.permute.xlu1 %540  ;;  %666 = vmatpush.bf16.xpose.msra.mxu0 %v657_v46 }
 0x25a   :  { %v551_v49 = vrot.slane %v541_v47, 4  ;;  %v622_v57 = vunpack.c.l.b16 %v541_v47 }
 0x25c   :  { %v625_v52 = vunpack.c.l.b16 %v551_v49  ;;  %v623_v59 = vpack.c.b16 %v622_v57, %v621_v58 }
 0x25e   :  { %v626_v56 = vpack.c.b16 %v625_v52, %v624_v51 }
 0x260   :  { %2890 = vmatmul.msk.bf16.vlgmr.msra.gmra.mxu0 %vm574_vm7, %v649_v53  ;;  %v631_v11 = vsel %vm574_vm7, %v626_v56, 0 }
 0x261   :  { %640 = vmatpush.bf16.xpose.msrb.mxu3 %v631_v11 }
 0x268   :  { %2889 = vmatmul.msk.bf16.vlgmr.msrb.gmra.mxu3 %vm574_vm7, %v623_v59 }
 0x272   :  { %v590_v61 = vpop.f32.mrf.mxu0 }
 0x273   :  { %v4303_v15 = vadd.f32 %v590_v61, %v315_v60 }
 0x275   :  { %v674_v62 = vsel %vm673_vm8, %v4303_v15, -inf }
 0x276   :  { %675 = vmax.xlane.f32.xlu1 %v674_v62 }
 0x27a   :  { %v592_v0 = vpop.f32.mrf.mxu0 }
 0x27b   :  { %v4307_v1 = vadd.f32 %v592_v0, %v316_v63 }
 0x27d   :  { %v677_v2 = vsel %vm673_vm8, %v4307_v1, -inf }
 0x27e   :  { %678 = vmax.xlane.f32.xlu0 %v677_v2 }
 0x2d3   :  { %v616_v3 = vpop.f32.mrf.mxu3 }
 0x2d4   :  { %v617_v4 = vadd.f32 %v616_v3, %v315_v60 }
 0x2d6   :  { %v680_v5 = vsel %vm673_vm8, %v617_v4, -inf }
 0x2d7   :  { %681 = vmax.xlane.f32.xlu2 %v680_v5 }
 0x2db   :  { %v618_v10 = vpop.f32.mrf.mxu3 }
 0x2dc   :  { %v619_v12 = vadd.f32 %v618_v10, %v316_v63 }
 0x2dd   :  { %v668_v6 = vpop.f32.mrf.mxu0 }
 0x2de   :  { %v669_v7 = vadd.f32 %v668_v6, %v315_v60  ;;  %v683_v19 = vsel %vm673_vm8, %v619_v12, -inf }
 0x2e0   :  { %v692_v9 = vsel %vm673_vm8, %v669_v7, -inf }
 0x2e1   :  { %693 = vmax.xlane.f32.xlu0 %v692_v9 }
 0x2e5   :  { %v670_v13 = vpop.f32.mrf.mxu0 }
 0x2e6   :  { %v671_v16 = vadd.f32 %v670_v13, %v316_v63 }
 0x2e8   :  { %v695_v17 = vsel %vm673_vm8, %v671_v16, -inf }
 0x2e9   :  { %696 = vmax.xlane.f32.xlu2 %v695_v17  ;;  %684 = vmax.xlane.f32.xlu0 %v683_v19  ;;  %v676_v35 = vpop.xlane.xlu1 %675 }
 0x2ea   :  { %v698_v3 = vsub.f32 %v4303_v15, %v676_v35 }
 0x2eb   :  { %v642_v20 = vpop.f32.mrf.mxu3 }
 0x2ec   :  { %v643_v21 = vadd.f32 %v642_v20, %v315_v60 }
 0x2ee   :  { %v686_v22 = vsel %vm673_vm8, %v643_v21, -inf }
 0x2ef   :  { %687 = vmax.xlane.f32.xlu1 %v686_v22 }
 0x2f1   :  { %v679_v28 = vpop.xlane.xlu0 %678 }
 0x2f2   :  { %v699_v0 = vsub.f32 %v4307_v1, %v679_v28 }
 0x2f3   :  { %v644_v23 = vpop.f32.mrf.mxu3 }
 0x2f4   :  { %v645_v24 = vadd.f32 %v644_v23, %v316_v63  ;;  %v708_v2 = vmul.f32 1.442695, %v699_v0 }
 0x2f6   :  { %v689_v25 = vsel %vm673_vm8, %v645_v24, -inf }
 0x2f7   :  { %690 = vmax.xlane.f32.xlu2 %v689_v25 }
 0x2fd   :  { %560 = vrot.lane.b32.xlu0 %v4287_v14, %s4623_s0 }
 0x308   :  { %558 = vrot.lane.b32.xlu1 %v4289_v18, %s4084_s18 }
 0x30f   :  { %556 = vrot.lane.b32.xlu2 %v4287_v14, %s4084_s18 }
 0x34a   :  { %v682_v26 = vpop.xlane.xlu2 %681 }
 0x34b   :  { %v700_v27 = vsub.f32 %v617_v4, %v682_v26  ;;  %v706_v4 = vmul.f32 1.442695, %v698_v3 }
 0x34d   :  { %v710_v29 = vmul.f32 1.442695, %v700_v27 }
 0x34f   :  { %3583 = vpow2.f32 %v710_v29 }
 0x354   :  { %v694_v30 = vpop.xlane.xlu0 %693 }
 0x355   :  { %v4323_v31 = vpop.eup %3583  ;;  %v704_v32 = vsub.f32 %v669_v7, %v694_v30 }
 0x356   :  { %v728_v33 = vsel %vm673_vm8, %v4323_v31, 0.0 }
 0x357   :  { %v718_v34 = vmul.f32 1.442695, %v704_v32  ;;  %729 = vadd.xlane.f32.xlu2 %v728_v33 }
 0x359   :  { %3585 = vpow2.f32 %v718_v34 }
 0x35c   :  { %v697_v36 = vpop.xlane.xlu2 %696  ;;  %v685_v37 = vpop.xlane.xlu0 %684 }
 0x35d   :  { %v705_v38 = vsub.f32 %v671_v16, %v697_v36  ;;  %v701_v39 = vsub.f32 %v619_v12, %v685_v37 }
 0x35f   :  { %v4327_v40 = vpop.eup %3585  ;;  %v720_v41 = vmul.f32 1.442695, %v705_v38  ;;  %v712_v42 = vmul.f32 1.442695, %v701_v39 }
 0x360   :  { %v740_v43 = vsel %vm673_vm8, %v4327_v40, 0.0 }
 0x361   :  { %3587 = vpow2.f32 %v720_v41  ;;  %741 = vadd.xlane.f32.xlu1 %v740_v43 }
 0x362   :  { %3589 = vpow2.f32 %v712_v42  ;;  %v688_v44 = vpop.xlane.xlu1 %687 }
 0x363   :  { %v702_v45 = vsub.f32 %v643_v21, %v688_v44 }
 0x365   :  { %v714_v46 = vmul.f32 1.442695, %v702_v45 }
 0x367   :  { %v4331_v47 = vpop.eup %3587  ;;  %3591 = vpow2.f32 %v714_v46 }
 0x368   :  { %v3590_v48 = vpop.eup %3589  ;;  %v743_v49 = vsel %vm673_vm8, %v4331_v47, 0.0 }
 0x369   :  { %744 = vadd.xlane.f32.xlu0 %v743_v49  ;;  %v731_v50 = vsel %vm673_vm8, %v3590_v48, 0.0 }
 0x36a   :  { %732 = vadd.xlane.f32.xlu1 %v731_v50  ;;  %v691_v51 = vpop.xlane.xlu2 %690 }
 0x36b   :  { %v703_v52 = vsub.f32 %v645_v24, %v691_v51 }
 0x36d   :  { %v3592_v53 = vpop.eup %3591  ;;  %v716_v56 = vmul.f32 1.442695, %v703_v52 }
 0x36e   :  { %v734_v11 = vsel %vm673_vm8, %v3592_v53, 0.0 }
 0x36f   :  { %3593 = vpow2.f32 %v716_v56 }
 0x370   :  { %3595 = vpow2.f32 %v708_v2 }
 0x371   :  { %735 = vadd.xlane.f32.xlu0 %v734_v11  ;;  %3597 = vpow2.f32 %v706_v4 }
 0x372   :  { %v557_v59 = vpop.permute.xlu2 %556 }
 0x373   :  { %v801_v61 = vunpack.c.l.b16 %v557_v59 }
 0x375   :  { %v3594_v57 = vpop.eup %3593 }
 0x376   :  { %v737_v58 = vsel %vm673_vm8, %v3594_v57, 0.0  ;;  %v4346_v5 = vpop.eup %3595 }
 0x377   :  { %738 = vadd.xlane.f32.xlu2 %v737_v58  ;;  %v725_v6 = vsel %vm673_vm8, %v4346_v5, 0.0  ;;  %v4350_v7 = vpop.eup %3597 }
 0x37a   :  { %v559_v60 = vpop.permute.xlu1 %558 }
 0x37b   :  { %v802_v62 = vunpack.c.l.b16 %v559_v60 }
 0x37d   :  { %v803_v63 = vpack.c.b16 %v802_v62, %v801_v61 }
 0x37f   :  { %815 = vmatpush.bf16.msrb.mxu2 %v803_v63 }
 0x383   :  { %566 = vrot.lane.b32.xlu1 %v4289_v18, %s4085_s20 }
 0x385   :  { %564 = vrot.lane.b32.xlu0 %v4287_v14, %s4085_s20  ;;  %v722_v14 = vsel %vm673_vm8, %v4350_v7, 0.0 }
 0x38f   :  { %562 = vrot.lane.b32.xlu2 %v4289_v18, %s4623_s0  ;;  %v561_v18 = vpop.permute.xlu0 %560 }
 0x390   :  { %v827_v35 = vunpack.c.l.b16 %v561_v18 }
 0x3af   :  { %726 = vadd.xlane.f32.xlu0 %v725_v6 }
 0x3b8   :  { %723 = vadd.xlane.f32.xlu2 %v722_v14 }
 0x3ca   :  { %v730_v9 = vpop.xlane.xlu2 %729 }
 0x3cb   :  { %3599 = vrcp.f32 %v730_v9 }
 0x3d1   :  { %v3600_v12 = vpop.eup %3599 }
 0x3d2   :  { %v756_v13 = vmul.f32 %v3600_v12, %v4323_v31 }
 0x3d4   :  { %v742_v1 = vpop.xlane.xlu1 %741  ;;  %v764_v19 = vpack.c.bf16 %v756_v13, %v756_v13 }
 0x3d6   :  { %v798_v22 = vunpack.c.l.b16 %v764_v19 }
 0x3dc   :  { %v745_v10 = vpop.xlane.xlu0 %744 }
 0x3dd   :  { %v733_v15 = vpop.xlane.xlu1 %732 }
 0x3de   :  { %3601 = vrcp.f32 %v733_v15 }
 0x3e4   :  { %v3602_v16 = vpop.eup %3601  ;;  %v736_v17 = vpop.xlane.xlu0 %735 }
 0x3e5   :  { %v757_v20 = vmul.f32 %v3602_v16, %v3590_v48  ;;  %3603 = vrcp.f32 %v736_v17 }
 0x3e6   :  { %3605 = vrcp.f32 %v745_v10 }
 0x3e7   :  { %v765_v21 = vpack.c.bf16 %v757_v20, %v757_v20  ;;  %3607 = vrcp.f32 %v742_v1 }
 0x3e9   :  { %v799_v23 = vunpack.c.l.b16 %v765_v21 }
 0x3ea   :  { %v739_v24 = vpop.xlane.xlu2 %738 }
 0x3eb   :  { %v3604_v25 = vpop.eup %3603  ;;  %3609 = vrcp.f32 %v739_v24  ;;  %v800_v26 = vpack.c.b16 %v799_v23, %v798_v22  ;;  %v3420_v24 = vld [vmem:[#allocation13 + $0x38] sm:$0xff] }
 0x3ec   :  { %v3606_v27 = vpop.eup %3605  ;;  %v758_v28 = vmul.f32 %v3604_v25, %v3592_v53  ;;  %986 = vmatpush.bf16.msra.mxu1 %v3420_v24  ;;  %v3419_v25 = vld [vmem:[#allocation13 + $0x30] sm:$0xff] }
 0x3ed   :  { %2892 = vmatmul.msk.bf16.vlgmr.msrb.gmra.mxu2 %vm673_vm8, %v800_v26  ;;  %v3608_v29 = vpop.eup %3607  ;;  %v761_v31 = vmul.f32 %v3606_v27, %v4331_v47  ;;  %v3418_v26 = vld [vmem:[#allocation13 + $0x28] sm:$0xff]  ;;  %v3417_v27 = vld [vmem:[#allocation13 + $0x20] sm:$0xff] }
 0x3ee   :  { %v766_v32 = vpack.c.bf16 %v758_v28, %v758_v28  ;;  %v760_v36 = vmul.f32 %v3608_v29, %v4327_v40  ;;  %v3416_v28 = vld [vmem:[#allocation13 + $0x18] sm:$0xff]  ;;  %v3415_v29 = vld [vmem:[#allocation13 + $0x10] sm:$0xff] }
 0x3ef   :  { %v769_v39 = vpack.c.bf16 %v761_v31, %v761_v31  ;;  %v3413_v31 = vld [vmem:[#allocation13] sm:$0xff] }
 0x3f0   :  { %v824_v43 = vunpack.c.l.b16 %v766_v32  ;;  %v768_v45 = vpack.c.bf16 %v760_v36, %v760_v36  ;;  %987 = vmatpush.bf16.msra.mxu1 %v3419_v25  ;;  %v2955_v25 = vld [vmem:[#allocation16 + $0x38] sm:$0xf0] }
 0x3f1   :  { %v3610_v30 = vpop.eup %3609  ;;  %v851_v47 = vunpack.c.l.b16 %v769_v39 }
 0x3f2   :  { %v759_v33 = vmul.f32 %v3610_v30, %v3594_v57  ;;  %v563_v34 = vpop.permute.xlu2 %562  ;;  %v850_v52 = vunpack.c.l.b16 %v768_v45  ;;  %v3414_v30 = vld [vmem:[#allocation13 + $0x8] sm:$0xff] }
 0x3f3   :  { %v828_v37 = vunpack.c.l.b16 %v563_v34 }
 0x3f4   :  { %v767_v38 = vpack.c.bf16 %v759_v33, %v759_v33  ;;  %v852_v40 = vpack.c.b16 %v851_v47, %v850_v52  ;;  %988 = vmatpush.bf16.msra.mxu1 %v3418_v26 }
 0x3f5   :  { %v829_v41 = vpack.c.b16 %v828_v37, %v827_v35  ;;  %v567_v42 = vpop.permute.xlu1 %566 }
 0x3f6   :  { %v825_v44 = vunpack.c.l.b16 %v767_v38  ;;  %v854_v49 = vunpack.c.l.b16 %v567_v42 }
 0x3f7   :  { %841 = vmatpush.bf16.msra.mxu3 %v829_v41  ;;  %v565_v46 = vpop.permute.xlu0 %564 }
 0x3f8   :  { %v826_v48 = vpack.c.b16 %v825_v44, %v824_v43  ;;  %v853_v50 = vunpack.c.l.b16 %v565_v46  ;;  %989 = vmatpush.bf16.msra.mxu1 %v3417_v27  ;;  %v3563_v46 = vld [vmem:[%s4585_s7] ss:$0 sm:$0xff]  ;;  %v2945_v27 = vld [vmem:[#allocation16 + $0x20] sm:$0xf] }
 0x3fa   :  { %v855_v51 = vpack.c.b16 %v854_v49, %v853_v50  ;;  %2893 = vmatmul.msk.bf16.vlgmr.msra.gmra.mxu3 %vm673_vm8, %v826_v48 }
 0x3fc   :  { %867 = vmatpush.bf16.msrb.mxu0 %v855_v51  ;;  %990 = vmatpush.bf16.msra.mxu1 %v3416_v28  ;;  %v3426_v28 = vld [vmem:[#allocation16 + $0x24] sm:$0xf0] }
 0x3ff   :  { %2894 = vmatmul.msk.bf16.vlgmr.msrb.gmra.mxu0 %vm673_vm8, %v852_v40 }
 0x400   :  { %991 = vmatpush.bf16.msra.mxu1 %v3415_v29  ;;  %v3425_v29 = vld [vmem:[#allocation16 + $0x24] sm:$0xf] }
 0x404   :  { %992 = vmatpush.bf16.msra.mxu1 %v3414_v30  ;;  %v2946_v30 = vor.u32 %v3426_v28, %v2945_v27  ;;  %v3445_v27 = vld [vmem:[#allocation17 + $0x40] sm:$0xff] }
 0x408   :  { %993 = vmatpush.bf16.msra.mxu1 %v3413_v31  ;;  %v2947_v31 = vld [vmem:[#allocation16 + $0x28] sm:$0xf0] }
 0x422   :  { %v727_v53 = vpop.xlane.xlu0 %726 }
 0x423   :  { %3611 = vrcp.f32 %v727_v53 }
 0x429   :  { %v3612_v11 = vpop.eup %3611 }
 0x42a   :  { %v755_v57 = vmul.f32 %v3612_v11, %v4346_v5 }
 0x42b   :  { %v724_v56 = vpop.xlane.xlu2 %723 }
 0x42c   :  { %3613 = vrcp.f32 %v724_v56  ;;  %v763_v59 = vpack.c.bf16 %v755_v57, %v755_v57 }
 0x42e   :  { %v773_v62 = vunpack.c.l.b16 %v763_v59 }
 0x432   :  { %v3614_v58 = vpop.eup %3613 }
 0x433   :  { %v754_v60 = vmul.f32 %v3614_v58, %v4350_v7 }
 0x435   :  { %v762_v61 = vpack.c.bf16 %v754_v60, %v754_v60  ;;  %v3436_v60 = vld [vmem:[#allocation16 + $0x74] sm:$0xf0] }
 0x437   :  { %v772_v63 = vunpack.c.l.b16 %v762_v61  ;;  %v3435_v61 = vld [vmem:[#allocation16 + $0x74] sm:$0xf] }
 0x439   :  { %v774_v0 = vpack.c.b16 %v773_v62, %v772_v63  ;;  %v2987_v63 = vld [vmem:[#allocation16 + $0x78] sm:$0xf0] }
 0x43b   :  { %2891 = vmatmul.msk.bf16.vlgmr.msrb.gmra.mxu1 %vm673_vm8, %v774_v0  ;;  %v2990_v0 = vor.u32 %v3435_v61, %v2987_v63 }
 0x43d   :  { %1171 = vmatpush.bf16.msrb.mxu3 %v2990_v0 }
 0x470   :  { %v817_v2 = vpop.f32.mrf.mxu2 }
 0x471   :  { %v876_v3 = vpack.c.bf16 %v817_v2, %v817_v2  ;;  %v2977_v2 = vld [vmem:[#allocation16 + $0x60] sm:$0xf] }
 0x473   :  { %v889_v14 = vunpack.c.l.b16 %v876_v3  ;;  %v3434_v3 = vld [vmem:[#allocation16 + $0x64] sm:$0xf0] }
 0x478   :  { %v819_v4 = vpop.f32.mrf.mxu2 }
 0x479   :  { %v877_v6 = vpack.c.bf16 %v819_v4, %v819_v4  ;;  %v3433_v4 = vld [vmem:[#allocation16 + $0x64] sm:$0xf] }
 0x47b   :  { %v890_v18 = vunpack.c.l.b16 %v877_v6  ;;  %v2978_v6 = vor.u32 %v3434_v3, %v2977_v2  ;;  %v3564_v2 = vld [vmem:[#allocation14] ss:$0 sm:$0xff] }
 0x47c   :  { %v869_v9 = vpop.f32.mrf.mxu0 }
 0x47d   :  { %v891_v1 = vpack.c.b16 %v890_v18, %v889_v14  ;;  %v843_v10 = vpop.f32.mrf.mxu3  ;;  %v880_v20 = vpack.c.bf16 %v869_v9, %v869_v9  ;;  %v2979_v14 = vld [vmem:[#allocation16 + $0x68] sm:$0xf0]  ;;  %v3432_v9 = vld [vmem:[#allocation16 + $0x54] sm:$0xf0] }
 0x47e   :  { %v878_v5 = vpack.c.bf16 %v843_v10, %v843_v10  ;;  %v2982_v18 = vor.u32 %v3433_v4, %v2979_v14  ;;  %v3431_v10 = vld [vmem:[#allocation16 + $0x54] sm:$0xf] }
 0x47f   :  { %892 = vrot.lane.b32.xlu1 %v891_v1, %s4085_s20  ;;  %v903_v22 = vunpack.c.l.b16 %v880_v20  ;;  %v2969_v1 = vld [vmem:[#allocation16 + $0x50] sm:$0xf] }
 0x480   :  { %v896_v13 = vunpack.c.l.b16 %v878_v5  ;;  %1172 = vmatpush.bf16.msrb.mxu3 %v2982_v18  ;;  %v2970_v5 = vor.u32 %v3432_v9, %v2969_v1  ;;  %v3565_v18 = vld [vmem:[%s4587_s9] ss:$0 sm:$0xff] }
 0x484   :  { %v871_v12 = vpop.f32.mrf.mxu0 }
 0x485   :  { %v845_v15 = vpop.f32.mrf.mxu3  ;;  %v881_v17 = vpack.c.bf16 %v871_v12, %v871_v12  ;;  %v2961_v12 = vld [vmem:[#allocation16 + $0x40] sm:$0xf] }
 0x486   :  { %v879_v7 = vpack.c.bf16 %v845_v15, %v845_v15  ;;  %v2971_v15 = vld [vmem:[#allocation16 + $0x58] sm:$0xf0] }
 0x487   :  { %v904_v21 = vunpack.c.l.b16 %v881_v17 }
 0x488   :  { %v897_v16 = vunpack.c.l.b16 %v879_v7  ;;  %v2974_v7 = vor.u32 %v3431_v10, %v2971_v15  ;;  %v3452_v15 = vld [vmem:[#allocation17 + $0x78] sm:$0xff] }
 0x489   :  { %v905_v23 = vpack.c.b16 %v904_v21, %v903_v22  ;;  %v2953_v21 = vld [vmem:[#allocation16 + $0x30] sm:$0xf]  ;;  %v3428_v22 = vld [vmem:[#allocation16 + $0x34] sm:$0xf0]  ;;  %1369 = vmatpush.bf16.msrb.mxu1 %v3452_v15 }
 0x48a   :  { %v898_v19 = vpack.c.b16 %v897_v16, %v896_v13  ;;  %1173 = vmatpush.bf16.msrb.mxu3 %v2974_v7  ;;  %v3430_v13 = vld [vmem:[#allocation16 + $0x44] sm:$0xf0]  ;;  %v3429_v16 = vld [vmem:[#allocation16 + $0x44] sm:$0xf]  ;;  %v2954_v24 = vor.u32 %v3428_v22, %v2953_v21  ;;  %v3451_v7 = vld [vmem:[#allocation17 + $0x70] sm:$0xff] }
 0x48b   :  { %v2962_v17 = vor.u32 %v3430_v13, %v2961_v12  ;;  %v3442_v12 = vld [vmem:[#allocation17 + $0x28] sm:$0xff]  ;;  %v3439_v21 = vld [vmem:[#allocation17 + $0x10] sm:$0xff] }
 0x48c   :  { %899 = vrot.lane.b32.xlu1 %v898_v19, %s4623_s0  ;;  %v2963_v19 = vld [vmem:[#allocation16 + $0x48] sm:$0xf0]  ;;  %v3447_v22 = vld [vmem:[#allocation17 + $0x50] sm:$0xff] }
 0x48d   :  { %v2966_v20 = vor.u32 %v3429_v16, %v2963_v19  ;;  %1370 = vmatpush.bf16.msrb.mxu1 %v3451_v7  ;;  %v3450_v13 = vld [vmem:[#allocation17 + $0x68] sm:$0xff]  ;;  %v3441_v16 = vld [vmem:[#allocation17 + $0x20] sm:$0xff]  ;;  %v3440_v19 = vld [vmem:[#allocation17 + $0x18] sm:$0xff] }
 0x48f   :  { %1174 = vmatpush.bf16.msrb.mxu3 %v2966_v20  ;;  %v3448_v20 = vld [vmem:[#allocation17 + $0x58] sm:$0xff] }
 0x491   :  { %1371 = vmatpush.bf16.msrb.mxu1 %v3450_v13 }
 0x494   :  { %906 = vrot.lane.b32.xlu1 %v905_v23, %s4084_s18  ;;  %v3427_v23 = vld [vmem:[#allocation16 + $0x34] sm:$0xf] }
 0x495   :  { %v2958_v26 = vor.u32 %v3427_v23, %v2955_v25  ;;  %v3438_v23 = vld [vmem:[#allocation17 + $0x8] sm:$0xff]  ;;  %v1071_v25 = vld [vmem:[%s4589_s11] sm:$0x3] }
 0x496   :  { %v1073_v28 = vperm.slane %v1071_v25, 0 }
 0x497   :  { %1175 = vmatpush.bf16.msrb.mxu3 %v2958_v26  ;;  %v3437_v26 = vld [vmem:[#allocation17] sm:$0xff] }
 0x4b8   :  { %v791_v32 = vpop.f32.mrf.mxu1 }
 0x4b9   :  { %v874_v36 = vpack.c.bf16 %v791_v32, %v791_v32  ;;  %v2950_v32 = vor.u32 %v3425_v29, %v2947_v31  ;;  %v1074_v29 = vperm.slane %v1071_v25, 1 }
 0x4bb   :  { %v884_v39 = vunpack.c.l.b16 %v874_v36  ;;  %1176 = vmatpush.bf16.msrb.mxu3 %v2950_v32 }
 0x4c0   :  { %v793_v34 = vpop.f32.mrf.mxu1 }
 0x4c1   :  { %v875_v35 = vpack.c.bf16 %v793_v34, %v793_v34  ;;  %v3424_v34 = vld [vmem:[#allocation16 + $0x14] sm:$0xf0] }
 0x4c3   :  { %v885_v38 = vunpack.c.l.b16 %v875_v35  ;;  %v3423_v35 = vld [vmem:[#allocation16 + $0x14] sm:$0xf] }
 0x4c5   :  { %v886_v41 = vpack.c.b16 %v885_v38, %v884_v39  ;;  %v2929_v38 = vld [vmem:[#allocation16] sm:$0xf]  ;;  %v3422_v39 = vld [vmem:[#allocation16 + $0x4] sm:$0xf0] }
 0x4f1   :  { %v893_v33 = vpop.permute.xlu1 %892 }
 0x4f2   :  { %v910_v42 = vsel %vm574_vm7, %v886_v41, %v893_v33  ;;  %v2937_v33 = vld [vmem:[#allocation16 + $0x10] sm:$0xf] }
 0x4f3   :  { %v2938_v36 = vor.u32 %v3424_v34, %v2937_v33 }
 0x4fe   :  { %v900_v37 = vpop.permute.xlu1 %899 }
 0x4ff   :  { %v913_v43 = vsel %vm911_vm9, %v910_v42, %v900_v37  ;;  %v2939_v37 = vld [vmem:[#allocation16 + $0x18] sm:$0xf0] }
 0x500   :  { %v2942_v42 = vor.u32 %v3423_v35, %v2939_v37 }
 0x502   :  { %1177 = vmatpush.bf16.msrb.mxu3 %v2942_v42 }
 0x506   :  { %v907_v44 = vpop.permute.xlu1 %906 }
 0x507   :  { %v916_v45 = vsel %vm914_vm10, %v913_v43, %v907_v44  ;;  %v3421_v43 = vld [vmem:[#allocation16 + $0x4] sm:$0xf]  ;;  %v2931_v44 = vld [vmem:[#allocation16 + $0x8] sm:$0xf0] }
 0x508   :  { %994 = vmatmul.bf16.vlgmr.msra.gmra.mxu1 %v916_v45 }
 0x585   :  { %v995_v48 = vpop.f32.mrf.mxu1 }
 0x586   :  { %v996_v49 = vadd.f32 %v3563_v46, %v995_v48  ;;  %v2934_v48 = vor.u32 %v3421_v43, %v2931_v44 }
 0x588   :  { %v1000_v50 = vadd.f32 %v996_v49, %v4277_v54  ;;  %1178 = vmatpush.bf16.msrb.mxu3 %v2934_v48 }
 0x58a   :  { %1004 = vadd.xlane.f32.xlu1 %v1000_v50 }
 0x58d   :  { %v997_v47 = vpop.f32.mrf.mxu1 }
 0x58e   :  { %v998_v51 = vadd.f32 %v3563_v46, %v997_v47  ;;  %v2930_v46 = vor.u32 %v3422_v39, %v2929_v38 }
 0x590   :  { %v1001_v52 = vadd.f32 %v998_v51, %v4279_v55  ;;  %v2985_v55 = vld [vmem:[#allocation16 + $0x70] sm:$0xf] }
 0x591   :  { %v2986_v62 = vor.u32 %v3436_v60, %v2985_v55 }
 0x592   :  { %1006 = vadd.xlane.f32.xlu2 %v1001_v52 }
 0x593   :  { %1157 = vmatpush.bf16.msra.mxu2 %v2986_v62 }
 0x597   :  { %1158 = vmatpush.bf16.msra.mxu2 %v2978_v6 }
 0x59b   :  { %1159 = vmatpush.bf16.msra.mxu2 %v2970_v5  ;;  %v3444_v5 = vld [vmem:[#allocation17 + $0x38] sm:$0xff] }
 0x59c   :  { %1355 = vmatpush.bf16.msra.mxu0 %v3444_v5 }
 0x59f   :  { %1160 = vmatpush.bf16.msra.mxu2 %v2962_v17  ;;  %v3449_v17 = vld [vmem:[#allocation17 + $0x60] sm:$0xff] }
 0x5a0   :  { %1372 = vmatpush.bf16.msrb.mxu1 %v3449_v17 }
 0x5a3   :  { %1161 = vmatpush.bf16.msra.mxu2 %v2954_v24  ;;  %v3446_v24 = vld [vmem:[#allocation17 + $0x48] sm:$0xff] }
 0x5a4   :  { %1373 = vmatpush.bf16.msrb.mxu1 %v3448_v20 }
 0x5a7   :  { %1162 = vmatpush.bf16.msra.mxu2 %v2946_v30 }
 0x5a8   :  { %1374 = vmatpush.bf16.msrb.mxu1 %v3447_v22 }
 0x5ab   :  { %1163 = vmatpush.bf16.msra.mxu2 %v2938_v36 }
 0x5ac   :  { %1375 = vmatpush.bf16.msrb.mxu1 %v3446_v24 }
 0x5af   :  { %1164 = vmatpush.bf16.msra.mxu2 %v2930_v46 }
 0x5b0   :  { %1376 = vmatpush.bf16.msrb.mxu1 %v3445_v27 }
 0x5fd   :  { %v1005_v40 = vpop.xlane.xlu1 %1004 }
 0x5fe   :  { %v1008_v53 = vmul.f32 %v1005_v40, %v4261_v8 }
 0x600   :  { %v4375_v56 = vsub.f32 %v1000_v50, %v1008_v53 }
 0x602   :  { %v1012_v11 = vmul.f32 %v4375_v56, %v4375_v56 }
 0x604   :  { %1014 = vadd.xlane.f32.xlu0 %v1012_v11 }
 0x605   :  { %v1007_v57 = vpop.xlane.xlu2 %1006 }
 0x606   :  { %v1009_v58 = vmul.f32 %v1007_v57, %v4261_v8 }
 0x608   :  { %v4380_v59 = vsub.f32 %v1001_v52, %v1009_v58 }
 0x60a   :  { %v1013_v54 = vmul.f32 %v4380_v59, %v4380_v59 }
 0x60c   :  { %1016 = vadd.xlane.f32.xlu2 %v1013_v54 }
 0x677   :  { %v1015_v41 = vpop.xlane.xlu0 %1014 }
 0x678   :  { %v1018_v45 = vmul.f32 %v1015_v41, %v4261_v8 }
 0x67a   :  { %v1020_v49 = vadd.f32 1e-12, %v1018_v45 }
 0x67c   :  { %3615 = vrsqrt.f32 %v1020_v49  ;;  %vm1028_vm12 = vweird.f32 %v1020_v49 }
 0x67f   :  { %v1017_v50 = vpop.xlane.xlu2 %1016 }
 0x680   :  { %v1019_v47 = vmul.f32 %v1017_v50, %v4261_v8 }
 0x682   :  { %v3616_v51 = vpop.eup %3615  ;;  %v1021_v52 = vadd.f32 1e-12, %v1019_v47 }
 0x683   :  { %v1023_v40 = vmul.f32 %v3616_v51, %v1020_v49  ;;  %vm1029_vm11 = vweird.f32 %v3616_v51 }
 0x684   :  { %3617 = vrsqrt.f32 %v1021_v52  ;;  %vm1030_vm13 = vmor %vm1028_vm12, %vm1029_vm11  ;;  %vm1038_vm15 = vweird.f32 %v1021_v52 }
 0x685   :  { %v1024_v53 = vmul.f32 %v3616_v51, %v1023_v40 }
 0x687   :  { %v1025_v11 = vmul.f32 0.5, %v1024_v53 }
 0x689   :  { %v1026_v57 = vsub.f32 1.5, %v1025_v11 }
 0x68a   :  { %v3618_v58 = vpop.eup %3617 }
 0x68b   :  { %v1027_v54 = vmul.f32 %v3616_v51, %v1026_v57  ;;  %v1033_v55 = vmul.f32 %v3618_v58, %v1021_v52  ;;  %vm1039_vm14 = vweird.f32 %v3618_v58 }
 0x68c   :  { %vm1040_vm0 = vmor %vm1038_vm15, %vm1039_vm14 }
 0x68d   :  { %v1034_v60 = vmul.f32 %v3618_v58, %v1033_v55  ;;  %v1031_v61 = vsel %vm1030_vm13, %v3616_v51, %v1027_v54 }
 0x68e   :  { %v1042_v0 = vmul.f32 %v1031_v61, %v4375_v56 }
 0x68f   :  { %v1035_v62 = vmul.f32 0.5, %v1034_v60 }
 0x690   :  { %v1047_v14 = vmul.f32 %v3564_v2, %v1042_v0 }
 0x691   :  { %v1036_v63 = vsub.f32 1.5, %v1035_v62 }
 0x692   :  { %v4391_v9 = vadd.f32 %v3565_v18, %v1047_v14 }
 0x693   :  { %v1037_v3 = vmul.f32 %v3618_v58, %v1036_v63 }
 0x695   :  { %v1041_v4 = vsel %vm1040_vm0, %v3618_v58, %v1037_v3 }
 0x696   :  { %v1043_v6 = vmul.f32 %v1041_v4, %v4380_v59  ;;  %v3443_v59 = vld [vmem:[#allocation17 + $0x30] sm:$0xff] }
 0x697   :  { %1356 = vmatpush.bf16.msra.mxu0 %v3443_v59 }
 0x698   :  { %v1048_v1 = vmul.f32 %v3564_v2, %v1043_v6 }
 0x69a   :  { %v4393_v10 = vadd.f32 %v3565_v18, %v1048_v1 }
 0x69b   :  { %1357 = vmatpush.bf16.msra.mxu0 %v3442_v12  ;;  %v3566_v12 = vld [vmem:[%s4591_s13] ss:$0 sm:$0xff] }
 0x69c   :  { %v1054_v56 = vpack.c.bf16 %v4393_v10, %v4391_v9 }
 0x69e   :  { %1165 = vmatmul.bf16.vlgmr.msra.gmra.mxu2 %v1054_v56  ;;  %1179 = vmatmul.bf16.vlgmr.msrb.gmra.mxu3 %v1054_v56 }
 0x69f   :  { %1358 = vmatpush.bf16.msra.mxu0 %v3441_v16 }
 0x6a3   :  { %1359 = vmatpush.bf16.msra.mxu0 %v3440_v19 }
 0x6a7   :  { %1360 = vmatpush.bf16.msra.mxu0 %v3439_v21 }
 0x6ab   :  { %1361 = vmatpush.bf16.msra.mxu0 %v3438_v23 }
 0x6af   :  { %1362 = vmatpush.bf16.msra.mxu0 %v3437_v26 }
 0x721   :  { %v1166_v30 = vpop.f32.mrf.mxu2  ;;  %v1180_v31 = vpop.f32.mrf.mxu3 }
 0x722   :  { %v1167_v32 = vadd.f32 %v1166_v30, %v1073_v28  ;;  %v1181_v33 = vadd.f32 %v1180_v31, %v1074_v29 }
 0x724   :  { %v1189_v34 = vmul.f32 0.044715, %v1167_v32  ;;  %v1190_v35 = vmul.f32 0.044715, %v1181_v33  ;;  %v1185_v2 = vmul.f32 0.5, %v1167_v32  ;;  %v1186_v6 = vmul.f32 0.5, %v1181_v33 }
 0x726   :  { %v1193_v36 = vmul.f32 %v1189_v34, %v1167_v32  ;;  %v1194_v37 = vmul.f32 %v1190_v35, %v1181_v33  ;;  %v3474_v34 = vld [vmem:[#allocation10 + $0x16c] sm:$0xf] }
 0x728   :  { %v1197_v38 = vmul.f32 %v1193_v36, %v1167_v32  ;;  %v1198_v39 = vmul.f32 %v1194_v37, %v1181_v33  ;;  %v3143_v36 = vld [vmem:[#allocation10 + $0x174] sm:$0xf0]  ;;  %v3149_v37 = vld [vmem:[#allocation10 + $0x170] sm:$0xf] }
 0x729   :  { %v1168_v41 = vpop.f32.mrf.mxu2  ;;  %v1182_v42 = vpop.f32.mrf.mxu3 }
 0x72a   :  { %v1201_v43 = vadd.f32 %v1197_v38, %v1167_v32  ;;  %v1169_v44 = vadd.f32 %v1168_v41, %v1073_v28  ;;  %v1183_v45 = vadd.f32 %v1182_v42, %v1074_v29  ;;  %v1202_v46 = vadd.f32 %v1198_v39, %v1181_v33  ;;  %v3475_v33 = vld [vmem:[#allocation10 + $0x170] sm:$0xf0]  ;;  %v3476_v38 = vld [vmem:[#allocation10 + $0x178] sm:$0xf0]  ;;  %v3129_v42 = vld [vmem:[#allocation10 + $0x150] sm:$0xf] }
 0x72b   :  { %v3146_v39 = vor.u32 %v3474_v34, %v3143_v36  ;;  %v3150_v41 = vor.u32 %v3476_v38, %v3149_v37  ;;  %v3454_v36 = vld [vmem:[#allocation10 + $0xc8] sm:$0xf0]  ;;  %v3453_v37 = vld [vmem:[#allocation10 + $0xc4] sm:$0xf] }
 0x72c   :  { %v1191_v48 = vmul.f32 0.044715, %v1169_v44  ;;  %v1192_v49 = vmul.f32 0.044715, %v1183_v45  ;;  %v1205_v50 = vmul.f32 0.7978846, %v1201_v43 }
 0x72d   :  { %v1206_v51 = vmul.f32 0.7978846, %v1202_v46  ;;  %v1187_v3 = vmul.f32 0.5, %v1169_v44  ;;  %v1188_v14 = vmul.f32 0.5, %v1183_v45  ;;  %1622 = vmatpush.bf16.msra.mxu3 %v3146_v39  ;;  %1636 = vmatpush.bf16.msrb.mxu0 %v3150_v41  ;;  %v3472_v43 = vld [vmem:[#allocation10 + $0x158] sm:$0xf0] }
 0x72e   :  { %v1195_v47 = vmul.f32 %v1191_v48, %v1169_v44  ;;  %v1196_v52 = vmul.f32 %v1192_v49, %v1183_v45  ;;  %3619 = vtanh.f32 %v1205_v50  ;;  %v3131_v46 = vld [vmem:[#allocation10 + $0x15c] sm:$0xf0]  ;;  %v3137_v48 = vld [vmem:[#allocation10 + $0x158] sm:$0xf]  ;;  %v3473_v49 = vld [vmem:[#allocation10 + $0x160] sm:$0xf0] }
 0x72f   :  { %3621 = vtanh.f32 %v1206_v51  ;;  %v3117_v51 = vld [vmem:[#allocation10 + $0x138] sm:$0xf]  ;;  %v3059_v41 = vld [vmem:[#allocation10 + $0xcc] sm:$0xf0] }
 0x730   :  { %v1199_v40 = vmul.f32 %v1195_v47, %v1169_v44  ;;  %v1200_v53 = vmul.f32 %v1196_v52, %v1183_v45  ;;  %v3138_v47 = vor.u32 %v3473_v49, %v3137_v48  ;;  %v3469_v52 = vld [vmem:[#allocation10 + $0x140] sm:$0xf0] }
 0x732   :  { %v1203_v11 = vadd.f32 %v1199_v40, %v1169_v44  ;;  %v1204_v57 = vadd.f32 %v1200_v53, %v1183_v45  ;;  %v3471_v44 = vld [vmem:[#allocation10 + $0x154] sm:$0xf]  ;;  %v3130_v45 = vor.u32 %v3472_v43, %v3129_v42  ;;  %1637 = vmatpush.bf16.msrb.mxu0 %v3138_v47  ;;  %v3468_v40 = vld [vmem:[#allocation10 + $0x13c] sm:$0xf]  ;;  %v3118_v53 = vor.u32 %v3469_v52, %v3117_v51  ;;  %v3065_v42 = vld [vmem:[#allocation10 + $0xc8] sm:$0xf] }
 0x733   :  { %v3134_v50 = vor.u32 %v3471_v44, %v3131_v46  ;;  %v3455_v43 = vld [vmem:[#allocation10 + $0xd0] sm:$0xf0]  ;;  %v3062_v44 = vor.u32 %v3453_v37, %v3059_v41 }
 0x734   :  { %v1207_v58 = vmul.f32 0.7978846, %v1203_v11  ;;  %v1208_v54 = vmul.f32 0.7978846, %v1204_v57  ;;  %v3620_v55 = vpop.eup %3619  ;;  %v3119_v11 = vld [vmem:[#allocation10 + $0x144] sm:$0xf0] }
 0x735   :  { %v3622_v60 = vpop.eup %3621  ;;  %v1213_v61 = vadd.f32 1.0, %v3620_v55  ;;  %1623 = vmatpush.bf16.msra.mxu3 %v3134_v50  ;;  %v3125_v57 = vld [vmem:[#allocation10 + $0x140] sm:$0xf] }
 0x736   :  { %3623 = vtanh.f32 %v1207_v58  ;;  %v1214_v63 = vadd.f32 1.0, %v3622_v60  ;;  %v3470_v58 = vld [vmem:[#allocation10 + $0x148] sm:$0xf0]  ;;  %v3105_v60 = vld [vmem:[#allocation10 + $0x120] sm:$0xf] }
 0x737   :  { %3625 = vtanh.f32 %v1208_v54  ;;  %v1217_v1 = vmul.f32 %v1213_v61, %v1185_v2  ;;  %v3122_v54 = vor.u32 %v3468_v40, %v3119_v11  ;;  %v3126_v55 = vor.u32 %v3470_v58, %v3125_v57  ;;  %v3466_v61 = vld [vmem:[#allocation10 + $0x128] sm:$0xf0]  ;;  %v3113_v2 = vld [vmem:[#allocation10 + $0x128] sm:$0xf] }
 0x738   :  { %v1218_v5 = vmul.f32 %v1214_v63, %v1186_v6  ;;  %v3106_v63 = vor.u32 %v3466_v61, %v3105_v60 }
 0x739   :  { %1624 = vmatpush.bf16.msra.mxu3 %v3122_v54  ;;  %1638 = vmatpush.bf16.msrb.mxu0 %v3126_v55 }
 0x73c   :  { %v3624_v62 = vpop.eup %3623 }
 0x73d   :  { %v3626_v0 = vpop.eup %3625  ;;  %v1215_v4 = vadd.f32 1.0, %v3624_v62  ;;  %v3465_v62 = vld [vmem:[#allocation10 + $0x124] sm:$0xf] }
 0x73e   :  { %v1216_v18 = vadd.f32 1.0, %v3626_v0  ;;  %v3107_v0 = vld [vmem:[#allocation10 + $0x12c] sm:$0xf0] }
 0x73f   :  { %v1219_v56 = vmul.f32 %v1215_v4, %v1187_v3  ;;  %v3467_v3 = vld [vmem:[#allocation10 + $0x130] sm:$0xf0]  ;;  %v3110_v4 = vor.u32 %v3465_v62, %v3107_v0 }
 0x740   :  { %v1220_v15 = vmul.f32 %v1216_v18, %v1188_v14  ;;  %v3114_v6 = vor.u32 %v3467_v3, %v3113_v2  ;;  %v3093_v14 = vld [vmem:[#allocation10 + $0x108] sm:$0xf]  ;;  %v3463_v18 = vld [vmem:[#allocation10 + $0x110] sm:$0xf0] }
 0x741   :  { %v1221_v59 = vpack.c.bf16 %v1219_v56, %v1217_v1  ;;  %1625 = vmatpush.bf16.msra.mxu3 %v3110_v4  ;;  %v3462_v1 = vld [vmem:[#allocation10 + $0x10c] sm:$0xf]  ;;  %v3094_v56 = vor.u32 %v3463_v18, %v3093_v14 }
 0x742   :  { %v1222_v7 = vpack.c.bf16 %v1220_v15, %v1218_v5  ;;  %1639 = vmatpush.bf16.msrb.mxu0 %v3114_v6  ;;  %v3095_v5 = vld [vmem:[#allocation10 + $0x114] sm:$0xf0]  ;;  %v3101_v15 = vld [vmem:[#allocation10 + $0x110] sm:$0xf]  ;;  %v3568_v6 = vld [vmem:[%s4593_s15] ss:$0 sm:$0xff] }
 0x743   :  { %1363 = vmatmul.bf16.vlgmr.msra.gmra.mxu0 %v1221_v59  ;;  %v3464_v59 = vld [vmem:[#allocation10 + $0x118] sm:$0xf0] }
 0x744   :  { %1377 = vmatmul.bf16.vlgmr.msrb.gmra.mxu1 %v1222_v7  ;;  %v3098_v7 = vor.u32 %v3462_v1, %v3095_v5  ;;  %v1472_v5 = vld [vmem:[#allocation11 + $0x3] sm:$0x7] }
 0x746   :  { %1626 = vmatpush.bf16.msra.mxu3 %v3098_v7 }
 0x7c0   :  { %v1364_v13 = vpop.f32.mrf.mxu0 }
 0x7c1   :  { %v1365_v16 = vadd.f32 %v3566_v12, %v1364_v13  ;;  %v1378_v17 = vpop.f32.mrf.mxu1  ;;  %v3081_v13 = vld [vmem:[#allocation10 + $0xf0] sm:$0xf] }
 0x7c3   :  { %v1379_v19 = vadd.f32 %v1378_v17, %v1365_v16  ;;  %v3460_v16 = vld [vmem:[#allocation10 + $0xf8] sm:$0xf0]  ;;  %v3459_v17 = vld [vmem:[#allocation10 + $0xf4] sm:$0xf] }
 0x7c5   :  { %v1383_v20 = vadd.f32 %v1379_v19, %v4391_v9  ;;  %v3082_v19 = vor.u32 %v3460_v16, %v3081_v13 }
 0x7c7   :  { %1387 = vadd.xlane.f32.xlu0 %v1383_v20 }
 0x7c8   :  { %v1366_v21 = vpop.f32.mrf.mxu0 }
 0x7c9   :  { %v1367_v22 = vadd.f32 %v3566_v12, %v1366_v21  ;;  %v1380_v23 = vpop.f32.mrf.mxu1  ;;  %v3102_v12 = vor.u32 %v3464_v59, %v3101_v15  ;;  %v3089_v21 = vld [vmem:[#allocation10 + $0xf8] sm:$0xf]  ;;  %v1474_v15 = vperm.slane %v1472_v5, 0 }
 0x7cb   :  { %v1381_v24 = vadd.f32 %v1380_v23, %v1367_v22  ;;  %1640 = vmatpush.bf16.msrb.mxu0 %v3102_v12  ;;  %v3461_v22 = vld [vmem:[#allocation10 + $0x100] sm:$0xf0] }
 0x7cd   :  { %v1384_v25 = vadd.f32 %v1381_v24, %v4393_v10  ;;  %v3141_v10 = vld [vmem:[#allocation10 + $0x168] sm:$0xf]  ;;  %v3090_v24 = vor.u32 %v3461_v22, %v3089_v21 }
 0x7ce   :  { %v3142_v35 = vor.u32 %v3475_v33, %v3141_v10 }
 0x7cf   :  { %1389 = vadd.xlane.f32.xlu2 %v1384_v25  ;;  %1641 = vmatpush.bf16.msrb.mxu0 %v3090_v24 }
 0x7d0   :  { %1608 = vmatpush.bf16.msrb.mxu2 %v3142_v35  ;;  %v3057_v35 = vld [vmem:[#allocation10 + $0xc0] sm:$0xf] }
 0x7d1   :  { %v3058_v39 = vor.u32 %v3454_v36, %v3057_v35 }
 0x7d4   :  { %1609 = vmatpush.bf16.msrb.mxu2 %v3130_v45  ;;  %v3066_v45 = vor.u32 %v3455_v43, %v3065_v42 }
 0x7d8   :  { %1610 = vmatpush.bf16.msrb.mxu2 %v3118_v53 }
 0x7dc   :  { %1611 = vmatpush.bf16.msrb.mxu2 %v3106_v63  ;;  %v3567_v63 = vld [vmem:[%s4592_s14] ss:$0 sm:$0xff] }
 0x7e0   :  { %1612 = vmatpush.bf16.msrb.mxu2 %v3094_v56 }
 0x7e4   :  { %1613 = vmatpush.bf16.msrb.mxu2 %v3082_v19  ;;  %v1476_v19 = vperm.slane %v1472_v5, 2 }
 0x83a   :  { %v1388_v26 = vpop.xlane.xlu0 %1387 }
 0x83b   :  { %v1391_v27 = vmul.f32 %v1388_v26, %v4261_v8  ;;  %v3457_v26 = vld [vmem:[#allocation10 + $0xe0] sm:$0xf0] }
 0x83d   :  { %v4406_v28 = vsub.f32 %v1383_v20, %v1391_v27  ;;  %v3083_v20 = vld [vmem:[#allocation10 + $0xfc] sm:$0xf0]  ;;  %v3456_v27 = vld [vmem:[#allocation10 + $0xdc] sm:$0xf] }
 0x83e   :  { %v3086_v23 = vor.u32 %v3459_v17, %v3083_v20 }
 0x83f   :  { %v1395_v29 = vmul.f32 %v4406_v28, %v4406_v28 }
 0x840   :  { %1627 = vmatpush.bf16.msra.mxu3 %v3086_v23 }
 0x841   :  { %1397 = vadd.xlane.f32.xlu0 %v1395_v29 }
 0x842   :  { %v1390_v30 = vpop.xlane.xlu2 %1389 }
 0x843   :  { %v1392_v9 = vmul.f32 %v1390_v30, %v4261_v8  ;;  %v3071_v30 = vld [vmem:[#allocation10 + $0xe4] sm:$0xf0] }
 0x844   :  { %v3074_v33 = vor.u32 %v3456_v27, %v3071_v30 }
 0x845   :  { %v4411_v31 = vsub.f32 %v1384_v25, %v1392_v9  ;;  %v3069_v25 = vld [vmem:[#allocation10 + $0xd8] sm:$0xf]  ;;  %v3077_v9 = vld [vmem:[#allocation10 + $0xe0] sm:$0xf] }
 0x846   :  { %v3070_v29 = vor.u32 %v3457_v26, %v3069_v25  ;;  %1628 = vmatpush.bf16.msra.mxu3 %v3074_v33 }
 0x847   :  { %v1396_v32 = vmul.f32 %v4411_v31, %v4411_v31 }
 0x848   :  { %1614 = vmatpush.bf16.msrb.mxu2 %v3070_v29 }
 0x849   :  { %1399 = vadd.xlane.f32.xlu2 %v1396_v32  ;;  %v3458_v32 = vld [vmem:[#allocation10 + $0xe8] sm:$0xf0] }
 0x84a   :  { %v3078_v34 = vor.u32 %v3458_v32, %v3077_v9  ;;  %1629 = vmatpush.bf16.msra.mxu3 %v3062_v44 }
 0x84c   :  { %1642 = vmatpush.bf16.msrb.mxu0 %v3078_v34  ;;  %1615 = vmatpush.bf16.msrb.mxu2 %v3058_v39 }
 0x850   :  { %1643 = vmatpush.bf16.msrb.mxu0 %v3066_v45 }
 0x8b4   :  { %v1398_v10 = vpop.xlane.xlu0 %1397 }
 0x8b5   :  { %v1401_v38 = vmul.f32 %v1398_v10, %v4261_v8 }
 0x8b7   :  { %v1403_v46 = vadd.f32 1e-12, %v1401_v38 }
 0x8b9   :  { %3627 = vrsqrt.f32 %v1403_v46  ;;  %vm1411_vm2 = vweird.f32 %v1403_v46 }
 0x8bc   :  { %v1400_v48 = vpop.xlane.xlu2 %1399 }
 0x8bd   :  { %v1402_v49 = vmul.f32 %v1400_v48, %v4261_v8 }
 0x8bf   :  { %v3628_v50 = vpop.eup %3627  ;;  %v1404_v47 = vadd.f32 1e-12, %v1402_v49 }
 0x8c0   :  { %v1406_v51 = vmul.f32 %v3628_v50, %v1403_v46  ;;  %vm1412_vm1 = vweird.f32 %v3628_v50 }
 0x8c1   :  { %3629 = vrsqrt.f32 %v1404_v47  ;;  %vm1413_vm3 = vmor %vm1411_vm2, %vm1412_vm1  ;;  %vm1421_vm5 = vweird.f32 %v1404_v47 }
 0x8c2   :  { %v1407_v52 = vmul.f32 %v3628_v50, %v1406_v51 }
 0x8c4   :  { %v1408_v40 = vmul.f32 0.5, %v1407_v52 }
 0x8c6   :  { %v1409_v53 = vsub.f32 1.5, %v1408_v40 }
 0x8c7   :  { %v3630_v11 = vpop.eup %3629 }
 0x8c8   :  { %v1410_v57 = vmul.f32 %v3628_v50, %v1409_v53  ;;  %v1416_v58 = vmul.f32 %v3630_v11, %v1404_v47  ;;  %vm1422_vm4 = vweird.f32 %v3630_v11 }
 0x8c9   :  { %vm1423_vm6 = vmor %vm1421_vm5, %vm1422_vm4 }
 0x8ca   :  { %v1417_v54 = vmul.f32 %v3630_v11, %v1416_v58  ;;  %v1414_v55 = vsel %vm1413_vm3, %v3628_v50, %v1410_v57 }
 0x8cb   :  { %v1425_v62 = vmul.f32 %v1414_v55, %v4406_v28 }
 0x8cc   :  { %v1418_v60 = vmul.f32 0.5, %v1417_v54 }
 0x8cd   :  { %v1430_v4 = vmul.f32 %v3567_v63, %v1425_v62 }
 0x8ce   :  { %v1419_v61 = vsub.f32 1.5, %v1418_v60 }
 0x8cf   :  { %v4425_v18 = vadd.f32 %v3568_v6, %v1430_v4 }
 0x8d0   :  { %v1420_v0 = vmul.f32 %v3630_v11, %v1419_v61 }
 0x8d2   :  { %v1424_v2 = vsel %vm1423_vm6, %v3630_v11, %v1420_v0 }
 0x8d3   :  { %v1426_v3 = vmul.f32 %v1424_v2, %v4411_v31  ;;  %v1475_v31 = vperm.slane %v1472_v5, 1 }
 0x8d5   :  { %v1431_v14 = vmul.f32 %v3567_v63, %v1426_v3 }
 0x8d7   :  { %v4427_v1 = vadd.f32 %v3568_v6, %v1431_v14 }
 0x8d9   :  { %v1437_v28 = vpack.c.bf16 %v4427_v1, %v4425_v18 }
 0x8db   :  { %1616 = vmatmul.bf16.vlgmr.msrb.gmra.mxu2 %v1437_v28  ;;  %1630 = vmatmul.bf16.vlgmr.msra.gmra.mxu3 %v1437_v28 }
 0x8dc   :  { %1644 = vmatmul.bf16.vlgmr.msrb.gmra.mxu0 %v1437_v28 }
 0x959   :  { %v1645_v56 = vpop.f32.mrf.mxu0 }
 0x95a   :  { %v1646_v25 = vadd.f32 %v1645_v56, %v1476_v19 }
 0x95c   :  { %v4437_v9 = vpack.c.bf16 %v1646_v25, %v1646_v25 }
 0x95e   :  { %v1617_v59 = vpop.f32.mrf.mxu2  ;;  %v1631_v7 = vpop.f32.mrf.mxu3  ;;  %v1895_v35 = vunpack.c.l.b16 %v4437_v9 }
 0x95f   :  { %v1618_v12 = vadd.f32 %v1617_v59, %v1474_v15  ;;  %v1632_v13 = vadd.f32 %v1631_v7, %v1475_v31  ;;  %v3681_v7 = vld [vmem:[#allocation5] sm:$0xff] }
 0x961   :  { %v1650_v16 = vpack.c.bf16 %v1632_v13, %v1618_v12  ;;  %v1647_v17 = vpop.f32.mrf.mxu0 }
 0x962   :  { %v1648_v20 = vadd.f32 %v1647_v17, %v1476_v19 }
 0x963   :  { %1660 = vrot.lane.b32.xlu2 %v1650_v16, %s4623_s0  ;;  %1656 = vrot.lane.b32.xlu0 %v1650_v16, %s4084_s18  ;;  %v1668_v27 = vrot.slane %v1650_v16, 4  ;;  %v1690_v39 = vunpack.c.l.b16 %v1650_v16 }
 0x964   :  { %v4433_v29 = vpack.c.bf16 %v1648_v20, %v1648_v20 }
 0x965   :  { %v1693_v32 = vunpack.c.l.b16 %v1668_v27 }
 0x966   :  { %v1619_v21 = vpop.f32.mrf.mxu2  ;;  %v1633_v22 = vpop.f32.mrf.mxu3  ;;  %v1896_v33 = vunpack.c.l.b16 %v4433_v29 }
 0x967   :  { %v1620_v23 = vadd.f32 %v1619_v21, %v1474_v15  ;;  %v1634_v24 = vadd.f32 %v1633_v22, %v1475_v31 }
 0x968   :  { %v1897_v37 = vpack.c.b16 %v1896_v33, %v1895_v35 }
 0x969   :  { %v1652_v26 = vpack.c.bf16 %v1634_v24, %v1620_v23 }
 0x96b   :  { %1658 = vrot.lane.b32.xlu1 %v1652_v26, %s4084_s18  ;;  %1662 = vrot.lane.b32.xlu0 %v1652_v26, %s4623_s0  ;;  %v1669_v30 = vrot.slane %v1652_v26, 4  ;;  %v1691_v38 = vunpack.c.l.b16 %v1652_v26 }
 0x96d   :  { %v1694_v10 = vunpack.c.l.b16 %v1669_v30  ;;  %v1692_v41 = vpack.c.b16 %v1691_v38, %v1690_v39  ;;  %v3682_v30 = vld [vmem:[#allocation5 + $0x8] sm:$0xff] }
 0x96f   :  { %v1695_v34 = vpack.c.b16 %v1694_v10, %v1693_v32 }
 0x971   :  { %v1700_v36 = vsel %vm574_vm7, %v1695_v34, 0 }
 0x972   :  { %1709 = vmatpush.bf16.xpose.msra.mxu1 %v1700_v36 }
 0x973   :  { %1664 = vrot.lane.b32.xlu1 %v1650_v16, %s4085_s20  ;;  %1666 = vrot.lane.b32.xlu0 %v1652_v26, %s4085_s20 }
 0x979   :  { %3151 = vmatmul.msk.bf16.vlgmr.msra.gmra.mxu1 %vm574_vm7, %v1692_v41 }
 0x97a   :  { %1909 = vmatpush.bf16.msrb.mxu1 %v1897_v37 }
 0x9bd   :  { %v1661_v43 = vpop.permute.xlu2 %1660 }
 0x9be   :  { %v1672_v44 = vrot.slane %v1661_v43, 4  ;;  %v1742_v0 = vunpack.c.l.b16 %v1661_v43 }
 0x9c0   :  { %v1745_v47 = vunpack.c.l.b16 %v1672_v44 }
 0x9d5   :  { %v1657_v42 = vpop.permute.xlu0 %1656 }
 0x9d6   :  { %v1670_v45 = vrot.slane %v1657_v42, 4  ;;  %v1716_v2 = vunpack.c.l.b16 %v1657_v42 }
 0x9d8   :  { %v1719_v51 = vunpack.c.l.b16 %v1670_v45 }
 0x9dd   :  { %v1659_v46 = vpop.permute.xlu1 %1658  ;;  %v1663_v48 = vpop.permute.xlu0 %1662 }
 0x9de   :  { %v1671_v49 = vrot.slane %v1659_v46, 4  ;;  %v1673_v50 = vrot.slane %v1663_v48, 4  ;;  %v1717_v60 = vunpack.c.l.b16 %v1659_v46  ;;  %v1743_v61 = vunpack.c.l.b16 %v1663_v48 }
 0x9e0   :  { %v1720_v52 = vunpack.c.l.b16 %v1671_v49  ;;  %v1746_v40 = vunpack.c.l.b16 %v1673_v50  ;;  %v1718_v6 = vpack.c.b16 %v1717_v60, %v1716_v2  ;;  %v1744_v14 = vpack.c.b16 %v1743_v61, %v1742_v0 }
 0x9e2   :  { %v1721_v53 = vpack.c.b16 %v1720_v52, %v1719_v51  ;;  %v1747_v11 = vpack.c.b16 %v1746_v40, %v1745_v47 }
 0x9e4   :  { %v1726_v57 = vsel %vm574_vm7, %v1721_v53, 0  ;;  %v1752_v58 = vsel %vm574_vm7, %v1747_v11, 0 }
 0x9e5   :  { %v1665_v54 = vpop.permute.xlu1 %1664  ;;  %1735 = vmatpush.bf16.xpose.msra.mxu2 %v1726_v57  ;;  %1761 = vmatpush.bf16.xpose.msrb.mxu3 %v1752_v58  ;;  %v1667_v55 = vpop.permute.xlu0 %1666 }
 0x9e6   :  { %v1674_v62 = vrot.slane %v1665_v54, 4  ;;  %v1675_v63 = vrot.slane %v1667_v55, 4  ;;  %v1768_v5 = vunpack.c.l.b16 %v1665_v54  ;;  %v1769_v15 = vunpack.c.l.b16 %v1667_v55 }
 0x9e8   :  { %v1771_v3 = vunpack.c.l.b16 %v1674_v62  ;;  %v1772_v4 = vunpack.c.l.b16 %v1675_v63  ;;  %v1770_v31 = vpack.c.b16 %v1769_v15, %v1768_v5 }
 0x9ea   :  { %v1773_v28 = vpack.c.b16 %v1772_v4, %v1771_v3 }
 0x9ec   :  { %3152 = vmatmul.msk.bf16.vlgmr.msra.gmra.mxu2 %vm574_vm7, %v1718_v6  ;;  %3153 = vmatmul.msk.bf16.vlgmr.msrb.gmra.mxu3 %vm574_vm7, %v1744_v14  ;;  %v1778_v56 = vsel %vm574_vm7, %v1773_v28, 0 }
 0x9ed   :  { %1787 = vmatpush.bf16.xpose.msra.mxu0 %v1778_v56 }
 0x9f4   :  { %3154 = vmatmul.msk.bf16.vlgmr.msra.gmra.mxu0 %vm574_vm7, %v1770_v31 }
 0x9f6   :  { %v1711_v59 = vpop.f32.mrf.mxu1 }
 0x9f7   :  { %v4451_v12 = vadd.f32 %v3681_v7, %v1711_v59 }
 0x9f9   :  { %v1794_v13 = vsel %vm673_vm8, %v4451_v12, -inf }
 0x9fa   :  { %1795 = vmax.xlane.f32.xlu2 %v1794_v13 }
 0x9fe   :  { %v1713_v38 = vpop.f32.mrf.mxu1 }
 0x9ff   :  { %v1714_v39 = vadd.f32 %v3682_v30, %v1713_v38 }
 0xa01   :  { %v1797_v41 = vsel %vm673_vm8, %v1714_v39, -inf }
 0xa6d   :  { %v1796_v42 = vpop.xlane.xlu2 %1795 }
 0xa6f   :  { %v1737_v16 = vpop.f32.mrf.mxu2  ;;  %v1763_v17 = vpop.f32.mrf.mxu3 }
 0xa70   :  { %v1738_v19 = vadd.f32 %v3681_v7, %v1737_v16  ;;  %v1764_v20 = vadd.f32 %v3681_v7, %v1763_v17  ;;  %v1818_v17 = vsub.f32 %v4451_v12, %v1796_v42 }
 0xa71   :  { %v1789_v21 = vpop.f32.mrf.mxu0 }
 0xa72   :  { %v1790_v22 = vadd.f32 %v3681_v7, %v1789_v21  ;;  %v1806_v23 = vsel %vm673_vm8, %v1764_v20, -inf  ;;  %v1800_v24 = vsel %vm673_vm8, %v1738_v19, -inf  ;;  %v1826_v21 = vmul.f32 1.442695, %v1818_v17 }
 0xa73   :  { %1807 = vmax.xlane.f32.xlu0 %v1806_v23  ;;  %1801 = vmax.xlane.f32.xlu2 %v1800_v24 }
 0xa74   :  { %v1812_v25 = vsel %vm673_vm8, %v1790_v22, -inf }
 0xa75   :  { %1813 = vmax.xlane.f32.xlu1 %v1812_v25 }
 0xa77   :  { %v1739_v26 = vpop.f32.mrf.mxu2  ;;  %v1765_v27 = vpop.f32.mrf.mxu3 }
 0xa78   :  { %v1740_v32 = vadd.f32 %v3682_v30, %v1739_v26  ;;  %v1766_v10 = vadd.f32 %v3682_v30, %v1765_v27 }
 0xa79   :  { %v1791_v33 = vpop.f32.mrf.mxu0 }
 0xa7a   :  { %v1792_v34 = vadd.f32 %v3682_v30, %v1791_v33  ;;  %v1809_v35 = vsel %vm673_vm8, %v1766_v10, -inf  ;;  %v1803_v37 = vsel %vm673_vm8, %v1740_v32, -inf }
 0xa7b   :  { %1810 = vmax.xlane.f32.xlu2 %v1809_v35 }
 0xa7c   :  { %v1815_v36 = vsel %vm673_vm8, %v1792_v34, -inf }
 0xa7d   :  { %1816 = vmax.xlane.f32.xlu0 %v1815_v36  ;;  %1804 = vmax.xlane.f32.xlu1 %v1803_v37 }
 0xa85   :  { %1798 = vmax.xlane.f32.xlu1 %v1797_v41 }
 0xa91   :  { %1678 = vrot.lane.b32.xlu0 %v4437_v9, %s4084_s18 }
 0xa93   :  { %1680 = vrot.lane.b32.xlu2 %v4433_v29, %s4084_s18 }
 0xae6   :  { %v1808_v43 = vpop.xlane.xlu0 %1807  ;;  %v1802_v44 = vpop.xlane.xlu2 %1801 }
 0xae7   :  { %v1822_v45 = vsub.f32 %v1764_v20, %v1808_v43  ;;  %v1820_v46 = vsub.f32 %v1738_v19, %v1802_v44 }
 0xae8   :  { %v1814_v48 = vpop.xlane.xlu1 %1813 }
 0xae9   :  { %v1834_v49 = vmul.f32 1.442695, %v1822_v45  ;;  %v1830_v50 = vmul.f32 1.442695, %v1820_v46  ;;  %v1824_v47 = vsub.f32 %v1790_v22, %v1814_v48 }
 0xaeb   :  { %3631 = vpow2.f32 %v1834_v49  ;;  %v1838_v51 = vmul.f32 1.442695, %v1824_v47 }
 0xaec   :  { %3633 = vpow2.f32 %v1830_v50 }
 0xaed   :  { %3635 = vpow2.f32 %v1838_v51 }
 0xaee   :  { %v1811_v0 = vpop.xlane.xlu2 %1810 }
 0xaef   :  { %v1823_v31 = vsub.f32 %v1766_v10, %v1811_v0 }
 0xaf0   :  { %v1805_v52 = vpop.xlane.xlu1 %1804  ;;  %v1817_v40 = vpop.xlane.xlu0 %1816 }
 0xaf1   :  { %v4466_v53 = vpop.eup %3631  ;;  %v1821_v11 = vsub.f32 %v1740_v32, %v1805_v52  ;;  %v1825_v57 = vsub.f32 %v1792_v34, %v1817_v40  ;;  %v1836_v59 = vmul.f32 1.442695, %v1823_v31 }
 0xaf2   :  { %v3634_v58 = vpop.eup %3633  ;;  %v1854_v54 = vsel %vm673_vm8, %v4466_v53, 0.0 }
 0xaf3   :  { %v4470_v55 = vpop.eup %3635  ;;  %v1832_v60 = vmul.f32 1.442695, %v1821_v11  ;;  %v1840_v61 = vmul.f32 1.442695, %v1825_v57  ;;  %1855 = vadd.xlane.f32.xlu1 %v1854_v54  ;;  %v1848_v62 = vsel %vm673_vm8, %v3634_v58, 0.0 }
 0xaf4   :  { %1849 = vadd.xlane.f32.xlu0 %v1848_v62  ;;  %v1860_v63 = vsel %vm673_vm8, %v4470_v55, 0.0 }
 0xaf5   :  { %3637 = vpow2.f32 %v1832_v60  ;;  %1861 = vadd.xlane.f32.xlu2 %v1860_v63 }
 0xaf6   :  { %3639 = vpow2.f32 %v1840_v61  ;;  %v1681_v14 = vpop.permute.xlu2 %1680 }
 0xaf7   :  { %v1922_v56 = vunpack.c.l.b16 %v1681_v14  ;;  %3641 = vpow2.f32 %v1836_v59 }
 0xaf8   :  { %v1799_v7 = vpop.xlane.xlu1 %1798 }
 0xaf9   :  { %v1819_v13 = vsub.f32 %v1714_v39, %v1799_v7 }
 0xafb   :  { %v3638_v2 = vpop.eup %3637  ;;  %v1828_v19 = vmul.f32 1.442695, %v1819_v13 }
 0xafc   :  { %v4475_v3 = vpop.eup %3639  ;;  %v1851_v4 = vsel %vm673_vm8, %v3638_v2, 0.0 }
 0xafd   :  { %v1863_v6 = vsel %vm673_vm8, %v4475_v3, 0.0  ;;  %1852 = vadd.xlane.f32.xlu2 %v1851_v4  ;;  %v3642_v16 = vpop.eup %3641  ;;  %3643 = vpow2.f32 %v1828_v19 }
 0xafe   :  { %1864 = vadd.xlane.f32.xlu1 %v1863_v6  ;;  %v1857_v20 = vsel %vm673_vm8, %v3642_v16, 0.0  ;;  %3645 = vpow2.f32 %v1826_v21 }
 0xb03   :  { %v1679_v28 = vpop.permute.xlu0 %1678  ;;  %v3644_v22 = vpop.eup %3643 }
 0xb04   :  { %v1921_v5 = vunpack.c.l.b16 %v1679_v28  ;;  %v4488_v23 = vpop.eup %3645 }
 0xb05   :  { %v1842_v24 = vsel %vm673_vm8, %v4488_v23, 0.0 }
 0xb06   :  { %v1923_v15 = vpack.c.b16 %v1922_v56, %v1921_v5 }
 0xb08   :  { %1684 = vrot.lane.b32.xlu0 %v4433_v29, %s4623_s0  ;;  %1935 = vmatpush.bf16.msrb.mxu2 %v1923_v15 }
 0xb15   :  { %1686 = vrot.lane.b32.xlu2 %v4437_v9, %s4085_s20 }
 0xb17   :  { %1682 = vrot.lane.b32.xlu1 %v4437_v9, %s4623_s0  ;;  %v1845_v9 = vsel %vm673_vm8, %v3644_v22, 0.0 }
 0xb32   :  { %1858 = vadd.xlane.f32.xlu0 %v1857_v20 }
 0xb3e   :  { %1846 = vadd.xlane.f32.xlu2 %v1845_v9 }
 0xb41   :  { %1843 = vadd.xlane.f32.xlu1 %v1842_v24 }
 0xb46   :  { %1688 = vrot.lane.b32.xlu0 %v4433_v29, %s4085_s20 }
 0xb66   :  { %v1856_v34 = vpop.xlane.xlu1 %1855 }
 0xb67   :  { %v1850_v12 = vpop.xlane.xlu0 %1849 }
 0xb68   :  { %v1862_v25 = vpop.xlane.xlu2 %1861  ;;  %3647 = vrcp.f32 %v1850_v12 }
 0xb6e   :  { %v3648_v27 = vpop.eup %3647 }
 0xb6f   :  { %v1876_v30 = vmul.f32 %v3648_v27, %v3634_v58 }
 0xb70   :  { %v1853_v26 = vpop.xlane.xlu2 %1852 }
 0xb71   :  { %3649 = vrcp.f32 %v1853_v26  ;;  %v1884_v10 = vpack.c.bf16 %v1876_v30, %v1876_v30  ;;  %v1865_v39 = vpop.xlane.xlu1 %1864 }
 0xb72   :  { %3651 = vrcp.f32 %v1856_v34 }
 0xb73   :  { %v1918_v36 = vunpack.c.l.b16 %v1884_v10 }
 0xb77   :  { %v3650_v32 = vpop.eup %3649 }
 0xb78   :  { %v1877_v33 = vmul.f32 %v3650_v32, %v3638_v2  ;;  %v3652_v46 = vpop.eup %3651  ;;  %v1687_v49 = vpop.permute.xlu2 %1686 }
 0xb79   :  { %v1878_v48 = vmul.f32 %v3652_v46, %v4466_v53  ;;  %v1973_v6 = vunpack.c.l.b16 %v1687_v49  ;;  %v3478_v46 = vld [vmem:[#allocation13 + $0x48] sm:$0xff] }
 0xb7a   :  { %v1885_v35 = vpack.c.bf16 %v1877_v33, %v1877_v33  ;;  %v1685_v41 = vpop.permute.xlu0 %1684 }
 0xb7b   :  { %v1948_v42 = vunpack.c.l.b16 %v1685_v41  ;;  %v1886_v47 = vpack.c.bf16 %v1878_v48, %v1878_v48  ;;  %v3484_v41 = vld [vmem:[#allocation13 + $0x78] sm:$0xff]  ;;  %v3477_v48 = vld [vmem:[#allocation13 + $0x40] sm:$0xff] }
 0xb7c   :  { %v1919_v37 = vunpack.c.l.b16 %v1885_v35  ;;  %2106 = vmatpush.bf16.msra.mxu1 %v3484_v41 }
 0xb7d   :  { %v1944_v57 = vunpack.c.l.b16 %v1886_v47 }
 0xb7e   :  { %v1920_v38 = vpack.c.b16 %v1919_v37, %v1918_v36 }
 0xb80   :  { %3156 = vmatmul.msk.bf16.vlgmr.msrb.gmra.mxu2 %vm673_vm8, %v1920_v38 }
 0xb89   :  { %v1683_v29 = vpop.permute.xlu1 %1682 }
 0xb8a   :  { %v1947_v43 = vunpack.c.l.b16 %v1683_v29  ;;  %v3483_v29 = vld [vmem:[#allocation13 + $0x70] sm:$0xff] }
 0xb8b   :  { %2107 = vmatpush.bf16.msra.mxu1 %v3483_v29  ;;  %v3222_v29 = vld [vmem:[#allocation16 + $0xb8] sm:$0xf0] }
 0xb8c   :  { %v1949_v44 = vpack.c.b16 %v1948_v42, %v1947_v43  ;;  %v3482_v42 = vld [vmem:[#allocation13 + $0x68] sm:$0xff]  ;;  %v3481_v43 = vld [vmem:[#allocation13 + $0x60] sm:$0xff] }
 0xb8e   :  { %1961 = vmatpush.bf16.msra.mxu3 %v1949_v44  ;;  %v3480_v44 = vld [vmem:[#allocation13 + $0x58] sm:$0xff] }
 0xb8f   :  { %2108 = vmatpush.bf16.msra.mxu1 %v3482_v42 }
 0xb93   :  { %2109 = vmatpush.bf16.msra.mxu1 %v3481_v43  ;;  %v3212_v43 = vld [vmem:[#allocation16 + $0xa0] sm:$0xf] }
 0xb97   :  { %2110 = vmatpush.bf16.msra.mxu1 %v3480_v44  ;;  %v3490_v44 = vld [vmem:[#allocation16 + $0xa4] sm:$0xf0] }
 0xba5   :  { %v1859_v45 = vpop.xlane.xlu0 %1858 }
 0xba6   :  { %3653 = vrcp.f32 %v1859_v45  ;;  %v3479_v45 = vld [vmem:[#allocation13 + $0x50] sm:$0xff] }
 0xba7   :  { %3655 = vrcp.f32 %v1865_v39  ;;  %2111 = vmatpush.bf16.msra.mxu1 %v3479_v45  ;;  %v3489_v45 = vld [vmem:[#allocation16 + $0xa4] sm:$0xf] }
 0xba8   :  { %3657 = vrcp.f32 %v1862_v25 }
 0xbab   :  { %2112 = vmatpush.bf16.msra.mxu1 %v3478_v46  ;;  %v3213_v46 = vor.u32 %v3490_v44, %v3212_v43  ;;  %v3509_v43 = vld [vmem:[#allocation17 + $0xc0] sm:$0xff] }
 0xbac   :  { %v3654_v50 = vpop.eup %3653 }
 0xbad   :  { %v1879_v51 = vmul.f32 %v3654_v50, %v3642_v16  ;;  %v3656_v52 = vpop.eup %3655 }
 0xbae   :  { %v3658_v11 = vpop.eup %3657  ;;  %v1881_v60 = vmul.f32 %v3656_v52, %v4475_v3 }
 0xbaf   :  { %v1887_v40 = vpack.c.bf16 %v1879_v51, %v1879_v51  ;;  %v1880_v62 = vmul.f32 %v3658_v11, %v4470_v55  ;;  %2113 = vmatpush.bf16.msra.mxu1 %v3477_v48  ;;  %v3214_v48 = vld [vmem:[#allocation16 + $0xa8] sm:$0xf0] }
 0xbb0   :  { %v1889_v53 = vpack.c.bf16 %v1881_v60, %v1881_v60 }
 0xbb1   :  { %v1945_v58 = vunpack.c.l.b16 %v1887_v40  ;;  %v1847_v54 = vpop.xlane.xlu2 %1846  ;;  %v1888_v2 = vpack.c.bf16 %v1880_v62, %v1880_v62 }
 0xbb2   :  { %3659 = vrcp.f32 %v1847_v54  ;;  %v1971_v56 = vunpack.c.l.b16 %v1889_v53 }
 0xbb3   :  { %v1946_v61 = vpack.c.b16 %v1945_v58, %v1944_v57  ;;  %v1970_v31 = vunpack.c.l.b16 %v1888_v2 }
 0xbb4   :  { %v1844_v63 = vpop.xlane.xlu1 %1843 }
 0xbb5   :  { %3661 = vrcp.f32 %v1844_v63  ;;  %3157 = vmatmul.msk.bf16.vlgmr.msra.gmra.mxu3 %vm673_vm8, %v1946_v61  ;;  %v1972_v55 = vpack.c.b16 %v1971_v56, %v1970_v31  ;;  %v3569_v63 = vld [vmem:[%s4585_s7 + $0x1] ss:$0 sm:$0xff] }
 0xbb8   :  { %v3660_v0 = vpop.eup %3659  ;;  %v1689_v4 = vpop.permute.xlu0 %1688 }
 0xbb9   :  { %v1875_v14 = vmul.f32 %v3660_v0, %v3644_v22  ;;  %v1974_v28 = vunpack.c.l.b16 %v1689_v4 }
 0xbbb   :  { %v3662_v5 = vpop.eup %3661  ;;  %v1975_v15 = vpack.c.b16 %v1974_v28, %v1973_v6  ;;  %v1883_v3 = vpack.c.bf16 %v1875_v14, %v1875_v14 }
 0xbbc   :  { %v1874_v59 = vmul.f32 %v3662_v5, %v4488_v23 }
 0xbbd   :  { %1987 = vmatpush.bf16.msrb.mxu0 %v1975_v15  ;;  %v1893_v13 = vunpack.c.l.b16 %v1883_v3 }
 0xbbe   :  { %v1882_v7 = vpack.c.bf16 %v1874_v59, %v1874_v59 }
 0xbc0   :  { %v1892_v16 = vunpack.c.l.b16 %v1882_v7  ;;  %3158 = vmatmul.msk.bf16.vlgmr.msrb.gmra.mxu0 %vm673_vm8, %v1972_v55  ;;  %v3500_v55 = vld [vmem:[#allocation16 + $0xf4] sm:$0xf0]  ;;  %v3499_v7 = vld [vmem:[#allocation16 + $0xf4] sm:$0xf] }
 0xbc2   :  { %v1894_v17 = vpack.c.b16 %v1893_v13, %v1892_v16  ;;  %v3254_v16 = vld [vmem:[#allocation16 + $0xf8] sm:$0xf0] }
 0xbc4   :  { %3155 = vmatmul.msk.bf16.vlgmr.msrb.gmra.mxu1 %vm673_vm8, %v1894_v17  ;;  %v3257_v17 = vor.u32 %v3499_v7, %v3254_v16 }
 0xbc6   :  { %2295 = vmatpush.bf16.msrb.mxu3 %v3257_v17 }
 0xc03   :  { %v1937_v19 = vpop.f32.mrf.mxu2 }
 0xc04   :  { %v1996_v20 = vpack.c.bf16 %v1937_v19, %v1937_v19  ;;  %v3244_v19 = vld [vmem:[#allocation16 + $0xe0] sm:$0xf] }
 0xc06   :  { %v2009_v9 = vunpack.c.l.b16 %v1996_v20  ;;  %v3498_v20 = vld [vmem:[#allocation16 + $0xe4] sm:$0xf0] }
 0xc0b   :  { %v1939_v21 = vpop.f32.mrf.mxu2 }
 0xc0c   :  { %v1997_v22 = vpack.c.bf16 %v1939_v21, %v1939_v21  ;;  %v3497_v21 = vld [vmem:[#allocation16 + $0xe4] sm:$0xf] }
 0xc0e   :  { %v2010_v24 = vunpack.c.l.b16 %v1997_v22  ;;  %v3245_v22 = vor.u32 %v3498_v20, %v3244_v19  ;;  %v3570_v19 = vld [vmem:[#allocation14 + $0x1] ss:$0 sm:$0xff] }
 0xc10   :  { %v2011_v12 = vpack.c.b16 %v2010_v24, %v2009_v9  ;;  %v3246_v9 = vld [vmem:[#allocation16 + $0xe8] sm:$0xf0] }
 0xc11   :  { %v3249_v24 = vor.u32 %v3497_v21, %v3246_v9 }
 0xc12   :  { %2012 = vrot.lane.b32.xlu0 %v2011_v12, %s4085_s20  ;;  %v3236_v12 = vld [vmem:[#allocation16 + $0xd0] sm:$0xf]  ;;  %s4086_s20 = smov [#allocation23]  }
 0xc13   :  { %2296 = vmatpush.bf16.msrb.mxu3 %v3249_v24  ;;  %v3571_v24 = vld [vmem:[%s4587_s9 + $0x1] ss:$0 sm:$0xff]  ;;  %s2753_s12 = sshll.u32 %s4086_s20, 4  ;;  %s2766_s9 = sshll.u32 %s4626_s10, 4  ;;  %s2754_s12 = int_to_ptr.vmem [resolvable:$true] %s2753_s12  ;;  %s2767_s9 = int_to_ptr.hbm [resolvable:$true] %s2766_s9 }
 0xc38   :  { %v1963_v23 = vpop.f32.mrf.mxu3 }
 0xc39   :  { %v1998_v26 = vpack.c.bf16 %v1963_v23, %v1963_v23  ;;  %v3496_v23 = vld [vmem:[#allocation16 + $0xd4] sm:$0xf0] }
 0xc3b   :  { %v2016_v32 = vunpack.c.l.b16 %v1998_v26  ;;  %v3237_v26 = vor.u32 %v3496_v23, %v3236_v12 }
 0xc3d   :  { %v1989_v25 = vpop.f32.mrf.mxu0 }
 0xc3e   :  { %v2000_v36 = vpack.c.bf16 %v1989_v25, %v1989_v25  ;;  %v3495_v25 = vld [vmem:[#allocation16 + $0xd4] sm:$0xf] }
 0xc40   :  { %v1965_v27 = vpop.f32.mrf.mxu3  ;;  %v2023_v38 = vunpack.c.l.b16 %v2000_v36 }
 0xc41   :  { %v1999_v30 = vpack.c.bf16 %v1965_v27, %v1965_v27  ;;  %v1911_v49 = vpop.f32.mrf.mxu1  ;;  %v3238_v27 = vld [vmem:[#allocation16 + $0xd8] sm:$0xf0] }
 0xc42   :  { %v1994_v52 = vpack.c.bf16 %v1911_v49, %v1911_v49  ;;  %v3217_v49 = vor.u32 %v3489_v45, %v3214_v48 }
 0xc43   :  { %v2017_v10 = vunpack.c.l.b16 %v1999_v30  ;;  %v3241_v30 = vor.u32 %v3495_v25, %v3238_v27  ;;  %v3516_v27 = vld [vmem:[#allocation17 + $0xf8] sm:$0xff] }
 0xc44   :  { %v2004_v57 = vunpack.c.l.b16 %v1994_v52  ;;  %2495 = vmatpush.bf16.msrb.mxu1 %v3516_v27 }
 0xc45   :  { %v1991_v33 = vpop.f32.mrf.mxu0  ;;  %v2018_v34 = vpack.c.b16 %v2017_v10, %v2016_v32  ;;  %2297 = vmatpush.bf16.msrb.mxu3 %v3241_v30  ;;  %v3228_v32 = vld [vmem:[#allocation16 + $0xc0] sm:$0xf]  ;;  %v3494_v10 = vld [vmem:[#allocation16 + $0xc4] sm:$0xf0]  ;;  %v3515_v30 = vld [vmem:[#allocation17 + $0xf0] sm:$0xff] }
 0xc46   :  { %v2001_v35 = vpack.c.bf16 %v1991_v33, %v1991_v33  ;;  %v3493_v33 = vld [vmem:[#allocation16 + $0xc4] sm:$0xf] }
 0xc47   :  { %2019 = vrot.lane.b32.xlu0 %v2018_v34, %s4623_s0  ;;  %v3229_v34 = vor.u32 %v3494_v10, %v3228_v32  ;;  %v3506_v32 = vld [vmem:[#allocation17 + $0xa8] sm:$0xff]  ;;  %s2764_s0 = sshll.u32 %s4088_s21, 4  ;;  %s2765_s0 = int_to_ptr.vmem [resolvable:$true] %s2764_s0 }
 0xc48   :  { %v2024_v37 = vunpack.c.l.b16 %v2001_v35  ;;  %v3230_v35 = vld [vmem:[#allocation16 + $0xc8] sm:$0xf0]  ;;  %2496 = vmatpush.bf16.msrb.mxu1 %v3515_v30 }
 0xc49   :  { %v1913_v47 = vpop.f32.mrf.mxu1  ;;  %v3233_v36 = vor.u32 %v3493_v33, %v3230_v35  ;;  %v3514_v10 = vld [vmem:[#allocation17 + $0xe8] sm:$0xff]  ;;  %v3505_v33 = vld [vmem:[#allocation17 + $0xa0] sm:$0xff]  ;;  %v3504_v35 = vld [vmem:[#allocation17 + $0x98] sm:$0xff] }
 0xc4a   :  { %v2025_v39 = vpack.c.b16 %v2024_v37, %v2023_v38  ;;  %v1995_v51 = vpack.c.bf16 %v1913_v47, %v1913_v47  ;;  %v3220_v37 = vld [vmem:[#allocation16 + $0xb0] sm:$0xf]  ;;  %v3492_v38 = vld [vmem:[#allocation16 + $0xb4] sm:$0xf0] }
 0xc4b   :  { %2298 = vmatpush.bf16.msrb.mxu3 %v3233_v36  ;;  %v3221_v41 = vor.u32 %v3492_v38, %v3220_v37  ;;  %v3488_v47 = vld [vmem:[#allocation16 + $0x94] sm:$0xf0]  ;;  %v3503_v37 = vld [vmem:[#allocation17 + $0x90] sm:$0xff] }
 0xc4c   :  { %v2005_v11 = vunpack.c.l.b16 %v1995_v51  ;;  %v3487_v51 = vld [vmem:[#allocation16 + $0x94] sm:$0xf]  ;;  %2497 = vmatpush.bf16.msrb.mxu1 %v3514_v10  ;;  %v3512_v36 = vld [vmem:[#allocation17 + $0xd8] sm:$0xff] }
 0xc4d   :  { %v3511_v38 = vld [vmem:[#allocation17 + $0xd0] sm:$0xff] }
 0xc4e   :  { %v2006_v58 = vpack.c.b16 %v2005_v11, %v2004_v57  ;;  %v3196_v57 = vld [vmem:[#allocation16 + $0x80] sm:$0xf] }
 0xc4f   :  { %2026 = vrot.lane.b32.xlu0 %v2025_v39, %s4084_s18  ;;  %v3491_v39 = vld [vmem:[#allocation16 + $0xb4] sm:$0xf] }
 0xc50   :  { %v3225_v42 = vor.u32 %v3491_v39, %v3222_v29  ;;  %v3502_v39 = vld [vmem:[#allocation17 + $0x88] sm:$0xff]  ;;  %v3193_v29 = vld [vmem:[%s4589_s11 + $0x2] sm:$0x3] }
 0xc51   :  { %v2197_v44 = vperm.slane %v3193_v29, 0  ;;  %v2198_v45 = vperm.slane %v3193_v29, 1 }
 0xc52   :  { %2299 = vmatpush.bf16.msrb.mxu3 %v3225_v42  ;;  %v3501_v42 = vld [vmem:[#allocation17 + $0x80] sm:$0xff] }
 0xc56   :  { %2300 = vmatpush.bf16.msrb.mxu3 %v3217_v49 }
 0xc84   :  { %v2013_v50 = vpop.permute.xlu0 %2012 }
 0xc85   :  { %v2030_v54 = vsel %vm574_vm7, %v2006_v58, %v2013_v50  ;;  %v3204_v50 = vld [vmem:[#allocation16 + $0x90] sm:$0xf]  ;;  %v3486_v58 = vld [vmem:[#allocation16 + $0x84] sm:$0xf0] }
 0xc86   :  { %v3205_v52 = vor.u32 %v3488_v47, %v3204_v50 }
 0xcb9   :  { %v2020_v40 = vpop.permute.xlu0 %2019 }
 0xcba   :  { %v2032_v60 = vsel %vm911_vm9, %v2030_v54, %v2020_v40  ;;  %v3206_v40 = vld [vmem:[#allocation16 + $0x98] sm:$0xf0]  ;;  %v3485_v54 = vld [vmem:[#allocation16 + $0x84] sm:$0xf] }
 0xcbb   :  { %v3209_v11 = vor.u32 %v3487_v51, %v3206_v40 }
 0xcbd   :  { %2301 = vmatpush.bf16.msrb.mxu3 %v3209_v11 }
 0xcc1   :  { %v2027_v61 = vpop.permute.xlu0 %2026 }
 0xcc2   :  { %v2034_v62 = vsel %vm914_vm10, %v2032_v60, %v2027_v61  ;;  %v3197_v61 = vor.u32 %v3486_v58, %v3196_v57 }
 0xcc3   :  { %2114 = vmatmul.bf16.vlgmr.msra.gmra.mxu1 %v2034_v62  ;;  %v3198_v62 = vld [vmem:[#allocation16 + $0x88] sm:$0xf0] }
 0xd40   :  { %v2115_v53 = vpop.f32.mrf.mxu1 }
 0xd41   :  { %v2116_v0 = vadd.f32 %v3569_v63, %v2115_v53  ;;  %v3201_v53 = vor.u32 %v3485_v54, %v3198_v62 }
 0xd43   :  { %v2120_v2 = vadd.f32 %v2116_v0, %v4425_v18  ;;  %2302 = vmatpush.bf16.msrb.mxu3 %v3201_v53 }
 0xd45   :  { %2126 = vadd.xlane.f32.xlu0 %v2120_v2 }
 0xd48   :  { %v2117_v4 = vpop.f32.mrf.mxu1 }
 0xd49   :  { %v2118_v6 = vadd.f32 %v3569_v63, %v2117_v4 }
 0xd4b   :  { %v2121_v14 = vadd.f32 %v2118_v6, %v4427_v1  ;;  %v3252_v1 = vld [vmem:[#allocation16 + $0xf0] sm:$0xf] }
 0xd4c   :  { %v3253_v13 = vor.u32 %v3500_v55, %v3252_v1 }
 0xd4d   :  { %2128 = vadd.xlane.f32.xlu1 %v2121_v14 }
 0xd4e   :  { %2281 = vmatpush.bf16.msra.mxu2 %v3253_v13 }
 0xd52   :  { %2282 = vmatpush.bf16.msra.mxu2 %v3245_v22 }
 0xd56   :  { %2283 = vmatpush.bf16.msra.mxu2 %v3237_v26  ;;  %v3508_v26 = vld [vmem:[#allocation17 + $0xb8] sm:$0xff] }
 0xd57   :  { %2481 = vmatpush.bf16.msra.mxu0 %v3508_v26 }
 0xd5a   :  { %2284 = vmatpush.bf16.msra.mxu2 %v3229_v34  ;;  %v3513_v34 = vld [vmem:[#allocation17 + $0xe0] sm:$0xff] }
 0xd5b   :  { %2498 = vmatpush.bf16.msrb.mxu1 %v3513_v34 }
 0xd5e   :  { %2285 = vmatpush.bf16.msra.mxu2 %v3221_v41  ;;  %v3510_v41 = vld [vmem:[#allocation17 + $0xc8] sm:$0xff] }
 0xd5f   :  { %2499 = vmatpush.bf16.msrb.mxu1 %v3512_v36 }
 0xd62   :  { %2286 = vmatpush.bf16.msra.mxu2 %v3213_v46 }
 0xd63   :  { %2500 = vmatpush.bf16.msrb.mxu1 %v3511_v38 }
 0xd66   :  { %2287 = vmatpush.bf16.msra.mxu2 %v3205_v52 }
 0xd67   :  { %2501 = vmatpush.bf16.msrb.mxu1 %v3510_v41 }
 0xd6a   :  { %2288 = vmatpush.bf16.msra.mxu2 %v3197_v61 }
 0xd6b   :  { %2502 = vmatpush.bf16.msrb.mxu1 %v3509_v43 }
 0xdb8   :  { %v2127_v28 = vpop.xlane.xlu0 %2126 }
 0xdb9   :  { %v2130_v56 = vmul.f32 %v2127_v28, %v4261_v8 }
 0xdbb   :  { %v4515_v5 = vsub.f32 %v2120_v2, %v2130_v56 }
 0xdbd   :  { %v2134_v15 = vmul.f32 %v4515_v5, %v4515_v5 }
 0xdbf   :  { %2136 = vadd.xlane.f32.xlu2 %v2134_v15 }
 0xdc0   :  { %v2129_v31 = vpop.xlane.xlu1 %2128 }
 0xdc1   :  { %v2131_v3 = vmul.f32 %v2129_v31, %v4261_v8 }
 0xdc3   :  { %v4520_v59 = vsub.f32 %v2121_v14, %v2131_v3 }
 0xdc5   :  { %v2135_v18 = vmul.f32 %v4520_v59, %v4520_v59 }
 0xdc7   :  { %2138 = vadd.xlane.f32.xlu1 %v2135_v18 }
 0xe32   :  { %v2137_v60 = vpop.xlane.xlu2 %2136 }
 0xe33   :  { %v2140_v63 = vmul.f32 %v2137_v60, %v4261_v8 }
 0xe35   :  { %v2142_v0 = vadd.f32 1e-12, %v2140_v63 }
 0xe37   :  { %3663 = vrsqrt.f32 %v2142_v0  ;;  %vm2150_vm8 = vweird.f32 %v2142_v0 }
 0xe3a   :  { %v2139_v2 = vpop.xlane.xlu1 %2138 }
 0xe3b   :  { %v2141_v4 = vmul.f32 %v2139_v2, %v4261_v8 }
 0xe3d   :  { %v3664_v6 = vpop.eup %3663  ;;  %v2143_v14 = vadd.f32 1e-12, %v2141_v4 }
 0xe3e   :  { %v2145_v28 = vmul.f32 %v3664_v6, %v2142_v0  ;;  %vm2151_vm7 = vweird.f32 %v3664_v6 }
 0xe3f   :  { %3665 = vrsqrt.f32 %v2143_v14  ;;  %vm2152_vm9 = vmor %vm2150_vm8, %vm2151_vm7  ;;  %vm2160_vm11 = vweird.f32 %v2143_v14 }
 0xe40   :  { %v2146_v56 = vmul.f32 %v3664_v6, %v2145_v28 }
 0xe42   :  { %v2147_v15 = vmul.f32 0.5, %v2146_v56 }
 0xe44   :  { %v2148_v31 = vsub.f32 1.5, %v2147_v15 }
 0xe45   :  { %v3666_v3 = vpop.eup %3665 }
 0xe46   :  { %v2149_v18 = vmul.f32 %v3664_v6, %v2148_v31  ;;  %v2155_v1 = vmul.f32 %v3666_v3, %v2143_v14  ;;  %vm2161_vm10 = vweird.f32 %v3666_v3 }
 0xe47   :  { %vm2162_vm12 = vmor %vm2160_vm11, %vm2161_vm10 }
 0xe48   :  { %v2156_v55 = vmul.f32 %v3666_v3, %v2155_v1  ;;  %v2153_v7 = vsel %vm2152_vm9, %v3664_v6, %v2149_v18 }
 0xe49   :  { %v2164_v17 = vmul.f32 %v2153_v7, %v4515_v5 }
 0xe4a   :  { %v2157_v13 = vmul.f32 0.5, %v2156_v55 }
 0xe4b   :  { %v2169_v9 = vmul.f32 %v3570_v19, %v2164_v17 }
 0xe4c   :  { %v2158_v16 = vsub.f32 1.5, %v2157_v13 }
 0xe4d   :  { %v4531_v23 = vadd.f32 %v3571_v24, %v2169_v9 }
 0xe4e   :  { %v2159_v20 = vmul.f32 %v3666_v3, %v2158_v16 }
 0xe50   :  { %v2163_v21 = vsel %vm2162_vm12, %v3666_v3, %v2159_v20 }
 0xe51   :  { %v2165_v22 = vmul.f32 %v2163_v21, %v4520_v59  ;;  %v3507_v59 = vld [vmem:[#allocation17 + $0xb0] sm:$0xff] }
 0xe52   :  { %2482 = vmatpush.bf16.msra.mxu0 %v3507_v59 }
 0xe53   :  { %v2170_v12 = vmul.f32 %v3570_v19, %v2165_v22 }
 0xe55   :  { %v4533_v25 = vadd.f32 %v3571_v24, %v2170_v12 }
 0xe56   :  { %2483 = vmatpush.bf16.msra.mxu0 %v3506_v32  ;;  %v3572_v32 = vld [vmem:[%s4591_s13 + $0x1] ss:$0 sm:$0xff] }
 0xe57   :  { %v2176_v5 = vpack.c.bf16 %v4533_v25, %v4531_v23 }
 0xe59   :  { %2289 = vmatmul.bf16.vlgmr.msra.gmra.mxu2 %v2176_v5  ;;  %2303 = vmatmul.bf16.vlgmr.msrb.gmra.mxu3 %v2176_v5 }
 0xe5a   :  { %2484 = vmatpush.bf16.msra.mxu0 %v3505_v33 }
 0xe5e   :  { %2485 = vmatpush.bf16.msra.mxu0 %v3504_v35 }
 0xe62   :  { %2486 = vmatpush.bf16.msra.mxu0 %v3503_v37 }
 0xe66   :  { %2487 = vmatpush.bf16.msra.mxu0 %v3502_v39 }
 0xe6a   :  { %2488 = vmatpush.bf16.msra.mxu0 %v3501_v42 }
 0xedc   :  { %v2290_v46 = vpop.f32.mrf.mxu2  ;;  %v2304_v48 = vpop.f32.mrf.mxu3 }
 0xedd   :  { %v2291_v49 = vadd.f32 %v2290_v46, %v2197_v44  ;;  %v2305_v50 = vadd.f32 %v2304_v48, %v2198_v45 }
 0xedf   :  { %v2313_v47 = vmul.f32 0.044715, %v2291_v49  ;;  %v2314_v51 = vmul.f32 0.044715, %v2305_v50  ;;  %v2309_v19 = vmul.f32 0.5, %v2291_v49  ;;  %v2310_v22 = vmul.f32 0.5, %v2305_v50 }
 0xee1   :  { %v2317_v52 = vmul.f32 %v2313_v47, %v2291_v49  ;;  %v2318_v40 = vmul.f32 %v2314_v51, %v2305_v50  ;;  %v3523_v47 = vld [vmem:[#allocation19 + $0x30] sm:$0xff]  ;;  %v3521_v51 = vld [vmem:[#allocation19 + $0x20] sm:$0xff] }
 0xee3   :  { %v2321_v11 = vmul.f32 %v2317_v52, %v2291_v49  ;;  %v2322_v57 = vmul.f32 %v2318_v40, %v2305_v50  ;;  %v3520_v52 = vld [vmem:[#allocation19 + $0x18] sm:$0xff] }
 0xee4   :  { %v2292_v58 = vpop.f32.mrf.mxu2  ;;  %v2306_v54 = vpop.f32.mrf.mxu3 }
 0xee5   :  { %v2325_v60 = vadd.f32 %v2321_v11, %v2291_v49  ;;  %v2293_v61 = vadd.f32 %v2292_v58, %v2197_v44  ;;  %v2307_v62 = vadd.f32 %v2306_v54, %v2198_v45  ;;  %v2326_v63 = vadd.f32 %v2322_v57, %v2305_v50  ;;  %v3524_v50 = vld [vmem:[#allocation19 + $0x38] sm:$0xff]  ;;  %v3519_v58 = vld [vmem:[#allocation19 + $0x10] sm:$0xff]  ;;  %v3518_v54 = vld [vmem:[#allocation19 + $0x8] sm:$0xff] }
 0xee6   :  { %2637 = vmatpush.bf16.msrb.mxu2 %v3524_v50 }
 0xee7   :  { %v2315_v53 = vmul.f32 0.044715, %v2293_v61  ;;  %v2316_v0 = vmul.f32 0.044715, %v2307_v62  ;;  %v2329_v2 = vmul.f32 0.7978846, %v2325_v60 }
 0xee8   :  { %v2330_v6 = vmul.f32 0.7978846, %v2326_v63  ;;  %v2311_v20 = vmul.f32 0.5, %v2293_v61  ;;  %v2312_v9 = vmul.f32 0.5, %v2307_v62 }
 0xee9   :  { %v2319_v4 = vmul.f32 %v2315_v53, %v2293_v61  ;;  %v2320_v14 = vmul.f32 %v2316_v0, %v2307_v62  ;;  %3667 = vtanh.f32 %v2329_v2 }
 0xeea   :  { %3669 = vtanh.f32 %v2330_v6  ;;  %2638 = vmatpush.bf16.msrb.mxu2 %v3523_v47 }
 0xeeb   :  { %v2323_v28 = vmul.f32 %v2319_v4, %v2293_v61  ;;  %v2324_v56 = vmul.f32 %v2320_v14, %v2307_v62  ;;  %v3532_v4 = vld [vmem:[#allocation20 + $0x38] sm:$0xff]  ;;  %v3531_v14 = vld [vmem:[#allocation20 + $0x30] sm:$0xff] }
 0xeec   :  { %2721 = vmatpush.bf16.msra.mxu3 %v3532_v4 }
 0xeed   :  { %v2327_v15 = vadd.f32 %v2323_v28, %v2293_v61  ;;  %v2328_v31 = vadd.f32 %v2324_v56, %v2307_v62  ;;  %v3517_v62 = vld [vmem:[#allocation19] sm:$0xff] }
 0xeef   :  { %v2331_v3 = vmul.f32 0.7978846, %v2327_v15  ;;  %v2332_v18 = vmul.f32 0.7978846, %v2328_v31  ;;  %v3668_v1 = vpop.eup %3667 }
 0xef0   :  { %v3670_v55 = vpop.eup %3669  ;;  %v2337_v7 = vadd.f32 1.0, %v3668_v1  ;;  %2722 = vmatpush.bf16.msra.mxu3 %v3531_v14 }
 0xef1   :  { %3671 = vtanh.f32 %v2331_v3  ;;  %v2338_v16 = vadd.f32 1.0, %v3670_v55  ;;  %v3530_v3 = vld [vmem:[#allocation20 + $0x28] sm:$0xff]  ;;  %v3574_v55 = vld [vmem:[%s4593_s15 + $0x1] ss:$0 sm:$0xff] }
 0xef2   :  { %3673 = vtanh.f32 %v2332_v18  ;;  %v2341_v12 = vmul.f32 %v2337_v7, %v2309_v19 }
 0xef3   :  { %v2342_v26 = vmul.f32 %v2338_v16, %v2310_v22  ;;  %v3528_v22 = vld [vmem:[#allocation20 + $0x18] sm:$0xff] }
 0xef4   :  { %2723 = vmatpush.bf16.msra.mxu3 %v3530_v3 }
 0xef7   :  { %v3672_v13 = vpop.eup %3671 }
 0xef8   :  { %v3674_v17 = vpop.eup %3673  ;;  %v2339_v21 = vadd.f32 1.0, %v3672_v13 }
 0xef9   :  { %v2340_v24 = vadd.f32 1.0, %v3674_v17  ;;  %v3529_v17 = vld [vmem:[#allocation20 + $0x20] sm:$0xff] }
 0xefa   :  { %v2343_v5 = vmul.f32 %v2339_v21, %v2311_v20  ;;  %2724 = vmatpush.bf16.msra.mxu3 %v3529_v17 }
 0xefb   :  { %v2344_v27 = vmul.f32 %v2340_v24, %v2312_v9 }
 0xefc   :  { %v2345_v59 = vpack.c.bf16 %v2343_v5, %v2341_v12 }
 0xefd   :  { %v2346_v30 = vpack.c.bf16 %v2344_v27, %v2342_v26 }
 0xefe   :  { %2489 = vmatmul.bf16.vlgmr.msra.gmra.mxu0 %v2345_v59  ;;  %2725 = vmatpush.bf16.msra.mxu3 %v3528_v22  ;;  %v3527_v59 = vld [vmem:[#allocation20 + $0x10] sm:$0xff] }
 0xeff   :  { %2503 = vmatmul.bf16.vlgmr.msrb.gmra.mxu1 %v2346_v30  ;;  %v3526_v30 = vld [vmem:[#allocation20 + $0x8] sm:$0xff] }
 0xf02   :  { %2726 = vmatpush.bf16.msra.mxu3 %v3527_v59 }
 0xf06   :  { %2727 = vmatpush.bf16.msra.mxu3 %v3526_v30 }
 0xf7b   :  { %v2490_v10 = vpop.f32.mrf.mxu0 }
 0xf7c   :  { %v2491_v33 = vadd.f32 %v3572_v32, %v2490_v10  ;;  %v2504_v34 = vpop.f32.mrf.mxu1  ;;  %v3575_v10 = vld [vmem:[%s4595_s17] ss:$0 sm:$0xff]  ;;  %s4624_s17 = sld [smem:[#allocation43_spill]] }
 0xf7e   :  { %v2505_v35 = vadd.f32 %v2504_v34, %v2491_v33 }
 0xf80   :  { %v2509_v36 = vadd.f32 %v2505_v35, %v4531_v23 }
 0xf82   :  { %2515 = vadd.xlane.f32.xlu2 %v2509_v36  ;;  %s2741_s23 = sshll.u32 %s4624_s17, 4  ;;  %s2742_s23 = int_to_ptr.hbm [resolvable:$true] %s2741_s23 }
 0xf83   :  { %v2492_v37 = vpop.f32.mrf.mxu0 }
 0xf84   :  { %v2493_v38 = vadd.f32 %v3572_v32, %v2492_v37  ;;  %v2506_v39 = vpop.f32.mrf.mxu1  ;;  %v3525_v32 = vld [vmem:[#allocation20] sm:$0xff] }
 0xf85   :  { %2728 = vmatpush.bf16.msra.mxu3 %v3525_v32 }
 0xf86   :  { %v2507_v41 = vadd.f32 %v2506_v39, %v2493_v38  ;;  %v3576_v38 = vld [vmem:[%s4625_s1] ss:$0 sm:$0xff] }
 0xf88   :  { %v2510_v29 = vadd.f32 %v2507_v41, %v4533_v25  ;;  %v3522_v25 = vld [vmem:[#allocation19 + $0x28] sm:$0xff] }
 0xf89   :  { %2639 = vmatpush.bf16.msrb.mxu2 %v3522_v25 }
 0xf8a   :  { %2517 = vadd.xlane.f32.xlu1 %v2510_v29 }
 0xf8d   :  { %2640 = vmatpush.bf16.msrb.mxu2 %v3521_v51 }
 0xf91   :  { %2641 = vmatpush.bf16.msrb.mxu2 %v3520_v52 }
 0xf95   :  { %2642 = vmatpush.bf16.msrb.mxu2 %v3519_v58 }
 0xf99   :  { %2643 = vmatpush.bf16.msrb.mxu2 %v3518_v54 }
 0xf9d   :  { %2644 = vmatpush.bf16.msrb.mxu2 %v3517_v62 }
 0xff5   :  { %v2516_v42 = vpop.xlane.xlu2 %2515 }
 0xff6   :  { %v2519_v43 = vmul.f32 %v2516_v42, %v4261_v8 }
 0xff8   :  { %v2521_v44 = vsub.f32 %v2509_v36, %v2519_v43 }
 0xffa   :  { %v2523_v45 = vmul.f32 %v2521_v44, %v2521_v44 }
 0xffc   :  { %2525 = vadd.xlane.f32.xlu2 %v2523_v45 }
 0xffd   :  { %v2518_v46 = vpop.xlane.xlu1 %2517 }
 0xffe   :  { %v2520_v48 = vmul.f32 %v2518_v46, %v4261_v8 }
0x1000   :  { %v4547_v49 = vsub.f32 %v2510_v29, %v2520_v48 }
0x1002   :  { %v2524_v23 = vmul.f32 %v4547_v49, %v4547_v49 }
0x1004   :  { %2527 = vadd.xlane.f32.xlu1 %v2524_v23 }
0x106f   :  { %v2526_v40 = vpop.xlane.xlu2 %2525 }
0x1070   :  { %v2529_v11 = vmul.f32 %v2526_v40, %v4261_v8 }
0x1072   :  { %v2531_v57 = vadd.f32 1e-12, %v2529_v11 }
0x1074   :  { %3675 = vrsqrt.f32 %v2531_v57  ;;  %vm2539_vm14 = vweird.f32 %v2531_v57 }
0x1077   :  { %v2528_v60 = vpop.xlane.xlu1 %2527 }
0x1078   :  { %v2530_v61 = vmul.f32 %v2528_v60, %v4261_v8  ;;  %v3573_v8 = vld [vmem:[%s4592_s14 + $0x1] ss:$0 sm:$0xff] }
0x107a   :  { %v3676_v63 = vpop.eup %3675  ;;  %v2532_v53 = vadd.f32 1e-12, %v2530_v61 }
0x107b   :  { %v2534_v0 = vmul.f32 %v3676_v63, %v2531_v57  ;;  %vm2540_vm13 = vweird.f32 %v3676_v63 }
0x107c   :  { %3677 = vrsqrt.f32 %v2532_v53  ;;  %vm2541_vm15 = vmor %vm2539_vm14, %vm2540_vm13  ;;  %vm2549_vm1 = vweird.f32 %v2532_v53 }
0x107d   :  { %v2535_v2 = vmul.f32 %v3676_v63, %v2534_v0 }
0x107f   :  { %v2536_v6 = vmul.f32 0.5, %v2535_v2 }
0x1081   :  { %v2537_v28 = vsub.f32 1.5, %v2536_v6 }
0x1082   :  { %v3678_v56 = vpop.eup %3677 }
0x1083   :  { %v2538_v15 = vmul.f32 %v3676_v63, %v2537_v28  ;;  %v2544_v31 = vmul.f32 %v3678_v56, %v2532_v53  ;;  %vm2550_vm0 = vweird.f32 %v3678_v56 }
0x1084   :  { %vm2551_vm2 = vmor %vm2549_vm1, %vm2550_vm0 }
0x1085   :  { %v2542_v18 = vsel %vm2541_vm15, %v3676_v63, %v2538_v15  ;;  %v2545_v1 = vmul.f32 %v3678_v56, %v2544_v31 }
0x1086   :  { %v2553_v7 = vmul.f32 %v2542_v18, %v2521_v44 }
0x1087   :  { %v2546_v13 = vmul.f32 0.5, %v2545_v1 }
0x1088   :  { %v2558_v16 = vmul.f32 %v3573_v8, %v2553_v7 }
0x1089   :  { %v2547_v19 = vsub.f32 1.5, %v2546_v13 }
0x108a   :  { %v2563_v20 = vadd.f32 %v3574_v55, %v2558_v16 }
0x108b   :  { %v2548_v21 = vmul.f32 %v3678_v56, %v2547_v19 }
0x108c   :  { %2565 = vst [vmem:[#allocation22] sm:$0xff] %v2563_v20 }
0x108d   :  { %v2552_v9 = vsel %vm2551_vm2, %v3678_v56, %v2548_v21 }
0x108e   :  { %v2554_v24 = vmul.f32 %v2552_v9, %v4547_v49 }
0x1090   :  { %v2559_v12 = vmul.f32 %v3573_v8, %v2554_v24 }
0x1092   :  { %v2564_v5 = vadd.f32 %v3574_v55, %v2559_v12 }
0x1094   :  { %2566 = vst [vmem:[#allocation22 + $0x8] sm:$0xff] %v2564_v5 }
0x1095   :  { %2747 = dma.vmem_to_hbm [thread:$0]  %s2740_s2, 256, %s2742_s23, [#allocation4], %s4620_s26, %s4620_s26, %s4063_s25  }
0x109b   :  { %v2567_v26 = vld [vmem:[#allocation22] ss:$8 sm:$0x3] }
0x109c   :  { %v2568_v27 = vpack.c.bf16 %v2567_v26, %v2567_v26 }
0x109e   :  { %2645 = vmatmul.bf16.vlgmr.msrb.gmra.mxu2 %v2568_v27 }
0x1121   :  { %v2646_v33 = vpop.f32.mrf.mxu2 }
0x1122   :  { %v2647_v34 = vadd.f32 %v3575_v10, %v2646_v33 }
0x1124   :  { %3679 = vtanh.f32 %v2647_v34 }
0x1129   :  { %v2648_v35 = vpop.f32.mrf.mxu2 }
0x112a   :  { %v3680_v36 = vpop.eup %3679 }
0x112b   :  { %2651 = vst [vmem:[#allocation23] sm:$0x3] %v3680_v36  ;;  %v2652_v37 = vpack.c.bf16 %v3680_v36, %v3680_v36 }
0x112c   :  { %2758 = dma.vmem_to_hbm [thread:$0]  %s2754_s12, 32, %s2756_s27, [#allocation24]  }
0x112d   :  { %2729 = vmatmul.bf16.vlgmr.msra.gmra.mxu3 %v2652_v37 }
0x11b0   :  { %v2730_v39 = vpop.f32.mrf.mxu3 }
0x11b1   :  { %v2731_v41 = vadd.f32 %v3576_v38, %v2730_v39 }
0x11b3   :  { %2734 = vst [vmem:[#allocation25] sm:$0x3] %v2731_v41 }
0x11b4   :  { %2769 = dma.vmem_to_hbm [thread:$0]  %s2765_s0, 32, %s2767_s9, [#allocation24]  }
0x11b8   :  { %v2732_v29 = vpop.f32.mrf.mxu3 }
0x11b9   :  { %4057 = dma.done.wait [#allocation4], 256  }
0x11ba   :  { %4058 = vsyncadd [#allocation4], 4294967040 }
0x11bb   :  { %4059 = dma.done.wait [#allocation24], 64  }
0x11bc   :  { %4060 = vsyncadd [#allocation24], 4294967232 }
0x11bd   :  { %2782 = vsyncpa [#allocation3], 1 }
0x11be   :  { %2783 = vsyncpa [#allocation6], 1 }
0x11bf   :  { %2784 = vsyncpa [#allocation9], 1 }
0x11c0   :  { %2785 = vsyncpa [#allocation12], 1 }
0x11c1   :  { %2786 = vsyncpa [#allocation15], 1 }
0x11c2   :  { %2787 = vsyncpa [#allocation18], 1 }
0x11c3   :  { %2788 = vsyncpa [#allocation21], 1 }
0x11c4   :  { %2789 = vsyncpa [#allocation4], 1 }
0x11c5   :  { %2790 = vsyncpa [#allocation24], 1 }

</bundles_post_ra>
